<compile_context>
chip_gen: v5e
topology: v5e:2x2
jax: 0.10.0
libtpu: 0.0.40
codegen_flags: <defaults>
</compile_context>

<pallas_src>
import jax
import jax.numpy as jnp
from jax.experimental import pallas as pl
from jax.experimental.pallas import tpu as pltpu

Z_DIM = 50
IN_DIM = 72
HID = 500
HID_PAD = 512      # 500 padded up to a 128-lane multiple
HEAD_PAD = 128     # fused mu||logvar head: 2*Z_DIM = 100 padded to 128
OUT_PAD = 128      # fc7 output: 72 padded to 128 for lane-dense stores


def vae_kernel(
    x_ref, eps_ref,
    w1, b1, w2, b2, w3, b3, wh, bh,
    w4, b4, w5, b5, w6, b6, w7, b7,
    recon_ref, head_ref,
):
    f32 = jnp.float32
    bf16 = jnp.bfloat16

    def linear(h, w_ref, b_ref):
        # bf16 x bf16 on the MXU, f32 accumulate, f32 bias add.
        return jnp.dot(h.astype(bf16), w_ref[...],
                       preferred_element_type=f32) + b_ref[...]

    def relu(h):
        return jnp.maximum(h, 0.0)

    x = x_ref[...].astype(f32)

    # ----- encode -----
    h = relu(linear(x, w1, b1))
    h = relu(linear(h, w2, b2))
    h = relu(linear(h, w3, b3))
    head = linear(h, wh, bh)                 # [TM, 128] = mu | logvar | zeros
    mu = head[:, :Z_DIM]
    logvar = head[:, Z_DIM:2 * Z_DIM]

    # ----- reparameterize (eps ~ Uniform[0,1), matching torch.rand_like) -----
    # Elementwise math deliberately kept in f32 (exp goes to the EUP slot and
    # hides under the MXU/DMA; v5e has no bf16 VPU anyway).
    std = jnp.exp(0.5 * logvar)
    z = mu + eps_ref[...].astype(f32) * std

    # ----- decode -----
    y = relu(linear(z, w4, b4))
    y = relu(linear(y, w5, b5))
    y = relu(linear(y, w6, b6))
    recon = linear(y, w7, b7)                # [TM, 128], cols 72.. are zero

    # Lane-dense (128-wide) stores only.
    recon_ref[...] = recon.astype(recon_ref.dtype)
    head_ref[...] = head.astype(head_ref.dtype)


def _round_up(n, m):
    return (n + m - 1) // m * m


@jax.jit
def vae_forward(x, eps, kernel_params):
    """x: [B, 72] f32, eps: [B, 50] f32, kernel_params: padded/fused bf16 weights."""
    B = x.shape[0]
    # Batch tiling: small batches run as a single tile (rounded to a sublane
    # multiple); large batches tile at 256 rows so the MXU M-dim is filled and
    # weights (DMA'd once, constant index_map) are amortized across tiles.
    if B <= 256:
        tm = _round_up(B, 8)
        b_pad = tm
    else:
        tm = 256               # 128 is also reasonable on v5e
        b_pad = _round_up(B, tm)
    n_tiles = b_pad // tm

    if b_pad != B:
        pad = ((0, b_pad - B), (0, 0))
        x = jnp.pad(x, pad)
        eps = jnp.pad(eps, pad)

    def row_spec(d):
        return pl.BlockSpec((tm, d), lambda i: (i, 0))

    def const_spec(arr):
        # Weights/biases: same block every grid step -> DMA'd once, VMEM-resident.
        return pl.BlockSpec(arr.shape, lambda i: (0, 0))

    in_specs = ([row_spec(IN_DIM), row_spec(Z_DIM)]
                + [const_spec(p) for p in kernel_params])
    out_specs = (row_spec(OUT_PAD), row_spec(HEAD_PAD))
    out_shapes = (
        jax.ShapeDtypeStruct((b_pad, OUT_PAD), jnp.float32),    # recon (padded)
        jax.ShapeDtypeStruct((b_pad, HEAD_PAD), jnp.float32),   # mu | logvar
    )

    # Only shard across TensorCores when there is real batch parallelism;
    # at a single tile it would just duplicate the weight DMA.
    semantics = ("parallel",) if n_tiles > 1 else ("arbitrary",)

    recon_pad, head = pl.pallas_call(
        vae_kernel,
        out_shape=out_shapes,
        grid_spec=pltpu.PrefetchScalarGridSpec(
            num_scalar_prefetch=0,
            grid=(n_tiles,),
            in_specs=in_specs,
            out_specs=out_specs,
        ),
        compiler_params=pltpu.CompilerParams(
            dimension_semantics=semantics,
            vmem_limit_bytes=16 << 20,
        ),
    )(x, eps, *kernel_params)

    recon = recon_pad[:B, :IN_DIM]
    mu = head[:B, :Z_DIM]
    logvar = head[:B, Z_DIM:2 * Z_DIM]
    return recon, mu, logvar


def init_raw_params(key):
    """Deterministic synthetic parameters with the module's layer shapes
    (stored [in, out] so the math is x @ W + b)."""
    dims = [
        (IN_DIM, HID),   # fc1
        (HID, HID),      # fc2
        (HID, HID),      # fc3
        (HID, Z_DIM),    # fc21
        (HID, Z_DIM),    # fc22
        (Z_DIM, HID),    # fc4
        (HID, HID),      # fc5
        (HID, HID),      # fc6
        (HID, IN_DIM),   # fc7
    ]
    params = []
    for i, (din, dout) in enumerate(dims):
        kw, kb = jax.random.split(jax.random.fold_in(key, i))
        scale = 1.0 / jnp.sqrt(jnp.float32(din))
        w = jax.random.uniform(kw, (din, dout), jnp.float32, -scale, scale)
        b = jax.random.uniform(kb, (1, dout), jnp.float32, -scale, scale)
        params += [w, b]
    return tuple(params)


def prepare_kernel_params(raw_params):
    """Host-side prep: pad hidden 500->512, fuse fc21/fc22 into one 128-wide
    head, pad fc7 output 72->128, cast weights to bf16 (biases stay f32).
    Zero padding is exact."""
    (w1, b1, w2, b2, w3, b3, w21, b21, w22, b22,
     w4, b4, w5, b5, w6, b6, w7, b7) = raw_params

    bf16 = jnp.bfloat16
    f32 = jnp.float32

    def pad_to(a, shape):
        return jnp.pad(a, [(0, t - s) for s, t in zip(a.shape, shape)])

    w1p = pad_to(w1, (IN_DIM, HID_PAD)).astype(bf16)
    b1p = pad_to(b1, (1, HID_PAD)).astype(f32)
    w2p = pad_to(w2, (HID_PAD, HID_PAD)).astype(bf16)
    b2p = pad_to(b2, (1, HID_PAD)).astype(f32)
    w3p = pad_to(w3, (HID_PAD, HID_PAD)).astype(bf16)
    b3p = pad_to(b3, (1, HID_PAD)).astype(f32)

    # Fused mu/logvar head: columns [0:50) = fc21, [50:100) = fc22, rest zero.
    wh = jnp.zeros((HID_PAD, HEAD_PAD), f32)
    wh = wh.at[:HID, :Z_DIM].set(w21).at[:HID, Z_DIM:2 * Z_DIM].set(w22)
    wh = wh.astype(bf16)
    bh = jnp.zeros((1, HEAD_PAD), f32)
    bh = bh.at[:, :Z_DIM].set(b21).at[:, Z_DIM:2 * Z_DIM].set(b22)

    w4p = pad_to(w4, (Z_DIM, HID_PAD)).astype(bf16)
    b4p = pad_to(b4, (1, HID_PAD)).astype(f32)
    w5p = pad_to(w5, (HID_PAD, HID_PAD)).astype(bf16)
    b5p = pad_to(b5, (1, HID_PAD)).astype(f32)
    w6p = pad_to(w6, (HID_PAD, HID_PAD)).astype(bf16)
    b6p = pad_to(b6, (1, HID_PAD)).astype(f32)
    # fc7 padded on both axes: rows 500->512 (contraction), cols 72->128 (lane-dense store).
    w7p = pad_to(w7, (HID_PAD, OUT_PAD)).astype(bf16)
    b7p = pad_to(b7, (1, OUT_PAD)).astype(f32)

    return (w1p, b1p, w2p, b2p, w3p, b3p, wh, bh,
            w4p, b4p, w5p, b5p, w6p, b6p, w7p, b7p)


def vae_reference(x, eps, raw_params):
    """Plain-JAX reference with the same bf16-weight/bf16-activation, f32-accum
    quantization as the kernel, for correctness checking."""
    (w1, b1, w2, b2, w3, b3, w21, b21, w22, b22,
     w4, b4, w5, b5, w6, b6, w7, b7) = raw_params
    bf16 = jnp.bfloat16

    def lin(h, w, b):
        return jnp.dot(h.astype(bf16), w.astype(bf16),
                       preferred_element_type=jnp.float32) + b

    relu = lambda v: jnp.maximum(v, 0.0)
    h = relu(lin(x, w1, b1))
    h = relu(lin(h, w2, b2))
    h = relu(lin(h, w3, b3))
    mu = lin(h, w21, b21)
    logvar = lin(h, w22, b22)
    z = mu + eps * jnp.exp(0.5 * logvar)
    y = relu(lin(z, w4, b4))
    y = relu(lin(y, w5, b5))
    y = relu(lin(y, w6, b6))
    return lin(y, w7, b7), mu, logvar


if __name__ == "__main__":
    key = jax.random.PRNGKey(0)
    k_x, k_eps, k_p = jax.random.split(key, 3)

    B = 8
    x = jax.random.normal(k_x, (B, IN_DIM), jnp.float32)
    # The spec's reparameterize uses torch.rand_like -> Uniform[0, 1).
    eps = jax.random.uniform(k_eps, (B, Z_DIM), jnp.float32)

    raw_params = init_raw_params(k_p)
    kernel_params = prepare_kernel_params(raw_params)

    # TODO(synk): for the production B=8 case, the remaining cost is launch
    # overhead + one-shot weight DMA; amortize by batching many samples per
    # call (the batch grid above already supports it).
    recon, mu, logvar = jax.block_until_ready(vae_forward(x, eps, kernel_params))

    r_ref, mu_ref, lv_ref = vae_reference(x, eps, raw_params)
    assert jnp.allclose(mu, mu_ref, atol=1e-2, rtol=1e-2)
    assert jnp.allclose(logvar, lv_ref, atol=1e-2, rtol=1e-2)
    assert jnp.allclose(recon, r_ref, atol=1e-2, rtol=1e-2)

    print("KERNEL_OK")
</pallas_src>

<mosaic_0001>
module attributes {stable_mosaic.version = 11 : i64} {
  func.func @vae_kernel(%arg0: i32, %arg1: memref<8x72xf32, #tpu.memory_space<vmem>>, %arg2: memref<8x50xf32, #tpu.memory_space<vmem>>, %arg3: memref<72x512xbf16, #tpu.memory_space<vmem>>, %arg4: memref<1x512xf32, #tpu.memory_space<vmem>>, %arg5: memref<512x512xbf16, #tpu.memory_space<vmem>>, %arg6: memref<1x512xf32, #tpu.memory_space<vmem>>, %arg7: memref<512x512xbf16, #tpu.memory_space<vmem>>, %arg8: memref<1x512xf32, #tpu.memory_space<vmem>>, %arg9: memref<512x128xbf16, #tpu.memory_space<vmem>>, %arg10: memref<1x128xf32, #tpu.memory_space<vmem>>, %arg11: memref<50x512xbf16, #tpu.memory_space<vmem>>, %arg12: memref<1x512xf32, #tpu.memory_space<vmem>>, %arg13: memref<512x512xbf16, #tpu.memory_space<vmem>>, %arg14: memref<1x512xf32, #tpu.memory_space<vmem>>, %arg15: memref<512x512xbf16, #tpu.memory_space<vmem>>, %arg16: memref<1x512xf32, #tpu.memory_space<vmem>>, %arg17: memref<512x128xbf16, #tpu.memory_space<vmem>>, %arg18: memref<1x128xf32, #tpu.memory_space<vmem>>, %arg19: memref<8x128xf32, #tpu.memory_space<vmem>>, %arg20: memref<8x128xf32, #tpu.memory_space<vmem>>) attributes {dimension_semantics = [#tpu.dimension_semantics<arbitrary>], iteration_bounds = array<i64: 1>, scalar_prefetch = 0 : i64, scratch_operands = 0 : i64, tpu.core_type = #tpu.core_type<tc>, window_params = [{transform_indices = @transform_0, window_bounds = array<i64: 8, 72>}, {transform_indices = @transform_1, window_bounds = array<i64: 8, 50>}, {pipeline_mode = #tpu.pipeline_mode<synchronous>, transform_indices = @transform_2, window_bounds = array<i64: 72, 512>}, {pipeline_mode = #tpu.pipeline_mode<synchronous>, transform_indices = @transform_3, window_bounds = array<i64: 1, 512>}, {pipeline_mode = #tpu.pipeline_mode<synchronous>, transform_indices = @transform_4, window_bounds = array<i64: 512, 512>}, {pipeline_mode = #tpu.pipeline_mode<synchronous>, transform_indices = @transform_5, window_bounds = array<i64: 1, 512>}, {pipeline_mode = #tpu.pipeline_mode<synchronous>, transform_indices = @transform_6, window_bounds = array<i64: 512, 512>}, {pipeline_mode = #tpu.pipeline_mode<synchronous>, transform_indices = @transform_7, window_bounds = array<i64: 1, 512>}, {pipeline_mode = #tpu.pipeline_mode<synchronous>, transform_indices = @transform_8, window_bounds = array<i64: 512, 128>}, {pipeline_mode = #tpu.pipeline_mode<synchronous>, transform_indices = @transform_9, window_bounds = array<i64: 1, 128>}, {pipeline_mode = #tpu.pipeline_mode<synchronous>, transform_indices = @transform_10, window_bounds = array<i64: 50, 512>}, {pipeline_mode = #tpu.pipeline_mode<synchronous>, transform_indices = @transform_11, window_bounds = array<i64: 1, 512>}, {pipeline_mode = #tpu.pipeline_mode<synchronous>, transform_indices = @transform_12, window_bounds = array<i64: 512, 512>}, {pipeline_mode = #tpu.pipeline_mode<synchronous>, transform_indices = @transform_13, window_bounds = array<i64: 1, 512>}, {pipeline_mode = #tpu.pipeline_mode<synchronous>, transform_indices = @transform_14, window_bounds = array<i64: 512, 512>}, {pipeline_mode = #tpu.pipeline_mode<synchronous>, transform_indices = @transform_15, window_bounds = array<i64: 1, 512>}, {pipeline_mode = #tpu.pipeline_mode<synchronous>, transform_indices = @transform_16, window_bounds = array<i64: 512, 128>}, {pipeline_mode = #tpu.pipeline_mode<synchronous>, transform_indices = @transform_17, window_bounds = array<i64: 1, 128>}, {transform_indices = @transform_18, window_bounds = array<i64: 8, 128>}, {transform_indices = @transform_19, window_bounds = array<i64: 8, 128>}]} {
    %c0 = arith.constant 0 : index
    %c0_0 = arith.constant 0 : index
    %0 = vector.load %arg1[%c0, %c0_0] : memref<8x72xf32, #tpu.memory_space<vmem>>, vector<8x72xf32>
    %1 = arith.truncf %0 : vector<8x72xf32> to vector<8x72xbf16>
    %c0_1 = arith.constant 0 : index
    %c0_2 = arith.constant 0 : index
    %2 = vector.load %arg3[%c0_1, %c0_2] : memref<72x512xbf16, #tpu.memory_space<vmem>>, vector<72x512xbf16>
    %cst = arith.constant dense<0.000000e+00> : vector<8x512xf32>
    %3 = tpu.matmul %1, %2, %cst {dimension_numbers = #tpu.dot_dimension_numbers<[1], [0], [0], [1], [0, 0, 1, 1], [], []>} : vector<8x72xbf16>, vector<72x512xbf16>, vector<8x512xf32> -> vector<8x512xf32>
    %c0_3 = arith.constant 0 : index
    %c0_4 = arith.constant 0 : index
    %4 = vector.load %arg4[%c0_3, %c0_4] : memref<1x512xf32, #tpu.memory_space<vmem>>, vector<1x512xf32>
    %5 = vector.broadcast %4 : vector<1x512xf32> to vector<8x512xf32>
    %6 = arith.addf %3, %5 : vector<8x512xf32>
    %cst_5 = arith.constant 0.000000e+00 : f32
    %7 = vector.broadcast %cst_5 : f32 to vector<8x512xf32>
    %8 = arith.maximumf %6, %7 : vector<8x512xf32>
    %9 = arith.truncf %8 : vector<8x512xf32> to vector<8x512xbf16>
    %c0_6 = arith.constant 0 : index
    %c0_7 = arith.constant 0 : index
    %10 = vector.load %arg5[%c0_6, %c0_7] : memref<512x512xbf16, #tpu.memory_space<vmem>>, vector<512x512xbf16>
    %cst_8 = arith.constant dense<0.000000e+00> : vector<8x512xf32>
    %11 = tpu.matmul %9, %10, %cst_8 {dimension_numbers = #tpu.dot_dimension_numbers<[1], [0], [0], [1], [0, 0, 1, 1], [], []>} : vector<8x512xbf16>, vector<512x512xbf16>, vector<8x512xf32> -> vector<8x512xf32>
    %c0_9 = arith.constant 0 : index
    %c0_10 = arith.constant 0 : index
    %12 = vector.load %arg6[%c0_9, %c0_10] : memref<1x512xf32, #tpu.memory_space<vmem>>, vector<1x512xf32>
    %13 = vector.broadcast %12 : vector<1x512xf32> to vector<8x512xf32>
    %14 = arith.addf %11, %13 : vector<8x512xf32>
    %cst_11 = arith.constant 0.000000e+00 : f32
    %15 = vector.broadcast %cst_11 : f32 to vector<8x512xf32>
    %16 = arith.maximumf %14, %15 : vector<8x512xf32>
    %17 = arith.truncf %16 : vector<8x512xf32> to vector<8x512xbf16>
    %c0_12 = arith.constant 0 : index
    %c0_13 = arith.constant 0 : index
    %18 = vector.load %arg7[%c0_12, %c0_13] : memref<512x512xbf16, #tpu.memory_space<vmem>>, vector<512x512xbf16>
    %cst_14 = arith.constant dense<0.000000e+00> : vector<8x512xf32>
    %19 = tpu.matmul %17, %18, %cst_14 {dimension_numbers = #tpu.dot_dimension_numbers<[1], [0], [0], [1], [0, 0, 1, 1], [], []>} : vector<8x512xbf16>, vector<512x512xbf16>, vector<8x512xf32> -> vector<8x512xf32>
    %c0_15 = arith.constant 0 : index
    %c0_16 = arith.constant 0 : index
    %20 = vector.load %arg8[%c0_15, %c0_16] : memref<1x512xf32, #tpu.memory_space<vmem>>, vector<1x512xf32>
    %21 = vector.broadcast %20 : vector<1x512xf32> to vector<8x512xf32>
    %22 = arith.addf %19, %21 : vector<8x512xf32>
    %cst_17 = arith.constant 0.000000e+00 : f32
    %23 = vector.broadcast %cst_17 : f32 to vector<8x512xf32>
    %24 = arith.maximumf %22, %23 : vector<8x512xf32>
    %25 = arith.truncf %24 : vector<8x512xf32> to vector<8x512xbf16>
    %c0_18 = arith.constant 0 : index
    %c0_19 = arith.constant 0 : index
    %26 = vector.load %arg9[%c0_18, %c0_19] : memref<512x128xbf16, #tpu.memory_space<vmem>>, vector<512x128xbf16>
    %cst_20 = arith.constant dense<0.000000e+00> : vector<8x128xf32>
    %27 = tpu.matmul %25, %26, %cst_20 {dimension_numbers = #tpu.dot_dimension_numbers<[1], [0], [0], [1], [0, 0, 1, 1], [], []>} : vector<8x512xbf16>, vector<512x128xbf16>, vector<8x128xf32> -> vector<8x128xf32>
    %c0_21 = arith.constant 0 : index
    %c0_22 = arith.constant 0 : index
    %28 = vector.load %arg10[%c0_21, %c0_22] : memref<1x128xf32, #tpu.memory_space<vmem>>, vector<1x128xf32>
    %29 = vector.broadcast %28 : vector<1x128xf32> to vector<8x128xf32>
    %30 = arith.addf %27, %29 : vector<8x128xf32>
    %31 = vector.extract_strided_slice %30 {offsets = [0, 0], sizes = [8, 50], strides = [1, 1]} : vector<8x128xf32> to vector<8x50xf32>
    %32 = vector.extract_strided_slice %30 {offsets = [0, 50], sizes = [8, 50], strides = [1, 1]} : vector<8x128xf32> to vector<8x50xf32>
    %cst_23 = arith.constant 5.000000e-01 : f32
    %33 = vector.broadcast %cst_23 : f32 to vector<8x50xf32>
    %34 = arith.mulf %33, %32 : vector<8x50xf32>
    %35 = math.exp %34 : vector<8x50xf32>
    %c0_24 = arith.constant 0 : index
    %c0_25 = arith.constant 0 : index
    %36 = vector.load %arg2[%c0_24, %c0_25] : memref<8x50xf32, #tpu.memory_space<vmem>>, vector<8x50xf32>
    %37 = arith.mulf %36, %35 : vector<8x50xf32>
    %38 = arith.addf %31, %37 : vector<8x50xf32>
    %39 = arith.truncf %38 : vector<8x50xf32> to vector<8x50xbf16>
    %c0_26 = arith.constant 0 : index
    %c0_27 = arith.constant 0 : index
    %40 = vector.load %arg11[%c0_26, %c0_27] : memref<50x512xbf16, #tpu.memory_space<vmem>>, vector<50x512xbf16>
    %cst_28 = arith.constant dense<0.000000e+00> : vector<8x512xf32>
    %41 = tpu.matmul %39, %40, %cst_28 {dimension_numbers = #tpu.dot_dimension_numbers<[1], [0], [0], [1], [0, 0, 1, 1], [], []>} : vector<8x50xbf16>, vector<50x512xbf16>, vector<8x512xf32> -> vector<8x512xf32>
    %c0_29 = arith.constant 0 : index
    %c0_30 = arith.constant 0 : index
    %42 = vector.load %arg12[%c0_29, %c0_30] : memref<1x512xf32, #tpu.memory_space<vmem>>, vector<1x512xf32>
    %43 = vector.broadcast %42 : vector<1x512xf32> to vector<8x512xf32>
    %44 = arith.addf %41, %43 : vector<8x512xf32>
    %cst_31 = arith.constant 0.000000e+00 : f32
    %45 = vector.broadcast %cst_31 : f32 to vector<8x512xf32>
    %46 = arith.maximumf %44, %45 : vector<8x512xf32>
    %47 = arith.truncf %46 : vector<8x512xf32> to vector<8x512xbf16>
    %c0_32 = arith.constant 0 : index
    %c0_33 = arith.constant 0 : index
    %48 = vector.load %arg13[%c0_32, %c0_33] : memref<512x512xbf16, #tpu.memory_space<vmem>>, vector<512x512xbf16>
    %cst_34 = arith.constant dense<0.000000e+00> : vector<8x512xf32>
    %49 = tpu.matmul %47, %48, %cst_34 {dimension_numbers = #tpu.dot_dimension_numbers<[1], [0], [0], [1], [0, 0, 1, 1], [], []>} : vector<8x512xbf16>, vector<512x512xbf16>, vector<8x512xf32> -> vector<8x512xf32>
    %c0_35 = arith.constant 0 : index
    %c0_36 = arith.constant 0 : index
    %50 = vector.load %arg14[%c0_35, %c0_36] : memref<1x512xf32, #tpu.memory_space<vmem>>, vector<1x512xf32>
    %51 = vector.broadcast %50 : vector<1x512xf32> to vector<8x512xf32>
    %52 = arith.addf %49, %51 : vector<8x512xf32>
    %cst_37 = arith.constant 0.000000e+00 : f32
    %53 = vector.broadcast %cst_37 : f32 to vector<8x512xf32>
    %54 = arith.maximumf %52, %53 : vector<8x512xf32>
    %55 = arith.truncf %54 : vector<8x512xf32> to vector<8x512xbf16>
    %c0_38 = arith.constant 0 : index
    %c0_39 = arith.constant 0 : index
    %56 = vector.load %arg15[%c0_38, %c0_39] : memref<512x512xbf16, #tpu.memory_space<vmem>>, vector<512x512xbf16>
    %cst_40 = arith.constant dense<0.000000e+00> : vector<8x512xf32>
    %57 = tpu.matmul %55, %56, %cst_40 {dimension_numbers = #tpu.dot_dimension_numbers<[1], [0], [0], [1], [0, 0, 1, 1], [], []>} : vector<8x512xbf16>, vector<512x512xbf16>, vector<8x512xf32> -> vector<8x512xf32>
    %c0_41 = arith.constant 0 : index
    %c0_42 = arith.constant 0 : index
    %58 = vector.load %arg16[%c0_41, %c0_42] : memref<1x512xf32, #tpu.memory_space<vmem>>, vector<1x512xf32>
    %59 = vector.broadcast %58 : vector<1x512xf32> to vector<8x512xf32>
    %60 = arith.addf %57, %59 : vector<8x512xf32>
    %cst_43 = arith.constant 0.000000e+00 : f32
    %61 = vector.broadcast %cst_43 : f32 to vector<8x512xf32>
    %62 = arith.maximumf %60, %61 : vector<8x512xf32>
    %63 = arith.truncf %62 : vector<8x512xf32> to vector<8x512xbf16>
    %c0_44 = arith.constant 0 : index
    %c0_45 = arith.constant 0 : index
    %64 = vector.load %arg17[%c0_44, %c0_45] : memref<512x128xbf16, #tpu.memory_space<vmem>>, vector<512x128xbf16>
    %cst_46 = arith.constant dense<0.000000e+00> : vector<8x128xf32>
    %65 = tpu.matmul %63, %64, %cst_46 {dimension_numbers = #tpu.dot_dimension_numbers<[1], [0], [0], [1], [0, 0, 1, 1], [], []>} : vector<8x512xbf16>, vector<512x128xbf16>, vector<8x128xf32> -> vector<8x128xf32>
    %c0_47 = arith.constant 0 : index
    %c0_48 = arith.constant 0 : index
    %66 = vector.load %arg18[%c0_47, %c0_48] : memref<1x128xf32, #tpu.memory_space<vmem>>, vector<1x128xf32>
    %67 = vector.broadcast %66 : vector<1x128xf32> to vector<8x128xf32>
    %68 = arith.addf %65, %67 : vector<8x128xf32>
    %c0_49 = arith.constant 0 : index
    %c0_50 = arith.constant 0 : index
    %69 = vector.load %arg19[%c0_49, %c0_50] : memref<8x128xf32, #tpu.memory_space<vmem>>, vector<8x128xf32>
    tpu.vector_store %arg19[%c0_49, %c0_50], %68 {strides = array<i32>} : memref<8x128xf32, #tpu.memory_space<vmem>>, vector<8x128xf32>,
    %c0_51 = arith.constant 0 : index
    %c0_52 = arith.constant 0 : index
    %70 = vector.load %arg20[%c0_51, %c0_52] : memref<8x128xf32, #tpu.memory_space<vmem>>, vector<8x128xf32>
    tpu.vector_store %arg20[%c0_51, %c0_52], %30 {strides = array<i32>} : memref<8x128xf32, #tpu.memory_space<vmem>>, vector<8x128xf32>,
    return
  }
  func.func @transform_0(%arg0: i32) -> (i32, i32) {
    %c0_i32 = arith.constant 0 : i32
    %c0_i32_0 = arith.constant 0 : i32
    return %arg0, %c0_i32 : i32, i32
  }
  func.func @transform_1(%arg0: i32) -> (i32, i32) {
    %c0_i32 = arith.constant 0 : i32
    %c0_i32_0 = arith.constant 0 : i32
    return %arg0, %c0_i32 : i32, i32
  }
  func.func @transform_2(%arg0: i32) -> (i32, i32) {
    %c0_i32 = arith.constant 0 : i32
    %c0_i32_0 = arith.constant 0 : i32
    %c0_i32_1 = arith.constant 0 : i32
    return %c0_i32, %c0_i32_0 : i32, i32
  }
  func.func @transform_3(%arg0: i32) -> (i32, i32) {
    %c0_i32 = arith.constant 0 : i32
    %c0_i32_0 = arith.constant 0 : i32
    %c0_i32_1 = arith.constant 0 : i32
    return %c0_i32, %c0_i32_0 : i32, i32
  }
  func.func @transform_4(%arg0: i32) -> (i32, i32) {
    %c0_i32 = arith.constant 0 : i32
    %c0_i32_0 = arith.constant 0 : i32
    %c0_i32_1 = arith.constant 0 : i32
    return %c0_i32, %c0_i32_0 : i32, i32
  }
  func.func @transform_5(%arg0: i32) -> (i32, i32) {
    %c0_i32 = arith.constant 0 : i32
    %c0_i32_0 = arith.constant 0 : i32
    %c0_i32_1 = arith.constant 0 : i32
    return %c0_i32, %c0_i32_0 : i32, i32
  }
  func.func @transform_6(%arg0: i32) -> (i32, i32) {
    %c0_i32 = arith.constant 0 : i32
    %c0_i32_0 = arith.constant 0 : i32
    %c0_i32_1 = arith.constant 0 : i32
    return %c0_i32, %c0_i32_0 : i32, i32
  }
  func.func @transform_7(%arg0: i32) -> (i32, i32) {
    %c0_i32 = arith.constant 0 : i32
    %c0_i32_0 = arith.constant 0 : i32
    %c0_i32_1 = arith.constant 0 : i32
    return %c0_i32, %c0_i32_0 : i32, i32
  }
  func.func @transform_8(%arg0: i32) -> (i32, i32) {
    %c0_i32 = arith.constant 0 : i32
    %c0_i32_0 = arith.constant 0 : i32
    %c0_i32_1 = arith.constant 0 : i32
    return %c0_i32, %c0_i32_0 : i32, i32
  }
  func.func @transform_9(%arg0: i32) -> (i32, i32) {
    %c0_i32 = arith.constant 0 : i32
    %c0_i32_0 = arith.constant 0 : i32
    %c0_i32_1 = arith.constant 0 : i32
    return %c0_i32, %c0_i32_0 : i32, i32
  }
  func.func @transform_10(%arg0: i32) -> (i32, i32) {
    %c0_i32 = arith.constant 0 : i32
    %c0_i32_0 = arith.constant 0 : i32
    %c0_i32_1 = arith.constant 0 : i32
    return %c0_i32, %c0_i32_0 : i32, i32
  }
  func.func @transform_11(%arg0: i32) -> (i32, i32) {
    %c0_i32 = arith.constant 0 : i32
    %c0_i32_0 = arith.constant 0 : i32
    %c0_i32_1 = arith.constant 0 : i32
    return %c0_i32, %c0_i32_0 : i32, i32
  }
  func.func @transform_12(%arg0: i32) -> (i32, i32) {
    %c0_i32 = arith.constant 0 : i32
    %c0_i32_0 = arith.constant 0 : i32
    %c0_i32_1 = arith.constant 0 : i32
    return %c0_i32, %c0_i32_0 : i32, i32
  }
  func.func @transform_13(%arg0: i32) -> (i32, i32) {
    %c0_i32 = arith.constant 0 : i32
    %c0_i32_0 = arith.constant 0 : i32
    %c0_i32_1 = arith.constant 0 : i32
    return %c0_i32, %c0_i32_0 : i32, i32
  }
  func.func @transform_14(%arg0: i32) -> (i32, i32) {
    %c0_i32 = arith.constant 0 : i32
    %c0_i32_0 = arith.constant 0 : i32
    %c0_i32_1 = arith.constant 0 : i32
    return %c0_i32, %c0_i32_0 : i32, i32
  }
  func.func @transform_15(%arg0: i32) -> (i32, i32) {
    %c0_i32 = arith.constant 0 : i32
    %c0_i32_0 = arith.constant 0 : i32
    %c0_i32_1 = arith.constant 0 : i32
    return %c0_i32, %c0_i32_0 : i32, i32
  }
  func.func @transform_16(%arg0: i32) -> (i32, i32) {
    %c0_i32 = arith.constant 0 : i32
    %c0_i32_0 = arith.constant 0 : i32
    %c0_i32_1 = arith.constant 0 : i32
    return %c0_i32, %c0_i32_0 : i32, i32
  }
  func.func @transform_17(%arg0: i32) -> (i32, i32) {
    %c0_i32 = arith.constant 0 : i32
    %c0_i32_0 = arith.constant 0 : i32
    %c0_i32_1 = arith.constant 0 : i32
    return %c0_i32, %c0_i32_0 : i32, i32
  }
  func.func @transform_18(%arg0: i32) -> (i32, i32) {
    %c0_i32 = arith.constant 0 : i32
    %c0_i32_0 = arith.constant 0 : i32
    return %arg0, %c0_i32 : i32, i32
  }
  func.func @transform_19(%arg0: i32) -> (i32, i32) {
    %c0_i32 = arith.constant 0 : i32
    %c0_i32_0 = arith.constant 0 : i32
    return %arg0, %c0_i32 : i32, i32
  }
}

</mosaic_0001>

<bundles_post_ra>
// kernel: vae_forward.1
= control target key start
LH: loop header
LB: loop body
LE: loop exit
PB: predicated region body
PF: predicated region fallthrough
CT: control target
= control target key end

     0   :  { %s9077_s0 = inlined_call_operand.hbm [shape: f32[8,72], index: 0, kind: input, shape index: {}]   ;;  %s9078_s1 = inlined_call_operand.hbm [shape: f32[8,50], index: 1, kind: input, shape index: {}]   ;;  %s9079_s2 = inlined_call_operand.hbm [shape: bf16[72,512], index: 2, kind: input, shape index: {}]   ;;  %s9080_s3 = inlined_call_operand.hbm [shape: f32[1,512], index: 3, kind: input, shape index: {}]   ;;  %s9081_s4 = inlined_call_operand.hbm [shape: bf16[512,512], index: 4, kind: input, shape index: {}]   ;;  %s9082_s5 = inlined_call_operand.vmem [shape: f32[1,512], index: 5, kind: input, shape index: {}]   ;;  %s9083_s6 = inlined_call_operand.hbm [shape: bf16[512,512], index: 6, kind: input, shape index: {}]   ;;  %s9084_s7 = inlined_call_operand.hbm [shape: f32[1,512], index: 7, kind: input, shape index: {}]   ;;  %s9085_s8 = inlined_call_operand.hbm [shape: bf16[512,128], index: 8, kind: input, shape index: {}]   ;;  %s9086_s9 = inlined_call_operand.hbm [shape: f32[1,128], index: 9, kind: input, shape index: {}]   ;;  %s9087_s10 = inlined_call_operand.hbm [shape: bf16[50,512], index: 10, kind: input, shape index: {}]   ;;  %s9088_s11 = inlined_call_operand.vmem [shape: f32[1,512], index: 11, kind: input, shape index: {}]   ;;  %s9089_s12 = inlined_call_operand.hbm [shape: bf16[512,512], index: 12, kind: input, shape index: {}]   ;;  %s9090_s13 = inlined_call_operand.vmem [shape: f32[1,512], index: 13, kind: input, shape index: {}]   ;;  %s9091_s14 = inlined_call_operand.hbm [shape: bf16[512,512], index: 14, kind: input, shape index: {}]   ;;  %s9092_s15 = inlined_call_operand.hbm [shape: f32[1,512], index: 15, kind: input, shape index: {}]   ;;  %s9093_s16 = inlined_call_operand.hbm [shape: bf16[512,128], index: 16, kind: input, shape index: {}]   ;;  %s9094_s17 = inlined_call_operand.vmem [shape: f32[1,128], index: 17, kind: input, shape index: {}]   ;;  %s9095_s18 = inlined_call_operand.hbm [shape: f32[8,128], index: 18, kind: output, shape index: {0}]   ;;  %s9096_s19 = inlined_call_operand.vmem [shape: f32[8,128], index: 19, kind: output, shape index: {1}]  }
   0x1   :  { %9097 = sst [smem:[#allocation35_spill]] %s9077_s0 }
   0x2   :  { %9098 = sst [smem:[#allocation36_spill]] %s9078_s1 }
   0x3   :  { %9099 = sst [smem:[#allocation37_spill]] %s9079_s2 }
   0x4   :  { %9100 = sst [smem:[#allocation38_spill]] %s9080_s3 }
   0x5   :  { %9101 = sst [smem:[#allocation39_spill]] %s9095_s18 }
   0x6   :  { %25 = vsyncpa [#allocation3], 0 }
   0x7   :  { %26 = vsyncpa [#allocation6], 0 }
   0x8   :  { %27 = vsyncpa [#allocation9], 0 }
   0x9   :  { %28 = vsyncpa [#allocation12], 0 }
   0xa   :  { %29 = vsyncpa [#allocation15], 0 }
   0xb   :  { %30 = vsyncpa [#allocation18], 0 }
   0xc   :  { %31 = vsyncpa [#allocation21], 0 }
   0xd   :  { %32 = vsyncpa [#allocation24], 0  ;;  %s9102_s20 = sld [smem:[#allocation36_spill]] }
  0x13   :  { %s50_s21 = sshll.u32 %s9102_s20, 4  ;;  %s51_s21 = int_to_ptr.hbm [resolvable:$true] %s50_s21 }
  0x14   :  { %33 = vsyncpa [#allocation4], 0  ;;  %s8708_s1 = smov [#allocation5]   ;;  %s9103_s24 = sld [smem:[#allocation38_spill]] }
  0x15   :  { %s52_s22 = sshll.u32 %s8708_s1, 4  ;;  %s8709_s3 = smov [#allocation8]   ;;  %s53_s22 = int_to_ptr.vmem [resolvable:$true] %s52_s22 }
  0x16   :  { %55 = dma.hbm_to_vmem [thread:$0]  %s51_s21, 128, %s53_s22, [#allocation6]  }
  0x17   :  { %s76_s26 = sshll.u32 %s8709_s3, 4  ;;  %s99_s29 = sshll.u32 %s9083_s6, 4  ;;  %s77_s26 = int_to_ptr.vmem [resolvable:$true] %s76_s26  ;;  %s100_s29 = int_to_ptr.hbm [resolvable:$true] %s99_s29 }
  0x18   :  { %s8710_s0 = smov [#allocation11]   ;;  %s123_s18 = sshll.u32 %s9085_s8, 4  ;;  %s124_s18 = int_to_ptr.hbm [resolvable:$true] %s123_s18 }
  0x19   :  { %s101_s30 = sshll.u32 %s8710_s0, 4  ;;  %s8711_s2 = smov 256   ;;  %s102_s30 = int_to_ptr.vmem [resolvable:$true] %s101_s30 }
  0x1a   :  { %s74_s25 = sshll.u32 %s9103_s24, 4  ;;  %s8712_s23 = smov 16   ;;  %s75_s25 = int_to_ptr.hbm [resolvable:$true] %s74_s25 }
  0x1b   :  { %79 = dma.hbm_to_vmem [thread:$0]  %s75_s25, 64, %s77_s26, [#allocation9]  }
  0x1c   :  { %107 = dma.hbm_to_vmem [thread:$0]  %s100_s29, 16384, %s102_s30, [#allocation12], %s8711_s2, %s8711_s2, %s8712_s23  }
  0x1d   :  { %s8713_s21 = smov [#allocation14]   ;;  %s8714_s24 = smov 64  }
  0x1e   :  { %s125_s22 = sshll.u32 %s8713_s21, 4  ;;  %s8715_s6 = smov 4   ;;  %s126_s22 = int_to_ptr.vmem [resolvable:$true] %s125_s22 }
  0x1f   :  { %131 = dma.hbm_to_vmem [thread:$0]  %s124_s18, 4096, %s126_s22, [#allocation15], %s8714_s24, %s8714_s24, %s8715_s6  }
  0x20   :  { %s147_s8 = sshll.u32 %s9087_s10, 4  ;;  %s8716_s26 = smov [#allocation17]   ;;  %s148_s8 = int_to_ptr.hbm [resolvable:$true] %s147_s8 }
  0x21   :  { %s149_s27 = sshll.u32 %s8716_s26, 4  ;;  %s177_s0 = sshll.u32 %s9091_s14, 4  ;;  %s150_s27 = int_to_ptr.vmem [resolvable:$true] %s149_s27  ;;  %s178_s0 = int_to_ptr.hbm [resolvable:$true] %s177_s0 }
  0x22   :  { %155 = dma.hbm_to_vmem [thread:$0]  %s148_s8, 1792, %s150_s27, [#allocation18], %s8711_s2, %s8711_s2, %s8712_s23  }
  0x23   :  { %s8717_s30 = smov [#allocation20]   ;;  %s9104_s21 = sld [smem:[#allocation35_spill]] }
  0x24   :  { %s179_s20 = sshll.u32 %s8717_s30, 4  ;;  %s9105_s14 = sld [smem:[#allocation37_spill]]  ;;  %s180_s20 = int_to_ptr.vmem [resolvable:$true] %s179_s20 }
  0x25   :  { %185 = dma.hbm_to_vmem [thread:$0]  %s178_s0, 16384, %s180_s20, [#allocation21], %s8711_s2, %s8711_s2, %s8712_s23  }
  0x26   :  { %s8718_s26 = smov [#allocation2]   ;;  %s8719_s8 = smov [#allocation7]  }
  0x27   :  { %s41_s28 = sshll.u32 %s8718_s26, 4  ;;  %s62_s27 = sshll.u32 %s8719_s8, 4  ;;  %s42_s28 = int_to_ptr.vmem [resolvable:$true] %s41_s28  ;;  %s63_s27 = int_to_ptr.vmem [resolvable:$true] %s62_s27 }
  0x28   :  { %s84_s18 = sshll.u32 %s9081_s4, 4  ;;  %s113_s1 = sshll.u32 %s9084_s7, 4  ;;  %s85_s18 = int_to_ptr.hbm [resolvable:$true] %s84_s18  ;;  %s114_s1 = int_to_ptr.hbm [resolvable:$true] %s113_s1 }
  0x29   :  { %s39_s22 = sshll.u32 %s9104_s21, 4  ;;  %s8720_s21 = smov [#allocation10]   ;;  %s40_s22 = int_to_ptr.hbm [resolvable:$true] %s39_s22 }
  0x2a   :  { %s60_s3 = sshll.u32 %s9105_s14, 4  ;;  %s86_s10 = sshll.u32 %s8720_s21, 4  ;;  %s61_s3 = int_to_ptr.hbm [resolvable:$true] %s60_s3  ;;  %s87_s10 = int_to_ptr.vmem [resolvable:$true] %s86_s10 }
  0x2b   :  { %44 = dma.hbm_to_vmem [thread:$0]  %s40_s22, 128, %s42_s28, [#allocation3]  }
  0x2c   :  { %68 = dma.hbm_to_vmem [thread:$0]  %s61_s3, 2304, %s63_s27, [#allocation6], %s8711_s2, %s8711_s2, %s8712_s23  }
  0x2d   :  { %92 = dma.hbm_to_vmem [thread:$0]  %s85_s18, 16384, %s87_s10, [#allocation9], %s8711_s2, %s8711_s2, %s8712_s23  }
  0x2e   :  { %s8721_s22 = smov [#allocation13]   ;;  %s137_s26 = sshll.u32 %s9086_s9, 4  ;;  %s138_s26 = int_to_ptr.hbm [resolvable:$true] %s137_s26 }
  0x2f   :  { %s115_s4 = sshll.u32 %s8721_s22, 4  ;;  %s162_s7 = sshll.u32 %s9089_s12, 4  ;;  %s116_s4 = int_to_ptr.vmem [resolvable:$true] %s115_s4  ;;  %s163_s7 = int_to_ptr.hbm [resolvable:$true] %s162_s7 }
  0x30   :  { %118 = dma.hbm_to_vmem [thread:$0]  %s114_s1, 64, %s116_s4, [#allocation12]  }
  0x31   :  { %s8722_s8 = smov [#allocation16]   ;;  %s8723_s29 = smov [#allocation19]  }
  0x32   :  { %s139_s27 = sshll.u32 %s8722_s8, 4  ;;  %s164_s30 = sshll.u32 %s8723_s29, 4  ;;  %s140_s27 = int_to_ptr.vmem [resolvable:$true] %s139_s27  ;;  %s165_s30 = int_to_ptr.vmem [resolvable:$true] %s164_s30 }
  0x33   :  { %142 = dma.hbm_to_vmem [thread:$0]  %s138_s26, 16, %s140_s27, [#allocation15]  }
  0x34   :  { %s191_s20 = sshll.u32 %s9092_s15, 4  ;;  %s201_s12 = sshll.u32 %s9093_s16, 4  ;;  %s192_s20 = int_to_ptr.hbm [resolvable:$true] %s191_s20  ;;  %s202_s12 = int_to_ptr.hbm [resolvable:$true] %s201_s12 }
  0x35   :  { %170 = dma.hbm_to_vmem [thread:$0]  %s163_s7, 16384, %s165_s30, [#allocation18], %s8711_s2, %s8711_s2, %s8712_s23  }
  0x36   :  { %s8724_s21 = smov [#allocation22]   ;;  %s8725_s22 = smov [#allocation23]  }
  0x37   :  { %s193_s10 = sshll.u32 %s8724_s21, 4  ;;  %s203_s4 = sshll.u32 %s8725_s22, 4  ;;  %s194_s10 = int_to_ptr.vmem [resolvable:$true] %s193_s10  ;;  %s204_s4 = int_to_ptr.vmem [resolvable:$true] %s203_s4 }
  0x38   :  { %196 = dma.hbm_to_vmem [thread:$0]  %s192_s20, 64, %s194_s10, [#allocation21]  }
  0x39   :  { %209 = dma.hbm_to_vmem [thread:$0]  %s202_s12, 4096, %s204_s4, [#allocation24], %s8714_s24, %s8714_s24, %s8715_s6  }
  0x3a   :  { %8690 = dma.done.wait [#allocation3], 128  }
  0x3b   :  { %8691 = vsyncadd [#allocation3], 4294967168 }
  0x3c   :  { %8692 = dma.done.wait [#allocation6], 2432  }
  0x3d   :  { %8693 = vsyncadd [#allocation6], 4294964864 }
  0x3e   :  { %8694 = dma.done.wait [#allocation9], 16448  }
  0x3f   :  { %8695 = vsyncadd [#allocation9], 4294950848 }
  0x40   :  { %8696 = dma.done.wait [#allocation12], 16448  }
  0x41   :  { %8697 = vsyncadd [#allocation12], 4294950848 }
  0x42   :  { %8698 = dma.done.wait [#allocation15], 4112  }
  0x43   :  { %8699 = vsyncadd [#allocation15], 4294963184 }
  0x44   :  { %8700 = dma.done.wait [#allocation18], 18176  }
  0x45   :  { %8701 = vsyncadd [#allocation18], 4294949120 }
  0x46   :  { %8702 = dma.done.wait [#allocation21], 16448  }
  0x47   :  { %8703 = vsyncadd [#allocation21], 4294950848 }
  0x48   :  { %8704 = dma.done.wait [#allocation24], 4096  }
  0x49   :  { %8705 = vsyncadd [#allocation24], 4294963200  ;;  %v287_v0 = vld [vmem:[#allocation7 + $0x80] sm:$0xff]  ;;  %v288_v1 = vld [vmem:[#allocation7 + $0x88] sm:$0xff]  ;;  %vm393_vm0 = vcmask 1043456   ;;  %vm389_vm1 = vcmask 588800  }
  0x4a   :  { %v349_v2 = vunpack.c.l.b16 %v287_v0  ;;  %v350_v3 = vunpack.c.h.b16 %v287_v0  ;;  %v351_v4 = vunpack.c.l.b16 %v288_v1  ;;  %v352_v5 = vunpack.c.h.b16 %v288_v1  ;;  %v5328_v6 = vld [vmem:[#allocation7 + $0x60] sm:$0xf]  ;;  %v7716_v7 = vld [vmem:[#allocation7 + $0x6c] sm:$0xf0]  ;;  %v7714_v12 = vld [vmem:[#allocation7 + $0x64] sm:$0xf] }
  0x4b   :  { %v5330_v13 = vld [vmem:[#allocation7 + $0x70] sm:$0xf0]  ;;  %v5336_v14 = vld [vmem:[#allocation7 + $0x68] sm:$0xf]  ;;  %v7717_v15 = vld [vmem:[#allocation7 + $0x74] sm:$0xf0]  ;;  %v5329_v22 = vor.u32 %v7716_v7, %v5328_v6 }
  0x4c   :  { %v369_v8 = vpack.c.b16 %v349_v2, %v349_v2  ;;  %v370_v9 = vpack.c.b16 %v350_v3, %v350_v3  ;;  %v371_v10 = vpack.c.b16 %v351_v4, %v351_v4  ;;  %v372_v11 = vpack.c.b16 %v352_v5, %v352_v5  ;;  %v7715_v16 = vld [vmem:[#allocation7 + $0x6c] sm:$0xf]  ;;  %v5338_v17 = vld [vmem:[#allocation7 + $0x78] sm:$0xf0]  ;;  %v5312_v24 = vld [vmem:[#allocation7 + $0x40] sm:$0xf] }
  0x4d   :  { %v5333_v23 = vor.u32 %v7714_v12, %v5330_v13  ;;  %v7712_v25 = vld [vmem:[#allocation7 + $0x4c] sm:$0xf0]  ;;  %v5337_v26 = vor.u32 %v7717_v15, %v5336_v14  ;;  %v5341_v27 = vor.u32 %v7715_v16, %v5338_v17  ;;  %v7710_v28 = vld [vmem:[#allocation7 + $0x44] sm:$0xf]  ;;  %v5314_v29 = vld [vmem:[#allocation7 + $0x50] sm:$0xf0] }
  0x4e   :  { %v395_v18 = vsel %vm393_vm0, %v369_v8, 0  ;;  %v398_v19 = vsel %vm393_vm0, %v370_v9, 0  ;;  %v401_v20 = vsel %vm393_vm0, %v371_v10, 0  ;;  %v404_v21 = vsel %vm393_vm0, %v372_v11, 0  ;;  %v5320_v30 = vld [vmem:[#allocation7 + $0x48] sm:$0xf] }
  0x4f   :  { %409 = vmatpush.bf16.msra.mxu0 %v395_v18  ;;  %422 = vmatpush.bf16.msra.mxu1 %v398_v19  ;;  %v7713_v31 = vld [vmem:[#allocation7 + $0x54] sm:$0xf0]  ;;  %v7711_v32 = vld [vmem:[#allocation7 + $0x4c] sm:$0xf]  ;;  %v5322_v33 = vld [vmem:[#allocation7 + $0x58] sm:$0xf0]  ;;  %v5313_v34 = vor.u32 %v7712_v25, %v5312_v24  ;;  %v5317_v35 = vor.u32 %v7710_v28, %v5314_v29 }
  0x50   :  { %435 = vmatpush.bf16.msra.mxu2 %v401_v20  ;;  %448 = vmatpush.bf16.msra.mxu3 %v404_v21  ;;  %v5296_v36 = vld [vmem:[#allocation7 + $0x20] sm:$0xf]  ;;  %v7708_v37 = vld [vmem:[#allocation7 + $0x2c] sm:$0xf0]  ;;  %v5321_v38 = vor.u32 %v7713_v31, %v5320_v30  ;;  %v5325_v39 = vor.u32 %v7711_v32, %v5322_v33  ;;  %v7706_v40 = vld [vmem:[#allocation7 + $0x24] sm:$0xf] }
  0x51   :  { %v5298_v41 = vld [vmem:[#allocation7 + $0x30] sm:$0xf0]  ;;  %v5304_v42 = vld [vmem:[#allocation7 + $0x28] sm:$0xf]  ;;  %v7709_v43 = vld [vmem:[#allocation7 + $0x34] sm:$0xf0]  ;;  %v5297_v46 = vor.u32 %v7708_v37, %v5296_v36 }
  0x52   :  { %v7707_v44 = vld [vmem:[#allocation7 + $0x2c] sm:$0xf]  ;;  %v5306_v45 = vld [vmem:[#allocation7 + $0x38] sm:$0xf0]  ;;  %v5301_v47 = vor.u32 %v7706_v40, %v5298_v41  ;;  %v5280_v48 = vld [vmem:[#allocation7] sm:$0xf]  ;;  %v5305_v51 = vor.u32 %v7709_v43, %v5304_v42 }
  0x53   :  { %410 = vmatpush.bf16.msra.mxu0 %v5329_v22  ;;  %423 = vmatpush.bf16.msra.mxu1 %v5333_v23  ;;  %v7704_v49 = vld [vmem:[#allocation7 + $0xc] sm:$0xf0]  ;;  %v7702_v50 = vld [vmem:[#allocation7 + $0x4] sm:$0xf]  ;;  %v5309_v52 = vor.u32 %v7707_v44, %v5306_v45  ;;  %v5282_v53 = vld [vmem:[#allocation7 + $0x10] sm:$0xf0] }
  0x54   :  { %436 = vmatpush.bf16.msra.mxu2 %v5337_v26  ;;  %449 = vmatpush.bf16.msra.mxu3 %v5341_v27  ;;  %v5288_v54 = vld [vmem:[#allocation7 + $0x8] sm:$0xf]  ;;  %v7705_v55 = vld [vmem:[#allocation7 + $0x14] sm:$0xf0]  ;;  %v7703_v56 = vld [vmem:[#allocation7 + $0xc] sm:$0xf]  ;;  %v5281_v62 = vor.u32 %v7704_v49, %v5280_v48  ;;  %v5285_v63 = vor.u32 %v7702_v50, %v5282_v53 }
  0x55   :  { %v5290_v57 = vld [vmem:[#allocation7 + $0x18] sm:$0xf0]  ;;  %v5460_v58 = vld [vmem:[#allocation10 + $0xe0] sm:$0xf]  ;;  %v7748_v59 = vld [vmem:[#allocation10 + $0xec] sm:$0xf0]  ;;  %v5289_v1 = vor.u32 %v7705_v55, %v5288_v54 }
  0x56   :  { %v5588_v60 = vld [vmem:[#allocation10 + $0x1e0] sm:$0xf]  ;;  %v7780_v61 = vld [vmem:[#allocation10 + $0x1ec] sm:$0xf0]  ;;  %v5293_v2 = vor.u32 %v7703_v56, %v5290_v57  ;;  %v5461_v5 = vor.u32 %v7748_v59, %v5460_v58  ;;  %vm2875_vm2 = vcmask 1040384   ;;  %s8726_s23 = smov 78  }
  0x57   :  { %411 = vmatpush.bf16.msra.mxu0 %v5313_v34  ;;  %424 = vmatpush.bf16.msra.mxu1 %v5317_v35  ;;  %v269_v0 = vld [vmem:[#allocation2] sm:$0xff]  ;;  %v5589_v6 = vor.u32 %v7780_v61, %v5588_v60  ;;  %v7812_v7 = vld [vmem:[#allocation10 + $0x2ec] sm:$0xf0]  ;;  %vm2871_vm3 = vcmask 408576   ;;  %s8727_s14 = smov [#allocation25]   ;;  %s9106_s7 = sld [smem:[#allocation39_spill]] }
  0x58   :  { %437 = vmatpush.bf16.msra.mxu2 %v5321_v38  ;;  %450 = vmatpush.bf16.msra.mxu3 %v5325_v39  ;;  %v5444_v3 = vld [vmem:[#allocation10 + $0xc0] sm:$0xf]  ;;  %v7844_v9 = vld [vmem:[#allocation10 + $0x3ec] sm:$0xf0]  ;;  %v270_v10 = vpack.c.bf16 %v269_v0, %v269_v0  ;;  %s5255_s26 = sshll.u32 %s8727_s14, 4  ;;  %s5256_s26 = int_to_ptr.vmem [resolvable:$true] %s5255_s26 }
  0x59   :  { %v5716_v4 = vld [vmem:[#allocation10 + $0x2e0] sm:$0xf]  ;;  %v7744_v11 = vld [vmem:[#allocation10 + $0xcc] sm:$0xf0] }
  0x5a   :  { %v5844_v8 = vld [vmem:[#allocation10 + $0x3e0] sm:$0xf]  ;;  %v7776_v13 = vld [vmem:[#allocation10 + $0x1cc] sm:$0xf0]  ;;  %v5717_v14 = vor.u32 %v7812_v7, %v5716_v4  ;;  %v5445_v18 = vor.u32 %v7744_v11, %v5444_v3 }
  0x5b   :  { %412 = vmatpush.bf16.msra.mxu0 %v5297_v46  ;;  %425 = vmatpush.bf16.msra.mxu1 %v5301_v47  ;;  %v5572_v12 = vld [vmem:[#allocation10 + $0x1c0] sm:$0xf]  ;;  %v5845_v15 = vor.u32 %v7844_v9, %v5844_v8  ;;  %v7808_v20 = vld [vmem:[#allocation10 + $0x2cc] sm:$0xf0] }
  0x5c   :  { %438 = vmatpush.bf16.msra.mxu2 %v5305_v51  ;;  %451 = vmatpush.bf16.msra.mxu3 %v5309_v52  ;;  %v5428_v16 = vld [vmem:[#allocation10 + $0xa0] sm:$0xf]  ;;  %v5573_v19 = vor.u32 %v7776_v13, %v5572_v12  ;;  %v7840_v22 = vld [vmem:[#allocation10 + $0x3cc] sm:$0xf0] }
  0x5d   :  { %v5700_v17 = vld [vmem:[#allocation10 + $0x2c0] sm:$0xf]  ;;  %v7740_v23 = vld [vmem:[#allocation10 + $0xac] sm:$0xf0]  ;;  %s5257_s8 = sshll.u32 %s9106_s7, 4  ;;  %s5258_s8 = int_to_ptr.hbm [resolvable:$true] %s5257_s8 }
  0x5e   :  { %v5828_v21 = vld [vmem:[#allocation10 + $0x3c0] sm:$0xf]  ;;  %v7772_v25 = vld [vmem:[#allocation10 + $0x1ac] sm:$0xf0]  ;;  %v5701_v26 = vor.u32 %v7808_v20, %v5700_v17  ;;  %v5429_v30 = vor.u32 %v7740_v23, %v5428_v16  ;;  %v5462_v23 = vld [vmem:[#allocation10 + $0xf0] sm:$0xf0] }
  0x5f   :  { %413 = vmatpush.bf16.msra.mxu0 %v5281_v62  ;;  %426 = vmatpush.bf16.msra.mxu1 %v5285_v63  ;;  %v5556_v24 = vld [vmem:[#allocation10 + $0x1a0] sm:$0xf]  ;;  %v5829_v27 = vor.u32 %v7840_v22, %v5828_v21  ;;  %v7804_v32 = vld [vmem:[#allocation10 + $0x2ac] sm:$0xf0]  ;;  %v7746_v22 = vld [vmem:[#allocation10 + $0xe4] sm:$0xf] }
  0x60   :  { %439 = vmatpush.bf16.msra.mxu2 %v5289_v1  ;;  %452 = vmatpush.bf16.msra.mxu3 %v5293_v2  ;;  %v5412_v28 = vld [vmem:[#allocation10 + $0x80] sm:$0xf]  ;;  %v5557_v31 = vor.u32 %v7772_v25, %v5556_v24  ;;  %v7836_v34 = vld [vmem:[#allocation10 + $0x3ac] sm:$0xf0]  ;;  %v7778_v24 = vld [vmem:[#allocation10 + $0x1e4] sm:$0xf] }
  0x61   :  { %v5684_v29 = vld [vmem:[#allocation10 + $0x2a0] sm:$0xf]  ;;  %v7736_v35 = vld [vmem:[#allocation10 + $0x8c] sm:$0xf0]  ;;  %v5590_v25 = vld [vmem:[#allocation10 + $0x1f0] sm:$0xf0] }
  0x62   :  { %5342 = vmatmul.msk.bf16.vlgmr.msra.gmra.mxu0 %vm389_vm1, %v270_v10  ;;  %5343 = vmatmul.msk.bf16.vlgmr.msra.gmra.mxu1 %vm389_vm1, %v270_v10  ;;  %v5812_v33 = vld [vmem:[#allocation10 + $0x3a0] sm:$0xf]  ;;  %v7768_v37 = vld [vmem:[#allocation10 + $0x18c] sm:$0xf0]  ;;  %v5685_v38 = vor.u32 %v7804_v32, %v5684_v29  ;;  %v5413_v42 = vor.u32 %v7736_v35, %v5412_v28  ;;  %v7742_v32 = vld [vmem:[#allocation10 + $0xc4] sm:$0xf] }
  0x63   :  { %1244 = vmatpush.bf16.msrb.mxu0 %v5461_v5  ;;  %1257 = vmatpush.bf16.msrb.mxu1 %v5589_v6  ;;  %v5540_v36 = vld [vmem:[#allocation10 + $0x180] sm:$0xf]  ;;  %v5813_v39 = vor.u32 %v7836_v34, %v5812_v33  ;;  %v7800_v44 = vld [vmem:[#allocation10 + $0x28c] sm:$0xf0]  ;;  %v7810_v35 = vld [vmem:[#allocation10 + $0x2e4] sm:$0xf] }
  0x64   :  { %5344 = vmatmul.msk.bf16.vlgmr.msra.gmra.mxu2 %vm389_vm1, %v270_v10  ;;  %5345 = vmatmul.msk.bf16.vlgmr.msra.gmra.mxu3 %vm389_vm1, %v270_v10  ;;  %v5396_v40 = vld [vmem:[#allocation10 + $0x60] sm:$0xf]  ;;  %v5541_v43 = vor.u32 %v7768_v37, %v5540_v36  ;;  %v7832_v46 = vld [vmem:[#allocation10 + $0x38c] sm:$0xf0]  ;;  %v5465_v36 = vor.u32 %v7746_v22, %v5462_v23  ;;  %v5593_v37 = vor.u32 %v7778_v24, %v5590_v25  ;;  %v7726_v22 = vld [vmem:[#allocation10 + $0x44] sm:$0xf] }
  0x65   :  { %1270 = vmatpush.bf16.msrb.mxu2 %v5717_v14  ;;  %1283 = vmatpush.bf16.msrb.mxu3 %v5845_v15  ;;  %v5668_v41 = vld [vmem:[#allocation10 + $0x280] sm:$0xf]  ;;  %v7732_v47 = vld [vmem:[#allocation10 + $0x6c] sm:$0xf0]  ;;  %v5382_v23 = vld [vmem:[#allocation10 + $0x50] sm:$0xf0] }
  0x66   :  { %v5796_v45 = vld [vmem:[#allocation10 + $0x380] sm:$0xf]  ;;  %v7764_v49 = vld [vmem:[#allocation10 + $0x16c] sm:$0xf0]  ;;  %v5669_v50 = vor.u32 %v7800_v44, %v5668_v41  ;;  %v5397_v54 = vor.u32 %v7732_v47, %v5396_v40  ;;  %v5846_v40 = vld [vmem:[#allocation10 + $0x3f0] sm:$0xf0] }
  0x67   :  { %1245 = vmatpush.bf16.msrb.mxu0 %v5445_v18  ;;  %1258 = vmatpush.bf16.msrb.mxu1 %v5573_v19  ;;  %v5524_v48 = vld [vmem:[#allocation10 + $0x160] sm:$0xf]  ;;  %v5797_v51 = vor.u32 %v7832_v46, %v5796_v45  ;;  %v7796_v56 = vld [vmem:[#allocation10 + $0x26c] sm:$0xf0]  ;;  %v5446_v41 = vld [vmem:[#allocation10 + $0xd0] sm:$0xf0] }
  0x68   :  { %v5380_v52 = vld [vmem:[#allocation10 + $0x40] sm:$0xf]  ;;  %v5525_v55 = vor.u32 %v7764_v49, %v5524_v48  ;;  %v7828_v58 = vld [vmem:[#allocation10 + $0x36c] sm:$0xf0]  ;;  %v7738_v48 = vld [vmem:[#allocation10 + $0xa4] sm:$0xf] }
  0x69   :  { %1271 = vmatpush.bf16.msrb.mxu2 %v5701_v26  ;;  %1284 = vmatpush.bf16.msrb.mxu3 %v5829_v27  ;;  %v5652_v53 = vld [vmem:[#allocation10 + $0x260] sm:$0xf]  ;;  %v7728_v59 = vld [vmem:[#allocation10 + $0x4c] sm:$0xf0]  ;;  %v7806_v49 = vld [vmem:[#allocation10 + $0x2c4] sm:$0xf] }
  0x6a   :  { %v5780_v57 = vld [vmem:[#allocation10 + $0x360] sm:$0xf]  ;;  %v7760_v61 = vld [vmem:[#allocation10 + $0x14c] sm:$0xf0]  ;;  %v5653_v62 = vor.u32 %v7796_v56, %v5652_v53  ;;  %v5381_v2 = vor.u32 %v7728_v59, %v5380_v52  ;;  %v5702_v52 = vld [vmem:[#allocation10 + $0x2d0] sm:$0xf0] }
  0x6b   :  { %1246 = vmatpush.bf16.msrb.mxu0 %v5429_v30  ;;  %1259 = vmatpush.bf16.msrb.mxu1 %v5557_v31  ;;  %v5508_v60 = vld [vmem:[#allocation10 + $0x140] sm:$0xf]  ;;  %v5781_v63 = vor.u32 %v7828_v58, %v5780_v57  ;;  %v7792_v4 = vld [vmem:[#allocation10 + $0x24c] sm:$0xf0]  ;;  %v7838_v53 = vld [vmem:[#allocation10 + $0x3c4] sm:$0xf]  ;;  %v5705_v58 = vor.u32 %v7806_v49, %v5702_v52 }
  0x6c   :  { %v5364_v0 = vld [vmem:[#allocation10 + $0x20] sm:$0xf]  ;;  %v5509_v3 = vor.u32 %v7760_v61, %v5508_v60  ;;  %v7824_v6 = vld [vmem:[#allocation10 + $0x34c] sm:$0xf0]  ;;  %v7770_v56 = vld [vmem:[#allocation10 + $0x1a4] sm:$0xf] }
  0x6d   :  { %1272 = vmatpush.bf16.msrb.mxu2 %v5685_v38  ;;  %1285 = vmatpush.bf16.msrb.mxu3 %v5813_v39  ;;  %v5636_v1 = vld [vmem:[#allocation10 + $0x240] sm:$0xf]  ;;  %v7724_v7 = vld [vmem:[#allocation10 + $0x2c] sm:$0xf0]  ;;  %v5718_v38 = vld [vmem:[#allocation10 + $0x2f0] sm:$0xf0] }
  0x6e   :  { %v5764_v5 = vld [vmem:[#allocation10 + $0x340] sm:$0xf]  ;;  %v7756_v9 = vld [vmem:[#allocation10 + $0x12c] sm:$0xf0]  ;;  %v5637_v10 = vor.u32 %v7792_v4, %v5636_v1  ;;  %v5365_v16 = vor.u32 %v7724_v7, %v5364_v0  ;;  %v7842_v39 = vld [vmem:[#allocation10 + $0x3e4] sm:$0xf]  ;;  %v5721_v46 = vor.u32 %v7810_v35, %v5718_v38 }
  0x6f   :  { %1247 = vmatpush.bf16.msrb.mxu0 %v5413_v42  ;;  %1260 = vmatpush.bf16.msrb.mxu1 %v5541_v43  ;;  %v5492_v8 = vld [vmem:[#allocation10 + $0x120] sm:$0xf]  ;;  %v5765_v11 = vor.u32 %v7824_v6, %v5764_v5  ;;  %v7720_v13 = vld [vmem:[#allocation10 + $0xc] sm:$0xf0]  ;;  %v7774_v42 = vld [vmem:[#allocation10 + $0x1c4] sm:$0xf]  ;;  %v5849_v47 = vor.u32 %v7842_v39, %v5846_v40 }
  0x70   :  { %v5348_v12 = vld [vmem:[#allocation10] sm:$0xf]  ;;  %v5493_v17 = vor.u32 %v7756_v9, %v5492_v8  ;;  %v7788_v18 = vld [vmem:[#allocation10 + $0x22c] sm:$0xf0]  ;;  %v5574_v43 = vld [vmem:[#allocation10 + $0x1d0] sm:$0xf0] }
  0x71   :  { %1273 = vmatpush.bf16.msrb.mxu2 %v5669_v50  ;;  %1286 = vmatpush.bf16.msrb.mxu3 %v5797_v51  ;;  %v5476_v14 = vld [vmem:[#allocation10 + $0x100] sm:$0xf]  ;;  %v7820_v20 = vld [vmem:[#allocation10 + $0x32c] sm:$0xf0]  ;;  %v5349_v30 = vor.u32 %v7720_v13, %v5348_v12  ;;  %v5449_v50 = vor.u32 %v7742_v32, %v5446_v41  ;;  %v5577_v51 = vor.u32 %v7774_v42, %v5574_v43  ;;  %v5558_v57 = vld [vmem:[#allocation10 + $0x1b0] sm:$0xf0] }
  0x72   :  { %v5620_v15 = vld [vmem:[#allocation10 + $0x220] sm:$0xf]  ;;  %v7752_v21 = vld [vmem:[#allocation10 + $0x10c] sm:$0xf0]  ;;  %v7734_v60 = vld [vmem:[#allocation10 + $0x84] sm:$0xf] }
  0x73   :  { %1248 = vmatpush.bf16.msrb.mxu0 %v5397_v54  ;;  %1261 = vmatpush.bf16.msrb.mxu1 %v5525_v55  ;;  %v5748_v19 = vld [vmem:[#allocation10 + $0x320] sm:$0xf]  ;;  %v5621_v27 = vor.u32 %v7788_v18, %v5620_v15  ;;  %v7784_v29 = vld [vmem:[#allocation10 + $0x20c] sm:$0xf0]  ;;  %v5477_v31 = vor.u32 %v7752_v21, %v5476_v14  ;;  %v5830_v54 = vld [vmem:[#allocation10 + $0x3d0] sm:$0xf0] }
  0x74   :  { %v5604_v26 = vld [vmem:[#allocation10 + $0x200] sm:$0xf]  ;;  %v5749_v28 = vor.u32 %v7820_v20, %v5748_v19  ;;  %v7816_v34 = vld [vmem:[#allocation10 + $0x30c] sm:$0xf0]  ;;  %v5430_v55 = vld [vmem:[#allocation10 + $0xb0] sm:$0xf0]  ;;  %v5833_v59 = vor.u32 %v7838_v53, %v5830_v54 }
  0x75   :  { %1274 = vmatpush.bf16.msrb.mxu2 %v5653_v62  ;;  %1287 = vmatpush.bf16.msrb.mxu3 %v5781_v63  ;;  %v5732_v33 = vld [vmem:[#allocation10 + $0x300] sm:$0xf]  ;;  %v5605_v44 = vor.u32 %v7784_v29, %v5604_v26  ;;  %v7802_v61 = vld [vmem:[#allocation10 + $0x2a4] sm:$0xf]  ;;  %v5433_v62 = vor.u32 %v7738_v48, %v5430_v55  ;;  %v5561_v63 = vor.u32 %v7770_v56, %v5558_v57  ;;  %v5686_v0 = vld [vmem:[#allocation10 + $0x2b0] sm:$0xf0] }
  0x76   :  { %v5733_v45 = vor.u32 %v7816_v34, %v5732_v33  ;;  %v7834_v1 = vld [vmem:[#allocation10 + $0x3a4] sm:$0xf]  ;;  %v5542_v5 = vld [vmem:[#allocation10 + $0x190] sm:$0xf0]  ;;  %v5689_v6 = vor.u32 %v7802_v61, %v5686_v0  ;;  %v5385_v26 = vor.u32 %v7726_v22, %v5382_v23  ;;  %v289_v0 = vld [vmem:[#allocation8] sm:$0xf] }
  0x77   :  { %1249 = vmatpush.bf16.msrb.mxu0 %v5381_v2  ;;  %1262 = vmatpush.bf16.msrb.mxu1 %v5509_v3  ;;  %v5814_v2 = vld [vmem:[#allocation10 + $0x3b0] sm:$0xf0]  ;;  %v7766_v4 = vld [vmem:[#allocation10 + $0x184] sm:$0xf]  ;;  %v7777_v22 = vld [vmem:[#allocation10 + $0x1d4] sm:$0xf0] }
  0x78   :  { %v5414_v3 = vld [vmem:[#allocation10 + $0x90] sm:$0xf0]  ;;  %v5817_v7 = vor.u32 %v7834_v1, %v5814_v2  ;;  %v7730_v8 = vld [vmem:[#allocation10 + $0x64] sm:$0xf]  ;;  %v291_v1 = vperm.slane %v289_v0, 0  ;;  %v292_v2 = vperm.slane %v289_v0, 1 }
  0x79   :  { %1275 = vmatpush.bf16.msrb.mxu2 %v5637_v10  ;;  %1288 = vmatpush.bf16.msrb.mxu3 %v5765_v11  ;;  %v7798_v9 = vld [vmem:[#allocation10 + $0x284] sm:$0xf]  ;;  %v5417_v10 = vor.u32 %v7734_v60, %v5414_v3  ;;  %v5545_v11 = vor.u32 %v7766_v4, %v5542_v5  ;;  %v5670_v12 = vld [vmem:[#allocation10 + $0x290] sm:$0xf0]  ;;  %v5468_v5 = vld [vmem:[#allocation10 + $0xe8] sm:$0xf] }
  0x7a   :  { %v7830_v13 = vld [vmem:[#allocation10 + $0x384] sm:$0xf]  ;;  %v5798_v14 = vld [vmem:[#allocation10 + $0x390] sm:$0xf0]  ;;  %v5673_v18 = vor.u32 %v7798_v9, %v5670_v12  ;;  %v5596_v9 = vld [vmem:[#allocation10 + $0x1e8] sm:$0xf] }
  0x7b   :  { %1250 = vmatpush.bf16.msrb.mxu0 %v5365_v16  ;;  %1263 = vmatpush.bf16.msrb.mxu1 %v5493_v17  ;;  %v5398_v15 = vld [vmem:[#allocation10 + $0x70] sm:$0xf0]  ;;  %v7762_v16 = vld [vmem:[#allocation10 + $0x164] sm:$0xf]  ;;  %v5801_v19 = vor.u32 %v7830_v13, %v5798_v14  ;;  %v293_v13 = vperm.slane %v289_v0, 2  ;;  %v294_v14 = vperm.slane %v289_v0, 3 }
  0x7c   :  { %v5526_v17 = vld [vmem:[#allocation10 + $0x170] sm:$0xf0]  ;;  %v5401_v20 = vor.u32 %v7730_v8, %v5398_v15  ;;  %v7758_v24 = vld [vmem:[#allocation10 + $0x144] sm:$0xf]  ;;  %v7749_v8 = vld [vmem:[#allocation10 + $0xf4] sm:$0xf0] }
  0x7d   :  { %1276 = vmatpush.bf16.msrb.mxu2 %v5621_v27  ;;  %1289 = vmatpush.bf16.msrb.mxu3 %v5749_v28  ;;  %v5529_v21 = vor.u32 %v7762_v16, %v5526_v17  ;;  %v5510_v25 = vld [vmem:[#allocation10 + $0x150] sm:$0xf0]  ;;  %v7794_v28 = vld [vmem:[#allocation10 + $0x264] sm:$0xf]  ;;  %v5469_v15 = vor.u32 %v7749_v8, %v5468_v5  ;;  %v5452_v17 = vld [vmem:[#allocation10 + $0xc8] sm:$0xf] }
  0x7e   :  { %v5513_v27 = vor.u32 %v7758_v24, %v5510_v25  ;;  %v5654_v29 = vld [vmem:[#allocation10 + $0x270] sm:$0xf0]  ;;  %v7722_v34 = vld [vmem:[#allocation10 + $0x24] sm:$0xf]  ;;  %v7837_v0 = vld [vmem:[#allocation10 + $0x3b4] sm:$0xf0] }
  0x7f   :  { %1251 = vmatpush.bf16.msrb.mxu0 %v5349_v30  ;;  %1264 = vmatpush.bf16.msrb.mxu1 %v5477_v31  ;;  %v7826_v30 = vld [vmem:[#allocation10 + $0x364] sm:$0xf]  ;;  %v5657_v31 = vor.u32 %v7794_v28, %v5654_v29  ;;  %v5782_v32 = vld [vmem:[#allocation10 + $0x370] sm:$0xf0]  ;;  %v5852_v28 = vld [vmem:[#allocation10 + $0x3e8] sm:$0xf] }
  0x80   :  { %v5785_v33 = vor.u32 %v7826_v30, %v5782_v32  ;;  %v5366_v35 = vld [vmem:[#allocation10 + $0x30] sm:$0xf0]  ;;  %v7790_v40 = vld [vmem:[#allocation10 + $0x244] sm:$0xf]  ;;  %v7801_v8 = vld [vmem:[#allocation10 + $0x294] sm:$0xf0] }
  0x81   :  { %1277 = vmatpush.bf16.msrb.mxu2 %v5605_v44  ;;  %1290 = vmatpush.bf16.msrb.mxu3 %v5733_v45  ;;  %v5494_v38 = vld [vmem:[#allocation10 + $0x130] sm:$0xf0]  ;;  %v7822_v42 = vld [vmem:[#allocation10 + $0x344] sm:$0xf] }
  0x82   :  { %v5638_v41 = vld [vmem:[#allocation10 + $0x250] sm:$0xf0]  ;;  %v7750_v48 = vld [vmem:[#allocation10 + $0x104] sm:$0xf] }
  0x83   :  { %1296 = vmatpush.bf16.msra.mxu0 %v5465_v36  ;;  %1309 = vmatpush.bf16.msra.mxu1 %v5593_v37  ;;  %v5369_v36 = vor.u32 %v7722_v34, %v5366_v35  ;;  %v7754_v37 = vld [vmem:[#allocation10 + $0x124] sm:$0xf]  ;;  %v5641_v43 = vor.u32 %v7790_v40, %v5638_v41  ;;  %v5766_v44 = vld [vmem:[#allocation10 + $0x350] sm:$0xf0]  ;;  %v7845_v34 = vld [vmem:[#allocation10 + $0x3f4] sm:$0xf0] }
  0x84   :  { %v5497_v39 = vor.u32 %v7754_v37, %v5494_v38  ;;  %v5769_v45 = vor.u32 %v7822_v42, %v5766_v44  ;;  %v7786_v52 = vld [vmem:[#allocation10 + $0x224] sm:$0xf]  ;;  %v5622_v53 = vld [vmem:[#allocation10 + $0x230] sm:$0xf0]  ;;  %v5436_v35 = vld [vmem:[#allocation10 + $0xa8] sm:$0xf]  ;;  %v5853_v42 = vor.u32 %v7845_v34, %v5852_v28 }
  0x85   :  { %1322 = vmatpush.bf16.msra.mxu2 %v5721_v46  ;;  %1335 = vmatpush.bf16.msra.mxu3 %v5849_v47  ;;  %v7718_v46 = vld [vmem:[#allocation10 + $0x4] sm:$0xf]  ;;  %v5350_v47 = vld [vmem:[#allocation10 + $0x10] sm:$0xf0]  ;;  %v5625_v54 = vor.u32 %v7786_v52, %v5622_v53  ;;  %v5564_v37 = vld [vmem:[#allocation10 + $0x1a8] sm:$0xf] }
  0x86   :  { %v5353_v49 = vor.u32 %v7718_v46, %v5350_v47  ;;  %v7818_v55 = vld [vmem:[#allocation10 + $0x324] sm:$0xf]  ;;  %v5750_v56 = vld [vmem:[#allocation10 + $0x330] sm:$0xf0]  ;;  %v7773_v38 = vld [vmem:[#allocation10 + $0x1b4] sm:$0xf0] }
  0x87   :  { %1297 = vmatpush.bf16.msra.mxu0 %v5449_v50  ;;  %1310 = vmatpush.bf16.msra.mxu1 %v5577_v51  ;;  %v5478_v50 = vld [vmem:[#allocation10 + $0x110] sm:$0xf0]  ;;  %v5753_v57 = vor.u32 %v7818_v55, %v5750_v56  ;;  %v7814_v61 = vld [vmem:[#allocation10 + $0x304] sm:$0xf]  ;;  %v5708_v44 = vld [vmem:[#allocation10 + $0x2c8] sm:$0xf] }
  0x88   :  { %v5481_v51 = vor.u32 %v7750_v48, %v5478_v50  ;;  %v5565_v48 = vor.u32 %v7773_v38, %v5564_v37  ;;  %v7841_v50 = vld [vmem:[#allocation10 + $0x3d4] sm:$0xf0]  ;;  %v5548_v53 = vld [vmem:[#allocation10 + $0x188] sm:$0xf] }
  0x89   :  { %1323 = vmatpush.bf16.msra.mxu2 %v5705_v58  ;;  %1336 = vmatpush.bf16.msra.mxu3 %v5833_v59  ;;  %v7782_v58 = vld [vmem:[#allocation10 + $0x204] sm:$0xf]  ;;  %v5606_v59 = vld [vmem:[#allocation10 + $0x210] sm:$0xf0]  ;;  %v7737_v52 = vld [vmem:[#allocation10 + $0x94] sm:$0xf0] }
  0x8a   :  { %v5609_v60 = vor.u32 %v7782_v58, %v5606_v59  ;;  %v5692_v59 = vld [vmem:[#allocation10 + $0x2a8] sm:$0xf]  ;;  %v7725_v28 = vld [vmem:[#allocation10 + $0x34] sm:$0xf0] }
  0x8b   :  { %1298 = vmatpush.bf16.msra.mxu0 %v5433_v62  ;;  %1311 = vmatpush.bf16.msra.mxu1 %v5561_v63  ;;  %v5734_v62 = vld [vmem:[#allocation10 + $0x310] sm:$0xf0]  ;;  %v7793_v34 = vld [vmem:[#allocation10 + $0x254] sm:$0xf0] }
  0x8c   :  { %v5737_v63 = vor.u32 %v7814_v61, %v5734_v62  ;;  %v7805_v62 = vld [vmem:[#allocation10 + $0x2b4] sm:$0xf0] }
  0x8d   :  { %1324 = vmatpush.bf16.msra.mxu2 %v5689_v6  ;;  %1337 = vmatpush.bf16.msra.mxu3 %v5817_v7  ;;  %v5693_v5 = vor.u32 %v7805_v62, %v5692_v59  ;;  %v7743_v59 = vld [vmem:[#allocation10 + $0xcc] sm:$0xf] }
  0x8f   :  { %1299 = vmatpush.bf16.msra.mxu0 %v5417_v10  ;;  %1312 = vmatpush.bf16.msra.mxu1 %v5545_v11  ;;  %v7781_v10 = vld [vmem:[#allocation10 + $0x1f4] sm:$0xf0] }
  0x90   :  { %v5597_v16 = vor.u32 %v7781_v10, %v5596_v9  ;;  %v5804_v9 = vld [vmem:[#allocation10 + $0x388] sm:$0xf]  ;;  %v7833_v10 = vld [vmem:[#allocation10 + $0x394] sm:$0xf0] }
  0x91   :  { %1325 = vmatpush.bf16.msra.mxu2 %v5673_v18  ;;  %1338 = vmatpush.bf16.msra.mxu3 %v5801_v19  ;;  %v7745_v18 = vld [vmem:[#allocation10 + $0xd4] sm:$0xf0] }
  0x92   :  { %v5453_v25 = vor.u32 %v7745_v18, %v5452_v17  ;;  %v5805_v18 = vor.u32 %v7833_v10, %v5804_v9 }
  0x93   :  { %1300 = vmatpush.bf16.msra.mxu0 %v5401_v20  ;;  %1313 = vmatpush.bf16.msra.mxu1 %v5529_v21  ;;  %v5580_v21 = vld [vmem:[#allocation10 + $0x1c8] sm:$0xf] }
  0x95   :  { %1326 = vmatpush.bf16.msra.mxu2 %v5657_v31  ;;  %1339 = vmatpush.bf16.msra.mxu3 %v5785_v33  ;;  %v5581_v33 = vor.u32 %v7777_v22, %v5580_v21  ;;  %v5660_v21 = vld [vmem:[#allocation10 + $0x268] sm:$0xf]  ;;  %v7797_v22 = vld [vmem:[#allocation10 + $0x274] sm:$0xf0] }
  0x97   :  { %1301 = vmatpush.bf16.msra.mxu0 %v5385_v26  ;;  %1314 = vmatpush.bf16.msra.mxu1 %v5513_v27  ;;  %v5724_v26 = vld [vmem:[#allocation10 + $0x2e8] sm:$0xf]  ;;  %v7813_v27 = vld [vmem:[#allocation10 + $0x2f4] sm:$0xf0] }
  0x98   :  { %v5725_v41 = vor.u32 %v7813_v27, %v5724_v26  ;;  %v5372_v27 = vld [vmem:[#allocation10 + $0x28] sm:$0xf] }
  0x99   :  { %1327 = vmatpush.bf16.msra.mxu2 %v5641_v43  ;;  %1340 = vmatpush.bf16.msra.mxu3 %v5769_v45  ;;  %v7809_v45 = vld [vmem:[#allocation10 + $0x2d4] sm:$0xf0]  ;;  %v5373_v37 = vor.u32 %v7725_v28, %v5372_v27  ;;  %v7735_v27 = vld [vmem:[#allocation10 + $0x8c] sm:$0xf]  ;;  %v5422_v28 = vld [vmem:[#allocation10 + $0x98] sm:$0xf0] }
  0x9b   :  { %1302 = vmatpush.bf16.msra.mxu0 %v5369_v36  ;;  %1315 = vmatpush.bf16.msra.mxu1 %v5497_v39  ;;  %v7741_v36 = vld [vmem:[#allocation10 + $0xb4] sm:$0xf0] }
  0x9c   :  { %v5437_v43 = vor.u32 %v7741_v36, %v5436_v35  ;;  %v5772_v35 = vld [vmem:[#allocation10 + $0x348] sm:$0xf]  ;;  %v7825_v36 = vld [vmem:[#allocation10 + $0x354] sm:$0xf0] }
  0x9d   :  { %1328 = vmatpush.bf16.msra.mxu2 %v5625_v54  ;;  %1341 = vmatpush.bf16.msra.mxu3 %v5753_v57  ;;  %v7769_v54 = vld [vmem:[#allocation10 + $0x194] sm:$0xf0]  ;;  %v5709_v57 = vor.u32 %v7809_v45, %v5708_v44  ;;  %v5470_v44 = vld [vmem:[#allocation10 + $0xf8] sm:$0xf0] }
  0x9e   :  { %v5549_v61 = vor.u32 %v7769_v54, %v5548_v53  ;;  %v5756_v53 = vld [vmem:[#allocation10 + $0x328] sm:$0xf]  ;;  %v7821_v54 = vld [vmem:[#allocation10 + $0x334] sm:$0xf0] }
  0x9f   :  { %1303 = vmatpush.bf16.msra.mxu0 %v5353_v49  ;;  %1316 = vmatpush.bf16.msra.mxu1 %v5481_v51  ;;  %v5836_v49 = vld [vmem:[#allocation10 + $0x3c8] sm:$0xf] }
  0xa0   :  { %v5420_v51 = vld [vmem:[#allocation10 + $0x88] sm:$0xf]  ;;  %v5837_v58 = vor.u32 %v7841_v50, %v5836_v49  ;;  %v7779_v49 = vld [vmem:[#allocation10 + $0x1ec] sm:$0xf]  ;;  %v5598_v50 = vld [vmem:[#allocation10 + $0x1f8] sm:$0xf0] }
  0xa1   :  { %1329 = vmatpush.bf16.msra.mxu2 %v5609_v60  ;;  %1342 = vmatpush.bf16.msra.mxu3 %v5737_v63  ;;  %v5421_v60 = vor.u32 %v7737_v52, %v5420_v51  ;;  %v5820_v63 = vld [vmem:[#allocation10 + $0x3a8] sm:$0xf]  ;;  %v7789_v52 = vld [vmem:[#allocation10 + $0x234] sm:$0xf0] }
  0xa2   :  { %v5628_v51 = vld [vmem:[#allocation10 + $0x228] sm:$0xf] }
  0xa3   :  { %v5629_v62 = vor.u32 %v7789_v52, %v5628_v51 }
  0xdf   :  { %v415_v3 = vpop.f32.mrf.mxu0  ;;  %v428_v4 = vpop.f32.mrf.mxu1 }
  0xe0   :  { %v416_v6 = vadd.f32 %v415_v3, %v291_v1  ;;  %v429_v7 = vadd.f32 %v428_v4, %v292_v2  ;;  %v5404_v1 = vld [vmem:[#allocation10 + $0x68] sm:$0xf]  ;;  %v7733_v2 = vld [vmem:[#allocation10 + $0x74] sm:$0xf0] }
  0xe1   :  { %v5532_v3 = vld [vmem:[#allocation10 + $0x168] sm:$0xf]  ;;  %v7765_v4 = vld [vmem:[#allocation10 + $0x174] sm:$0xf0] }
  0xe2   :  { %v458_v11 = vmax.f32 %v416_v6, 0.0  ;;  %v459_v12 = vmax.f32 %v429_v7, 0.0  ;;  %v5821_v6 = vor.u32 %v7837_v0, %v5820_v63  ;;  %v5676_v7 = vld [vmem:[#allocation10 + $0x288] sm:$0xf]  ;;  %v5757_v63 = vor.u32 %v7821_v54, %v5756_v53  ;;  %v5582_v0 = vld [vmem:[#allocation10 + $0x1d8] sm:$0xf0] }
  0xe3   :  { %v5677_v17 = vor.u32 %v7801_v8, %v5676_v7  ;;  %v7843_v7 = vld [vmem:[#allocation10 + $0x3ec] sm:$0xf]  ;;  %v5854_v8 = vld [vmem:[#allocation10 + $0x3f8] sm:$0xf0] }
  0xe4   :  { %v8902_v19 = vpack.c.bf16 %v458_v11, %v458_v11  ;;  %v8904_v20 = vpack.c.bf16 %v459_v12, %v459_v12  ;;  %v5405_v11 = vor.u32 %v7733_v2, %v5404_v1  ;;  %v5533_v12 = vor.u32 %v7765_v4, %v5532_v3  ;;  %v5612_v1 = vld [vmem:[#allocation10 + $0x208] sm:$0xf]  ;;  %v7785_v2 = vld [vmem:[#allocation10 + $0x214] sm:$0xf0]  ;;  %v7727_v53 = vld [vmem:[#allocation10 + $0x4c] sm:$0xf] }
  0xe5   :  { %v5740_v3 = vld [vmem:[#allocation10 + $0x308] sm:$0xf]  ;;  %v7817_v4 = vld [vmem:[#allocation10 + $0x314] sm:$0xf0]  ;;  %v5390_v54 = vld [vmem:[#allocation10 + $0x58] sm:$0xf0] }
  0xe6   :  { %1252 = vmatmul.bf16.vlgmr.msrb.gmra.mxu0 %v8902_v19  ;;  %1265 = vmatmul.bf16.vlgmr.msrb.gmra.mxu1 %v8904_v20 }
  0xe7   :  { %v441_v23 = vpop.f32.mrf.mxu2  ;;  %v454_v24 = vpop.f32.mrf.mxu3  ;;  %1348 = vmatpush.bf16.msrb.mxu0 %v5469_v15  ;;  %1361 = vmatpush.bf16.msrb.mxu1 %v5597_v16  ;;  %v5516_v15 = vld [vmem:[#allocation10 + $0x148] sm:$0xf]  ;;  %v7761_v16 = vld [vmem:[#allocation10 + $0x154] sm:$0xf0] }
  0xe8   :  { %v442_v29 = vadd.f32 %v441_v23, %v293_v13  ;;  %v455_v30 = vadd.f32 %v454_v24, %v294_v14  ;;  %v417_v31 = vpop.f32.mrf.mxu0  ;;  %v430_v32 = vpop.f32.mrf.mxu1  ;;  %v5388_v13 = vld [vmem:[#allocation10 + $0x48] sm:$0xf]  ;;  %v7729_v14 = vld [vmem:[#allocation10 + $0x54] sm:$0xf0]  ;;  %v5517_v26 = vor.u32 %v7761_v16, %v5516_v15  ;;  %v7771_v15 = vld [vmem:[#allocation10 + $0x1ac] sm:$0xf] }
  0xe9   :  { %v5788_v23 = vld [vmem:[#allocation10 + $0x368] sm:$0xf]  ;;  %v7829_v24 = vld [vmem:[#allocation10 + $0x374] sm:$0xf0]  ;;  %v5661_v31 = vor.u32 %v7797_v22, %v5660_v21  ;;  %v5566_v16 = vld [vmem:[#allocation10 + $0x1b8] sm:$0xf0] }
  0xea   :  { %v460_v39 = vmax.f32 %v442_v29, 0.0  ;;  %v461_v40 = vmax.f32 %v455_v30, 0.0  ;;  %v5500_v29 = vld [vmem:[#allocation10 + $0x128] sm:$0xf]  ;;  %v7757_v30 = vld [vmem:[#allocation10 + $0x134] sm:$0xf0]  ;;  %v5789_v32 = vor.u32 %v7829_v24, %v5788_v23 }
  0xeb   :  { %1349 = vmatpush.bf16.msrb.mxu0 %v5453_v25  ;;  %1362 = vmatpush.bf16.msrb.mxu1 %v5581_v33  ;;  %v5389_v25 = vor.u32 %v7729_v14, %v5388_v13  ;;  %v5644_v33 = vld [vmem:[#allocation10 + $0x248] sm:$0xf]  ;;  %v5501_v38 = vor.u32 %v7757_v30, %v5500_v29  ;;  %v5741_v13 = vor.u32 %v7817_v4, %v5740_v3  ;;  %v5438_v14 = vld [vmem:[#allocation10 + $0xb8] sm:$0xf0]  ;;  %v7807_v21 = vld [vmem:[#allocation10 + $0x2cc] sm:$0xf] }
  0xec   :  { %v8908_v46 = vpack.c.bf16 %v460_v39, %v460_v39  ;;  %v8910_v47 = vpack.c.bf16 %v461_v40, %v461_v40  ;;  %v5356_v39 = vld [vmem:[#allocation10 + $0x8] sm:$0xf]  ;;  %v7721_v40 = vld [vmem:[#allocation10 + $0x14] sm:$0xf0]  ;;  %v5645_v45 = vor.u32 %v7793_v34, %v5644_v33  ;;  %v5710_v22 = vld [vmem:[#allocation10 + $0x2d8] sm:$0xf0] }
  0xed   :  { %v7839_v23 = vld [vmem:[#allocation10 + $0x3cc] sm:$0xf]  ;;  %v5838_v24 = vld [vmem:[#allocation10 + $0x3d8] sm:$0xf0] }
  0xee   :  { %1278 = vmatmul.bf16.vlgmr.msrb.gmra.mxu2 %v8908_v46  ;;  %1291 = vmatmul.bf16.vlgmr.msrb.gmra.mxu3 %v8910_v47  ;;  %v7767_v29 = vld [vmem:[#allocation10 + $0x18c] sm:$0xf]  ;;  %v5550_v30 = vld [vmem:[#allocation10 + $0x198] sm:$0xf0] }
  0xef   :  { %1374 = vmatpush.bf16.msrb.mxu2 %v5725_v41  ;;  %1387 = vmatpush.bf16.msrb.mxu3 %v5853_v42  ;;  %v443_v55 = vpop.f32.mrf.mxu2  ;;  %v456_v56 = vpop.f32.mrf.mxu3  ;;  %v5484_v41 = vld [vmem:[#allocation10 + $0x108] sm:$0xf]  ;;  %v7753_v42 = vld [vmem:[#allocation10 + $0x114] sm:$0xf0]  ;;  %v7803_v33 = vld [vmem:[#allocation10 + $0x2ac] sm:$0xf] }
  0xf0   :  { %1350 = vmatpush.bf16.msrb.mxu0 %v5437_v43  ;;  %1363 = vmatpush.bf16.msrb.mxu1 %v5565_v48  ;;  %v7747_v43 = vld [vmem:[#allocation10 + $0xec] sm:$0xf]  ;;  %v5773_v48 = vor.u32 %v7825_v36, %v5772_v35  ;;  %v5357_v55 = vor.u32 %v7721_v40, %v5356_v39  ;;  %v5485_v56 = vor.u32 %v7753_v42, %v5484_v41  ;;  %v5694_v34 = vld [vmem:[#allocation10 + $0x2b8] sm:$0xf0] }
  0xf1   :  { %v7835_v35 = vld [vmem:[#allocation10 + $0x3ac] sm:$0xf]  ;;  %v5822_v36 = vld [vmem:[#allocation10 + $0x3b8] sm:$0xf0] }
  0xf2   :  { %v7731_v39 = vld [vmem:[#allocation10 + $0x6c] sm:$0xf]  ;;  %v5406_v40 = vld [vmem:[#allocation10 + $0x78] sm:$0xf0] }
  0xf3   :  { %1375 = vmatpush.bf16.msrb.mxu2 %v5709_v57  ;;  %1388 = vmatpush.bf16.msrb.mxu3 %v5837_v58  ;;  %v5473_v57 = vor.u32 %v7747_v43, %v5470_v44  ;;  %v5601_v58 = vor.u32 %v7779_v49, %v5598_v50  ;;  %v7763_v41 = vld [vmem:[#allocation10 + $0x16c] sm:$0xf]  ;;  %v5534_v42 = vld [vmem:[#allocation10 + $0x178] sm:$0xf0]  ;;  %v5697_v43 = vor.u32 %v7803_v33, %v5694_v34  ;;  %v5956_v33 = vld [vmem:[#allocation11 + $0xc0] sm:$0xf] }
  0xf4   :  { %1351 = vmatpush.bf16.msrb.mxu0 %v5421_v60  ;;  %1364 = vmatpush.bf16.msrb.mxu1 %v5549_v61  ;;  %v5454_v60 = vld [vmem:[#allocation10 + $0xd8] sm:$0xf0]  ;;  %v7775_v61 = vld [vmem:[#allocation10 + $0x1cc] sm:$0xf]  ;;  %v5825_v44 = vor.u32 %v7835_v35, %v5822_v36  ;;  %v5409_v51 = vor.u32 %v7731_v39, %v5406_v40  ;;  %v5537_v52 = vor.u32 %v7763_v41, %v5534_v42  ;;  %v7904_v39 = vld [vmem:[#allocation11 + $0x1cc] sm:$0xf0] }
  0xf5   :  { %v5457_v9 = vor.u32 %v7743_v59, %v5454_v60  ;;  %v5585_v10 = vor.u32 %v7775_v61, %v5582_v0  ;;  %v7831_v49 = vld [vmem:[#allocation10 + $0x38c] sm:$0xf]  ;;  %v5806_v50 = vld [vmem:[#allocation10 + $0x398] sm:$0xf0] }
  0xf6   :  { %1304 = vmatmul.bf16.vlgmr.msra.gmra.mxu0 %v8902_v19  ;;  %1317 = vmatmul.bf16.vlgmr.msra.gmra.mxu1 %v8904_v20  ;;  %v7795_v59 = vld [vmem:[#allocation10 + $0x26c] sm:$0xf]  ;;  %v5662_v60 = vld [vmem:[#allocation10 + $0x278] sm:$0xf0] }
  0xf7   :  { %1376 = vmatpush.bf16.msrb.mxu2 %v5693_v5  ;;  %1389 = vmatpush.bf16.msrb.mxu3 %v5821_v6  ;;  %v7811_v5 = vld [vmem:[#allocation10 + $0x2ec] sm:$0xf]  ;;  %v5726_v6 = vld [vmem:[#allocation10 + $0x2f8] sm:$0xf0] }
  0xf8   :  { %1352 = vmatpush.bf16.msrb.mxu0 %v5405_v11  ;;  %1365 = vmatpush.bf16.msrb.mxu1 %v5533_v12  ;;  %v7739_v11 = vld [vmem:[#allocation10 + $0xac] sm:$0xf]  ;;  %v5613_v12 = vor.u32 %v7785_v2, %v5612_v1  ;;  %v5374_v2 = vld [vmem:[#allocation10 + $0x38] sm:$0xf0] }
  0xf9   :  { %v7827_v61 = vld [vmem:[#allocation10 + $0x36c] sm:$0xf]  ;;  %v5502_v4 = vld [vmem:[#allocation10 + $0x138] sm:$0xf0] }
  0xfa   :  { %v7723_v1 = vld [vmem:[#allocation10 + $0x2c] sm:$0xf]  ;;  %v5614_v40 = vld [vmem:[#allocation10 + $0x218] sm:$0xf0] }
  0xfb   :  { %1377 = vmatpush.bf16.msrb.mxu2 %v5677_v17  ;;  %1390 = vmatpush.bf16.msrb.mxu3 %v5805_v18  ;;  %v5729_v17 = vor.u32 %v7811_v5, %v5726_v6  ;;  %v5857_v18 = vor.u32 %v7843_v7, %v5854_v8  ;;  %v7755_v3 = vld [vmem:[#allocation10 + $0x12c] sm:$0xf]  ;;  %v5665_v5 = vor.u32 %v7795_v59, %v5662_v60  ;;  %v5646_v8 = vld [vmem:[#allocation10 + $0x258] sm:$0xf0]  ;;  %v5924_v59 = vld [vmem:[#allocation11 + $0x80] sm:$0xf] }
  0xfc   :  { %1353 = vmatpush.bf16.msrb.mxu0 %v5389_v25  ;;  %1366 = vmatpush.bf16.msrb.mxu1 %v5517_v26  ;;  %v5441_v25 = vor.u32 %v7739_v11, %v5438_v14  ;;  %v5569_v26 = vor.u32 %v7771_v15, %v5566_v16  ;;  %v7791_v7 = vld [vmem:[#allocation10 + $0x24c] sm:$0xf]  ;;  %v5377_v11 = vor.u32 %v7723_v1, %v5374_v2  ;;  %v5358_v14 = vld [vmem:[#allocation10 + $0x18] sm:$0xf0]  ;;  %v7860_v2 = vld [vmem:[#allocation11 + $0x6c] sm:$0xf0] }
  0xfd   :  { %v7751_v15 = vld [vmem:[#allocation10 + $0x10c] sm:$0xf]  ;;  %v5486_v16 = vld [vmem:[#allocation10 + $0x118] sm:$0xf0] }
  0xfe   :  { %1330 = vmatmul.bf16.vlgmr.msra.gmra.mxu2 %v8908_v46  ;;  %1343 = vmatmul.bf16.vlgmr.msra.gmra.mxu3 %v8910_v47  ;;  %v7815_v41 = vld [vmem:[#allocation10 + $0x30c] sm:$0xf]  ;;  %v5742_v42 = vld [vmem:[#allocation10 + $0x318] sm:$0xf0] }
  0xff   :  { %1378 = vmatpush.bf16.msrb.mxu2 %v5661_v31  ;;  %1391 = vmatpush.bf16.msrb.mxu3 %v5789_v32  ;;  %v5713_v31 = vor.u32 %v7807_v21, %v5710_v22  ;;  %v5841_v32 = vor.u32 %v7839_v23, %v5838_v24  ;;  %v5649_v21 = vor.u32 %v7791_v7, %v5646_v8  ;;  %v7876_v23 = vld [vmem:[#allocation11 + $0xec] sm:$0xf0]  ;;  %v6100_v24 = vld [vmem:[#allocation11 + $0x1e0] sm:$0xf] }
 0x100   :  { %1354 = vmatpush.bf16.msrb.mxu0 %v5373_v37  ;;  %1367 = vmatpush.bf16.msrb.mxu1 %v5501_v38  ;;  %v5425_v37 = vor.u32 %v7735_v27, %v5422_v28  ;;  %v5553_v38 = vor.u32 %v7767_v29, %v5550_v30  ;;  %v7819_v27 = vld [vmem:[#allocation10 + $0x32c] sm:$0xf]  ;;  %v5758_v28 = vld [vmem:[#allocation10 + $0x338] sm:$0xf0]  ;;  %v5489_v30 = vor.u32 %v7751_v15, %v5486_v16  ;;  %v7856_v8 = vld [vmem:[#allocation11 + $0x4c] sm:$0xf0] }
 0x101   :  { %v5761_v36 = vor.u32 %v7819_v27, %v5758_v28  ;;  %v7848_v15 = vld [vmem:[#allocation11 + $0xc] sm:$0xf0]  ;;  %v7874_v16 = vld [vmem:[#allocation11 + $0xe4] sm:$0xf]  ;;  %v6004_v28 = vld [vmem:[#allocation11 + $0x120] sm:$0xf] }
 0x103   :  { %1379 = vmatpush.bf16.msrb.mxu2 %v5645_v45  ;;  %1392 = vmatpush.bf16.msrb.mxu3 %v5773_v48  ;;  %v7799_v45 = vld [vmem:[#allocation10 + $0x28c] sm:$0xf]  ;;  %v5678_v48 = vld [vmem:[#allocation10 + $0x298] sm:$0xf0] }
 0x104   :  { %1355 = vmatpush.bf16.msrb.mxu0 %v5357_v55  ;;  %1368 = vmatpush.bf16.msrb.mxu1 %v5485_v56  ;;  %v7759_v55 = vld [vmem:[#allocation10 + $0x14c] sm:$0xf]  ;;  %v5518_v56 = vld [vmem:[#allocation10 + $0x158] sm:$0xf0] }
 0x105   :  { %v5521_v0 = vor.u32 %v7759_v55, %v5518_v56  ;;  %v6212_v56 = vld [vmem:[#allocation11 + $0x2c0] sm:$0xf] }
 0x107   :  { %1380 = vmatpush.bf16.msrb.mxu2 %v5629_v62  ;;  %1393 = vmatpush.bf16.msrb.mxu3 %v5757_v63  ;;  %v5790_v62 = vld [vmem:[#allocation10 + $0x378] sm:$0xf0]  ;;  %v5393_v63 = vor.u32 %v7727_v53, %v5390_v54  ;;  %v6068_v53 = vld [vmem:[#allocation11 + $0x1a0] sm:$0xf]  ;;  %v7900_v54 = vld [vmem:[#allocation11 + $0x1ac] sm:$0xf0] }
 0x108   :  { %1400 = vmatpush.bf16.msra.mxu0 %v5473_v57  ;;  %1413 = vmatpush.bf16.msra.mxu1 %v5601_v58  ;;  %v5681_v57 = vor.u32 %v7799_v45, %v5678_v48  ;;  %v5809_v58 = vor.u32 %v7831_v49, %v5806_v50  ;;  %v5793_v6 = vor.u32 %v7827_v61, %v5790_v62  ;;  %v7864_v61 = vld [vmem:[#allocation11 + $0x8c] sm:$0xf0]  ;;  %v6052_v62 = vld [vmem:[#allocation11 + $0x180] sm:$0xf] }
 0x109   :  { %1356 = vmatmul.bf16.vlgmr.msrb.gmra.mxu0 %v8902_v19  ;;  %1369 = vmatmul.bf16.vlgmr.msrb.gmra.mxu1 %v8904_v20  ;;  %v5745_v50 = vor.u32 %v7815_v41, %v5742_v42  ;;  %v6069_v60 = vor.u32 %v7900_v54, %v6068_v53  ;;  %v7928_v41 = vld [vmem:[#allocation11 + $0x28c] sm:$0xf0]  ;;  %v7854_v54 = vld [vmem:[#allocation11 + $0x44] sm:$0xf] }
 0x10b   :  { %1381 = vmatpush.bf16.msrb.mxu2 %v5613_v12  ;;  %1394 = vmatpush.bf16.msrb.mxu3 %v5741_v13  ;;  %v5505_v12 = vor.u32 %v7755_v3, %v5502_v4  ;;  %v7719_v13 = vld [vmem:[#allocation10 + $0xc] sm:$0xf]  ;;  %v6036_v3 = vld [vmem:[#allocation11 + $0x160] sm:$0xf]  ;;  %v7892_v4 = vld [vmem:[#allocation11 + $0x16c] sm:$0xf0] }
 0x10c   :  { %1401 = vmatpush.bf16.msra.mxu0 %v5457_v9  ;;  %1414 = vmatpush.bf16.msra.mxu1 %v5585_v10  ;;  %v7823_v9 = vld [vmem:[#allocation10 + $0x34c] sm:$0xf]  ;;  %v5774_v10 = vld [vmem:[#allocation10 + $0x358] sm:$0xf0]  ;;  %v5361_v29 = vor.u32 %v7719_v13, %v5358_v14  ;;  %v6037_v7 = vor.u32 %v7892_v4, %v6036_v3  ;;  %v5860_v14 = vld [vmem:[#allocation11] sm:$0xf] }
 0x10d   :  { %v5777_v22 = vor.u32 %v7823_v9, %v5774_v10  ;;  %v6020_v9 = vld [vmem:[#allocation11 + $0x140] sm:$0xf]  ;;  %v7888_v10 = vld [vmem:[#allocation11 + $0x14c] sm:$0xf0] }
 0x10e   :  { %1382 = vmatmul.bf16.vlgmr.msrb.gmra.mxu2 %v8908_v46  ;;  %1395 = vmatmul.bf16.vlgmr.msrb.gmra.mxu3 %v8910_v47  ;;  %v6132_v3 = vld [vmem:[#allocation11 + $0x220] sm:$0xf]  ;;  %v7916_v4 = vld [vmem:[#allocation11 + $0x22c] sm:$0xf0] }
 0x10f   :  { %1426 = vmatpush.bf16.msra.mxu2 %v5729_v17  ;;  %1439 = vmatpush.bf16.msra.mxu3 %v5857_v18  ;;  %v7787_v17 = vld [vmem:[#allocation10 + $0x22c] sm:$0xf]  ;;  %v5972_v18 = vld [vmem:[#allocation11 + $0xe0] sm:$0xf] }
 0x110   :  { %1402 = vmatpush.bf16.msra.mxu0 %v5441_v25  ;;  %1415 = vmatpush.bf16.msra.mxu1 %v5569_v26  ;;  %v7908_v25 = vld [vmem:[#allocation11 + $0x1ec] sm:$0xf0]  ;;  %v5630_v26 = vld [vmem:[#allocation10 + $0x238] sm:$0xf0] }
 0x111   :  { %v6101_v34 = vor.u32 %v7908_v25, %v6100_v24  ;;  %v5633_v35 = vor.u32 %v7787_v17, %v5630_v26  ;;  %v5974_v17 = vld [vmem:[#allocation11 + $0xf0] sm:$0xf0]  ;;  %v7866_v25 = vld [vmem:[#allocation11 + $0xa4] sm:$0xf] }
 0x112   :  { %v5942_v26 = vld [vmem:[#allocation11 + $0xb0] sm:$0xf0] }
 0x113   :  { %1427 = vmatpush.bf16.msra.mxu2 %v5713_v31  ;;  %1440 = vmatpush.bf16.msra.mxu3 %v5841_v32  ;;  %v7783_v31 = vld [vmem:[#allocation10 + $0x20c] sm:$0xf]  ;;  %v5973_v32 = vor.u32 %v7876_v23, %v5972_v18  ;;  %v5861_v18 = vor.u32 %v7848_v15, %v5860_v14  ;;  %v5958_v23 = vld [vmem:[#allocation11 + $0xd0] sm:$0xf0]  ;;  %v5945_v27 = vor.u32 %v7866_v25, %v5942_v26  ;;  %v7972_v14 = vld [vmem:[#allocation11 + $0x3ec] sm:$0xf0] }
 0x114   :  { %1403 = vmatpush.bf16.msra.mxu0 %v5425_v37  ;;  %1416 = vmatpush.bf16.msra.mxu1 %v5553_v38  ;;  %v7872_v37 = vld [vmem:[#allocation11 + $0xcc] sm:$0xf0]  ;;  %v6084_v38 = vld [vmem:[#allocation11 + $0x1c0] sm:$0xf]  ;;  %v5617_v49 = vor.u32 %v7783_v31, %v5614_v40  ;;  %v7890_v15 = vld [vmem:[#allocation11 + $0x164] sm:$0xf] }
 0x115   :  { %v5957_v45 = vor.u32 %v7872_v37, %v5956_v33  ;;  %v6085_v48 = vor.u32 %v7904_v39, %v6084_v38  ;;  %v7862_v33 = vld [vmem:[#allocation11 + $0x84] sm:$0xf]  ;;  %v7880_v37 = vld [vmem:[#allocation11 + $0x10c] sm:$0xf0]  ;;  %v6180_v38 = vld [vmem:[#allocation11 + $0x280] sm:$0xf] }
 0x116   :  { %v6181_v42 = vor.u32 %v7928_v41, %v6180_v38  ;;  %v7968_v25 = vld [vmem:[#allocation11 + $0x3cc] sm:$0xf0]  ;;  %v6006_v38 = vld [vmem:[#allocation11 + $0x130] sm:$0xf0] }
 0x117   :  { %1428 = vmatpush.bf16.msra.mxu2 %v5697_v43  ;;  %1441 = vmatpush.bf16.msra.mxu3 %v5825_v44  ;;  %v6228_v43 = vld [vmem:[#allocation11 + $0x2e0] sm:$0xf]  ;;  %v7940_v44 = vld [vmem:[#allocation11 + $0x2ec] sm:$0xf0] }
 0x118   :  { %1404 = vmatpush.bf16.msra.mxu0 %v5409_v51  ;;  %1417 = vmatpush.bf16.msra.mxu1 %v5537_v52  ;;  %v5940_v51 = vld [vmem:[#allocation11 + $0xa0] sm:$0xf]  ;;  %v7868_v52 = vld [vmem:[#allocation11 + $0xac] sm:$0xf0]  ;;  %v6229_v55 = vor.u32 %v7940_v44, %v6228_v43  ;;  %v7858_v43 = vld [vmem:[#allocation11 + $0x64] sm:$0xf] }
 0x119   :  { %v5910_v44 = vld [vmem:[#allocation11 + $0x70] sm:$0xf0] }
 0x11b   :  { %1429 = vmatpush.bf16.msra.mxu2 %v5681_v57  ;;  %1442 = vmatpush.bf16.msra.mxu3 %v5809_v58  ;;  %v7936_v57 = vld [vmem:[#allocation11 + $0x2cc] sm:$0xf0]  ;;  %v5941_v58 = vor.u32 %v7868_v52, %v5940_v51  ;;  %v5913_v51 = vor.u32 %v7858_v43, %v5910_v44  ;;  %v6198_v43 = vld [vmem:[#allocation11 + $0x2b0] sm:$0xf0] }
 0x11c   :  { %1405 = vmatpush.bf16.msra.mxu0 %v5393_v63  ;;  %1418 = vmatpush.bf16.msra.mxu1 %v5521_v0  ;;  %v7896_v63 = vld [vmem:[#allocation11 + $0x18c] sm:$0xf0]  ;;  %v5908_v0 = vld [vmem:[#allocation11 + $0x60] sm:$0xf] }
 0x11d   :  { %v6053_v1 = vor.u32 %v7896_v63, %v6052_v62  ;;  %v7850_v63 = vld [vmem:[#allocation11 + $0x24] sm:$0xf] }
 0x11f   :  { %1430 = vmatpush.bf16.msra.mxu2 %v5665_v5  ;;  %1443 = vmatpush.bf16.msra.mxu3 %v5793_v6  ;;  %v5909_v5 = vor.u32 %v7860_v2, %v5908_v0  ;;  %v5892_v6 = vld [vmem:[#allocation11 + $0x40] sm:$0xf]  ;;  %v6070_v0 = vld [vmem:[#allocation11 + $0x1b0] sm:$0xf0] }
 0x120   :  { %1406 = vmatpush.bf16.msra.mxu0 %v5377_v11  ;;  %1419 = vmatpush.bf16.msra.mxu1 %v5505_v12  ;;  %v5876_v11 = vld [vmem:[#allocation11 + $0x20] sm:$0xf]  ;;  %v7852_v12 = vld [vmem:[#allocation11 + $0x2c] sm:$0xf0] }
 0x121   :  { %v5877_v13 = vor.u32 %v7852_v12, %v5876_v11  ;;  %v7912_v11 = vld [vmem:[#allocation11 + $0x20c] sm:$0xf0]  ;;  %v6356_v12 = vld [vmem:[#allocation11 + $0x3e0] sm:$0xf] }
 0x123   :  { %1431 = vmatpush.bf16.msra.mxu2 %v5649_v21  ;;  %1444 = vmatpush.bf16.msra.mxu3 %v5777_v22  ;;  %v5977_v21 = vor.u32 %v7874_v16, %v5974_v17  ;;  %v7870_v22 = vld [vmem:[#allocation11 + $0xc4] sm:$0xf]  ;;  %v6038_v16 = vld [vmem:[#allocation11 + $0x170] sm:$0xf0]  ;;  %v6357_v17 = vor.u32 %v7972_v14, %v6356_v12  ;;  %v5980_v14 = vld [vmem:[#allocation11 + $0xe8] sm:$0xf] }
 0x124   :  { %1407 = vmatpush.bf16.msra.mxu0 %v5361_v29  ;;  %1420 = vmatpush.bf16.msra.mxu1 %v5489_v30  ;;  %v5961_v24 = vor.u32 %v7870_v22, %v5958_v23  ;;  %v7884_v29 = vld [vmem:[#allocation11 + $0x12c] sm:$0xf0]  ;;  %v6196_v30 = vld [vmem:[#allocation11 + $0x2a0] sm:$0xf]  ;;  %v6230_v22 = vld [vmem:[#allocation11 + $0x2f0] sm:$0xf0] }
 0x125   :  { %v6005_v31 = vor.u32 %v7884_v29, %v6004_v28  ;;  %v6022_v28 = vld [vmem:[#allocation11 + $0x150] sm:$0xf0]  ;;  %v7934_v29 = vld [vmem:[#allocation11 + $0x2c4] sm:$0xf] }
 0x126   :  { %v6134_v12 = vld [vmem:[#allocation11 + $0x230] sm:$0xf0] }
 0x127   :  { %1432 = vmatpush.bf16.msra.mxu2 %v5633_v35  ;;  %1445 = vmatpush.bf16.msra.mxu3 %v5761_v36  ;;  %v5988_v36 = vld [vmem:[#allocation11 + $0x100] sm:$0xf] }
 0x128   :  { %2238 = vmatpush.bf16.msrb.mxu0 %v5973_v32  ;;  %2251 = vmatpush.bf16.msrb.mxu1 %v6101_v34  ;;  %v7932_v32 = vld [vmem:[#allocation11 + $0x2ac] sm:$0xf0]  ;;  %v5926_v34 = vld [vmem:[#allocation11 + $0x90] sm:$0xf0]  ;;  %v5989_v40 = vor.u32 %v7880_v37, %v5988_v36  ;;  %v7882_v37 = vld [vmem:[#allocation11 + $0x124] sm:$0xf] }
 0x129   :  { %1408 = vmatmul.bf16.vlgmr.msra.gmra.mxu0 %v8902_v19  ;;  %1421 = vmatmul.bf16.vlgmr.msra.gmra.mxu1 %v8904_v20  ;;  %v6213_v19 = vor.u32 %v7936_v57, %v6212_v56  ;;  %v5925_v20 = vor.u32 %v7864_v61, %v5924_v59  ;;  %v6197_v35 = vor.u32 %v7932_v32, %v6196_v30  ;;  %v7902_v56 = vld [vmem:[#allocation11 + $0x1c4] sm:$0xf]  ;;  %v6086_v57 = vld [vmem:[#allocation11 + $0x1d0] sm:$0xf0]  ;;  %v7920_v61 = vld [vmem:[#allocation11 + $0x24c] sm:$0xf0] }
 0x12a   :  { %v5929_v39 = vor.u32 %v7862_v33, %v5926_v34  ;;  %v6089_v59 = vor.u32 %v7902_v56, %v6086_v57  ;;  %v8929_v33 = vld [vmem:[%s9082_s5] sm:$0xf]  ;;  %v6324_v34 = vld [vmem:[#allocation11 + $0x3a0] sm:$0xf] }
 0x12b   :  { %1433 = vmatpush.bf16.msra.mxu2 %v5617_v49  ;;  %1446 = vmatpush.bf16.msra.mxu3 %v5745_v50  ;;  %v6164_v49 = vld [vmem:[#allocation11 + $0x260] sm:$0xf]  ;;  %v7924_v50 = vld [vmem:[#allocation11 + $0x26c] sm:$0xf0] }
 0x12c   :  { %2239 = vmatpush.bf16.msrb.mxu0 %v5957_v45  ;;  %2252 = vmatpush.bf16.msrb.mxu1 %v6085_v48  ;;  %v7906_v45 = vld [vmem:[#allocation11 + $0x1e4] sm:$0xf]  ;;  %v6102_v48 = vld [vmem:[#allocation11 + $0x1f0] sm:$0xf0]  ;;  %v6165_v53 = vor.u32 %v7924_v50, %v6164_v49  ;;  %v7960_v49 = vld [vmem:[#allocation11 + $0x38c] sm:$0xf0] }
 0x12d   :  { %v6105_v52 = vor.u32 %v7906_v45, %v6102_v48  ;;  %v596_v45 = vperm.slane %v8929_v33, 0  ;;  %v6308_v48 = vld [vmem:[#allocation11 + $0x380] sm:$0xf] }
 0x12e   :  { %1434 = vmatmul.bf16.vlgmr.msra.gmra.mxu2 %v8908_v46  ;;  %1447 = vmatmul.bf16.vlgmr.msra.gmra.mxu3 %v8910_v47  ;;  %v5893_v46 = vor.u32 %v7856_v8, %v5892_v6  ;;  %v6021_v47 = vor.u32 %v7888_v10, %v6020_v9  ;;  %v7846_v6 = vld [vmem:[#allocation11 + $0x4] sm:$0xf]  ;;  %v6054_v9 = vld [vmem:[#allocation11 + $0x190] sm:$0xf0]  ;;  %v6309_v50 = vor.u32 %v7960_v49, %v6308_v48 }
 0x12f   :  { %2264 = vmatpush.bf16.msrb.mxu2 %v6229_v55  ;;  %v5894_v55 = vld [vmem:[#allocation11 + $0x50] sm:$0xf0]  ;;  %v7894_v8 = vld [vmem:[#allocation11 + $0x184] sm:$0xf]  ;;  %2277 = vmatpush.bf16.msrb.mxu3 %v6357_v17 }
 0x130   :  { %2240 = vmatpush.bf16.msrb.mxu0 %v5941_v58  ;;  %2253 = vmatpush.bf16.msrb.mxu1 %v6069_v60  ;;  %v5897_v58 = vor.u32 %v7854_v54, %v5894_v55  ;;  %v6148_v60 = vld [vmem:[#allocation11 + $0x240] sm:$0xf]  ;;  %v6182_v55 = vld [vmem:[#allocation11 + $0x290] sm:$0xf0] }
 0x131   :  { %v6149_v62 = vor.u32 %v7920_v61, %v6148_v60  ;;  %v7922_v61 = vld [vmem:[#allocation11 + $0x264] sm:$0xf] }
 0x133   :  { %2265 = vmatpush.bf16.msrb.mxu2 %v6213_v19  ;;  %v5878_v19 = vld [vmem:[#allocation11 + $0x30] sm:$0xf0] }
 0x134   :  { %2241 = vmatpush.bf16.msrb.mxu0 %v5925_v20  ;;  %2254 = vmatpush.bf16.msrb.mxu1 %v6053_v1  ;;  %v7898_v20 = vld [vmem:[#allocation11 + $0x1a4] sm:$0xf]  ;;  %v5881_v1 = vor.u32 %v7850_v63, %v5878_v19 }
 0x135   :  { %v6073_v2 = vor.u32 %v7898_v20, %v6070_v0 }
 0x137   :  { %2266 = vmatpush.bf16.msrb.mxu2 %v6197_v35  ;;  %v7964_v35 = vld [vmem:[#allocation11 + $0x3ac] sm:$0xf0] }
 0x138   :  { %2242 = vmatpush.bf16.msrb.mxu0 %v5909_v5  ;;  %2255 = vmatpush.bf16.msrb.mxu1 %v6037_v7  ;;  %v6133_v5 = vor.u32 %v7916_v4, %v6132_v3  ;;  %v5862_v7 = vld [vmem:[#allocation11 + $0x10] sm:$0xf0]  ;;  %v6325_v36 = vor.u32 %v7964_v35, %v6324_v34  ;;  %v7918_v4 = vld [vmem:[#allocation11 + $0x244] sm:$0xf] }
 0x139   :  { %v5865_v10 = vor.u32 %v7846_v6, %v5862_v7  ;;  %v6358_v35 = vld [vmem:[#allocation11 + $0x3f0] sm:$0xf0] }
 0x13b   :  { %2267 = vmatpush.bf16.msrb.mxu2 %v6181_v42  ;;  %v6009_v42 = vor.u32 %v7882_v37, %v6006_v38 }
 0x13c   :  { %2243 = vmatpush.bf16.msrb.mxu0 %v5893_v46  ;;  %2256 = vmatpush.bf16.msrb.mxu1 %v6021_v47  ;;  %v6057_v46 = vor.u32 %v7894_v8, %v6054_v9  ;;  %v6116_v47 = vld [vmem:[#allocation11 + $0x200] sm:$0xf] }
 0x13f   :  { %2268 = vmatpush.bf16.msrb.mxu2 %v6165_v53  ;;  %v7926_v53 = vld [vmem:[#allocation11 + $0x284] sm:$0xf] }
 0x140   :  { %2244 = vmatpush.bf16.msrb.mxu0 %v5877_v13  ;;  %2257 = vmatpush.bf16.msrb.mxu1 %v6005_v31  ;;  %v6117_v13 = vor.u32 %v7912_v11, %v6116_v47  ;;  %v6214_v31 = vld [vmem:[#allocation11 + $0x2d0] sm:$0xf0]  ;;  %v6185_v56 = vor.u32 %v7926_v53, %v6182_v55  ;;  %v7914_v11 = vld [vmem:[#allocation11 + $0x224] sm:$0xf]  ;;  %v7865_v53 = vld [vmem:[#allocation11 + $0x94] sm:$0xf0] }
 0x141   :  { %v6217_v32 = vor.u32 %v7934_v29, %v6214_v31  ;;  %v7970_v29 = vld [vmem:[#allocation11 + $0x3e4] sm:$0xf]  ;;  %v5964_v31 = vld [vmem:[#allocation11 + $0xc8] sm:$0xf]  ;;  %v6326_v55 = vld [vmem:[#allocation11 + $0x3b0] sm:$0xf0] }
 0x142   :  { %v6361_v38 = vor.u32 %v7970_v29, %v6358_v35  ;;  %v5868_v35 = vld [vmem:[#allocation11 + $0x8] sm:$0xf] }
 0x143   :  { %2269 = vmatpush.bf16.msrb.mxu2 %v6149_v62  ;;  %v6166_v62 = vld [vmem:[#allocation11 + $0x270] sm:$0xf0] }
 0x144   :  { %2245 = vmatpush.bf16.msrb.mxu0 %v5861_v18  ;;  %2258 = vmatpush.bf16.msrb.mxu1 %v5989_v40  ;;  %v6041_v18 = vor.u32 %v7890_v15, %v6038_v16  ;;  %v6169_v20 = vor.u32 %v7922_v61, %v6166_v62  ;;  %v7877_v15 = vld [vmem:[#allocation11 + $0xf4] sm:$0xf0]  ;;  %v6137_v16 = vor.u32 %v7914_v11, %v6134_v12  ;;  %v5916_v61 = vld [vmem:[#allocation11 + $0x68] sm:$0xf]  ;;  %v7954_v11 = vld [vmem:[#allocation11 + $0x364] sm:$0xf] }
 0x145   :  { %v7861_v62 = vld [vmem:[#allocation11 + $0x74] sm:$0xf0]  ;;  %v6294_v12 = vld [vmem:[#allocation11 + $0x370] sm:$0xf0] }
 0x147   :  { %2270 = vmatpush.bf16.msrb.mxu2 %v6133_v5  ;;  %v6150_v5 = vld [vmem:[#allocation11 + $0x250] sm:$0xf0] }
 0x148   :  { %2290 = vmatpush.bf16.msra.mxu0 %v5977_v21  ;;  %2303 = vmatpush.bf16.msra.mxu1 %v6105_v52  ;;  %v7938_v21 = vld [vmem:[#allocation11 + $0x2e4] sm:$0xf]  ;;  %v5990_v52 = vld [vmem:[#allocation11 + $0x110] sm:$0xf0]  ;;  %v6153_v6 = vor.u32 %v7918_v4, %v6150_v5 }
 0x149   :  { %v6233_v23 = vor.u32 %v7938_v21, %v6230_v22  ;;  %v597_v22 = vperm.slane %v8929_v33, 1 }
 0x14b   :  { %2271 = vmatpush.bf16.msrb.mxu2 %v6117_v13 }
 0x14c   :  { %2291 = vmatpush.bf16.msra.mxu0 %v5961_v24  ;;  %2304 = vmatpush.bf16.msra.mxu1 %v6089_v59  ;;  %v6340_v24 = vld [vmem:[#allocation11 + $0x3c0] sm:$0xf]  ;;  %v7956_v59 = vld [vmem:[#allocation11 + $0x36c] sm:$0xf0] }
 0x14d   :  { %v6341_v26 = vor.u32 %v7968_v25, %v6340_v24  ;;  %v7944_v24 = vld [vmem:[#allocation11 + $0x30c] sm:$0xf0]  ;;  %v5981_v25 = vor.u32 %v7877_v15, %v5980_v14 }
 0x14f   :  { %2316 = vmatpush.bf16.msra.mxu2 %v6233_v23  ;;  %2278 = vmatpush.bf16.msrb.mxu3 %v6341_v26  ;;  %v6244_v23 = vld [vmem:[#allocation11 + $0x300] sm:$0xf] }
 0x150   :  { %2292 = vmatpush.bf16.msra.mxu0 %v5945_v27  ;;  %2305 = vmatpush.bf16.msra.mxu1 %v6073_v2  ;;  %v7886_v27 = vld [vmem:[#allocation11 + $0x144] sm:$0xf]  ;;  %v7952_v2 = vld [vmem:[#allocation11 + $0x34c] sm:$0xf0]  ;;  %v6245_v26 = vor.u32 %v7944_v24, %v6244_v23  ;;  %v6076_v23 = vld [vmem:[#allocation11 + $0x1a8] sm:$0xf] }
 0x151   :  { %v6025_v30 = vor.u32 %v7886_v27, %v6022_v28  ;;  %v7910_v27 = vld [vmem:[#allocation11 + $0x204] sm:$0xf]  ;;  %v6118_v28 = vld [vmem:[#allocation11 + $0x210] sm:$0xf0]  ;;  %v7901_v24 = vld [vmem:[#allocation11 + $0x1b4] sm:$0xf0] }
 0x152   :  { %v6121_v34 = vor.u32 %v7910_v27, %v6118_v28 }
 0x153   :  { %2317 = vmatpush.bf16.msra.mxu2 %v6217_v32  ;;  %2279 = vmatpush.bf16.msrb.mxu3 %v6325_v36  ;;  %v7873_v32 = vld [vmem:[#allocation11 + $0xd4] sm:$0xf0] }
 0x154   :  { %2293 = vmatpush.bf16.msra.mxu0 %v5929_v39  ;;  %2306 = vmatpush.bf16.msra.mxu1 %v6057_v46  ;;  %v7930_v39 = vld [vmem:[#allocation11 + $0x2a4] sm:$0xf]  ;;  %v7948_v46 = vld [vmem:[#allocation11 + $0x32c] sm:$0xf0] }
 0x155   :  { %v6201_v44 = vor.u32 %v7930_v39, %v6198_v43  ;;  %v5965_v39 = vor.u32 %v7873_v32, %v5964_v31  ;;  %v7966_v43 = vld [vmem:[#allocation11 + $0x3c4] sm:$0xf] }
 0x157   :  { %2318 = vmatpush.bf16.msra.mxu2 %v6201_v44  ;;  %2280 = vmatpush.bf16.msrb.mxu3 %v6309_v50  ;;  %v6342_v44 = vld [vmem:[#allocation11 + $0x3d0] sm:$0xf0] }
 0x158   :  { %2294 = vmatpush.bf16.msra.mxu0 %v5913_v51  ;;  %2307 = vmatpush.bf16.msra.mxu1 %v6041_v18  ;;  %v7878_v51 = vld [vmem:[#allocation11 + $0x104] sm:$0xf]  ;;  %v6345_v49 = vor.u32 %v7966_v43, %v6342_v44  ;;  %v5982_v43 = vld [vmem:[#allocation11 + $0xf8] sm:$0xf0] }
 0x159   :  { %v5993_v54 = vor.u32 %v7878_v51, %v5990_v52  ;;  %v5932_v51 = vld [vmem:[#allocation11 + $0x88] sm:$0xf] }
 0x15b   :  { %2319 = vmatpush.bf16.msra.mxu2 %v6185_v56 }
 0x15c   :  { %2295 = vmatpush.bf16.msra.mxu0 %v5897_v58  ;;  %2308 = vmatpush.bf16.msra.mxu1 %v6025_v30  ;;  %v6292_v58 = vld [vmem:[#allocation11 + $0x360] sm:$0xf] }
 0x15d   :  { %v6293_v60 = vor.u32 %v7956_v59, %v6292_v58 }
 0x15f   :  { %2281 = vmatpush.bf16.msrb.mxu3 %v6293_v60  ;;  %2320 = vmatpush.bf16.msra.mxu2 %v6169_v20  ;;  %v5933_v60 = vor.u32 %v7865_v53, %v5932_v51  ;;  %v7909_v20 = vld [vmem:[#allocation11 + $0x1f4] sm:$0xf0] }
 0x160   :  { %2296 = vmatpush.bf16.msra.mxu0 %v5881_v1  ;;  %2309 = vmatpush.bf16.msra.mxu1 %v6009_v42  ;;  %v6276_v1 = vld [vmem:[#allocation11 + $0x340] sm:$0xf]  ;;  %v7869_v42 = vld [vmem:[#allocation11 + $0xb4] sm:$0xf0] }
 0x161   :  { %v6277_v3 = vor.u32 %v7952_v2, %v6276_v1  ;;  %v6310_v1 = vld [vmem:[#allocation11 + $0x390] sm:$0xf0]  ;;  %v7893_v53 = vld [vmem:[#allocation11 + $0x174] sm:$0xf0] }
 0x163   :  { %v1253_v40 = vpop.f32.mrf.mxu0  ;;  %v1266_v41 = vpop.f32.mrf.mxu1  ;;  %2282 = vmatpush.bf16.msrb.mxu3 %v6277_v3  ;;  %2321 = vmatpush.bf16.msra.mxu2 %v6153_v6  ;;  %v5917_v6 = vor.u32 %v7861_v62, %v5916_v61  ;;  %v5966_v61 = vld [vmem:[#allocation11 + $0xd8] sm:$0xf0] }
 0x164   :  { %2297 = vmatpush.bf16.msra.mxu0 %v5865_v10  ;;  %v1254_v57 = vadd.f32 %v1253_v40, %v596_v45  ;;  %2310 = vmatpush.bf16.msra.mxu1 %v5993_v54  ;;  %v6260_v10 = vld [vmem:[#allocation11 + $0x320] sm:$0xf]  ;;  %v5948_v40 = vld [vmem:[#allocation11 + $0xa8] sm:$0xf]  ;;  %v7962_v54 = vld [vmem:[#allocation11 + $0x3a4] sm:$0xf] }
 0x165   :  { %v6261_v47 = vor.u32 %v7948_v46, %v6260_v10  ;;  %v5949_v50 = vor.u32 %v7869_v42, %v5948_v40  ;;  %v6329_v58 = vor.u32 %v7962_v54, %v6326_v55  ;;  %v6092_v10 = vld [vmem:[#allocation11 + $0x1c8] sm:$0xf]  ;;  %v6262_v40 = vld [vmem:[#allocation11 + $0x330] sm:$0xf0]  ;;  %v7875_v42 = vld [vmem:[#allocation11 + $0xec] sm:$0xf] }
 0x166   :  { %v1267_v0 = vadd.f32 %v1266_v41, %v1254_v57  ;;  %v5985_v54 = vor.u32 %v7875_v42, %v5982_v43  ;;  %v6236_v55 = vld [vmem:[#allocation11 + $0x2e8] sm:$0xf]  ;;  %v7855_v42 = vld [vmem:[#allocation11 + $0x4c] sm:$0xf]  ;;  %v5902_v43 = vld [vmem:[#allocation11 + $0x58] sm:$0xf0] }
 0x167   :  { %2283 = vmatpush.bf16.msrb.mxu3 %v6261_v47  ;;  %2322 = vmatpush.bf16.msra.mxu2 %v6137_v16  ;;  %v7905_v47 = vld [vmem:[#allocation11 + $0x1d4] sm:$0xf0]  ;;  %v6297_v16 = vor.u32 %v7954_v11, %v6294_v12  ;;  %v6012_v12 = vld [vmem:[#allocation11 + $0x128] sm:$0xf] }
 0x16b   :  { %v1255_v63 = vpop.f32.mrf.mxu0  ;;  %v1268_v19 = vpop.f32.mrf.mxu1  ;;  %2284 = vmatpush.bf16.msrb.mxu3 %v6245_v26  ;;  %2323 = vmatpush.bf16.msra.mxu2 %v6121_v34  ;;  %v6278_v26 = vld [vmem:[#allocation11 + $0x350] sm:$0xf0]  ;;  %v6077_v34 = vor.u32 %v7901_v24, %v6076_v23  ;;  %v5996_v23 = vld [vmem:[#allocation11 + $0x108] sm:$0xf]  ;;  %v7881_v24 = vld [vmem:[#allocation11 + $0x114] sm:$0xf0] }
 0x16c   :  { %v6108_v63 = vld [vmem:[#allocation11 + $0x1e8] sm:$0xf] }
 0x16f   :  { %2329 = vmatpush.bf16.msra.mxu3 %v6361_v38  ;;  %v7897_v38 = vld [vmem:[#allocation11 + $0x194] sm:$0xf0] }
 0x171   :  { %v1279_v7 = vpop.f32.mrf.mxu2  ;;  %v1292_v8 = vpop.f32.mrf.mxu3 }
 0x172   :  { %v1280_v9 = vadd.f32 %v1279_v7, %v1267_v0  ;;  %v7958_v0 = vld [vmem:[#allocation11 + $0x384] sm:$0xf]  ;;  %v6109_v7 = vor.u32 %v7909_v20, %v6108_v63 }
 0x173   :  { %v1305_v17 = vpop.f32.mrf.mxu0  ;;  %v1318_v18 = vpop.f32.mrf.mxu1  ;;  %2330 = vmatpush.bf16.msra.mxu3 %v6345_v49  ;;  %v6313_v4 = vor.u32 %v7958_v0, %v6310_v1  ;;  %v6028_v1 = vld [vmem:[#allocation11 + $0x148] sm:$0xf] }
 0x174   :  { %v1293_v13 = vadd.f32 %v1292_v8, %v1280_v9  ;;  %v1306_v41 = vadd.f32 %v1305_v17, %v597_v22  ;;  %v5900_v8 = vld [vmem:[#allocation11 + $0x48] sm:$0xf]  ;;  %v7857_v9 = vld [vmem:[#allocation11 + $0x54] sm:$0xf0] }
 0x175   :  { %v5901_v17 = vor.u32 %v7857_v9, %v5900_v8  ;;  %v7853_v22 = vld [vmem:[#allocation11 + $0x34] sm:$0xf0] }
 0x176   :  { %v1452_v21 = vmax.f32 %v1293_v13, 0.0  ;;  %v1319_v52 = vadd.f32 %v1318_v18, %v1306_v41  ;;  %v598_v13 = vperm.slane %v8929_v33, 2  ;;  %v6093_v18 = vor.u32 %v7905_v47, %v6092_v10 }
 0x177   :  { %2331 = vmatpush.bf16.msra.mxu3 %v6329_v58 }
 0x178   :  { %v8933_v30 = vpack.c.bf16 %v1452_v21, %v1452_v21  ;;  %v5884_v21 = vld [vmem:[#allocation11 + $0x28] sm:$0xf] }
 0x179   :  { %v1281_v36 = vpop.f32.mrf.mxu2  ;;  %v1294_v37 = vpop.f32.mrf.mxu3  ;;  %v5885_v32 = vor.u32 %v7853_v22, %v5884_v21 }
 0x17a   :  { %2246 = vmatmul.bf16.vlgmr.msrb.gmra.mxu0 %v8933_v30  ;;  %v7849_v36 = vld [vmem:[#allocation11 + $0x14] sm:$0xf0]  ;;  %v6060_v37 = vld [vmem:[#allocation11 + $0x188] sm:$0xf] }
 0x17b   :  { %2342 = vmatpush.bf16.msrb.mxu0 %v5981_v25  ;;  %v1307_v45 = vpop.f32.mrf.mxu0  ;;  %v1320_v48 = vpop.f32.mrf.mxu1  ;;  %2332 = vmatpush.bf16.msra.mxu3 %v6313_v4  ;;  %v7950_v25 = vld [vmem:[#allocation11 + $0x344] sm:$0xf]  ;;  %v6061_v51 = vor.u32 %v7897_v38, %v6060_v37 }
 0x17c   :  { %v6281_v31 = vor.u32 %v7950_v25, %v6278_v26  ;;  %v6188_v25 = vld [vmem:[#allocation11 + $0x288] sm:$0xf]  ;;  %v7929_v26 = vld [vmem:[#allocation11 + $0x294] sm:$0xf0] }
 0x17d   :  { %v6189_v37 = vor.u32 %v7929_v26, %v6188_v25  ;;  %v6348_v26 = vld [vmem:[#allocation11 + $0x3c8] sm:$0xf] }
 0x17f   :  { %2343 = vmatpush.bf16.msrb.mxu0 %v5965_v39  ;;  %2333 = vmatpush.bf16.msra.mxu3 %v6297_v16  ;;  %v7946_v39 = vld [vmem:[#allocation11 + $0x324] sm:$0xf]  ;;  %v7863_v16 = vld [vmem:[#allocation11 + $0x8c] sm:$0xf] }
 0x180   :  { %v6265_v44 = vor.u32 %v7946_v39, %v6262_v40  ;;  %v6172_v39 = vld [vmem:[#allocation11 + $0x268] sm:$0xf] }
 0x181   :  { %v1331_v56 = vpop.f32.mrf.mxu2  ;;  %v1344_v57 = vpop.f32.mrf.mxu3 }
 0x182   :  { %v1332_v59 = vadd.f32 %v1331_v56, %v1319_v52  ;;  %v6044_v52 = vld [vmem:[#allocation11 + $0x168] sm:$0xf]  ;;  %v7942_v56 = vld [vmem:[#allocation11 + $0x304] sm:$0xf] }
 0x183   :  { %2344 = vmatpush.bf16.msrb.mxu0 %v5949_v50  ;;  %2334 = vmatpush.bf16.msra.mxu3 %v6281_v31  ;;  %v5869_v50 = vor.u32 %v7849_v36, %v5868_v35  ;;  %v5997_v35 = vor.u32 %v7881_v24, %v5996_v23  ;;  %v599_v36 = vperm.slane %v8929_v33, 3 }
 0x184   :  { %v1345_v19 = vadd.f32 %v1344_v57, %v1332_v59  ;;  %v6246_v57 = vld [vmem:[#allocation11 + $0x310] sm:$0xf0]  ;;  %v7941_v59 = vld [vmem:[#allocation11 + $0x2f4] sm:$0xf0] }
 0x185   :  { %v6249_v62 = vor.u32 %v7942_v56, %v6246_v57  ;;  %v6237_v20 = vor.u32 %v7941_v59, %v6236_v55  ;;  %v7899_v57 = vld [vmem:[#allocation11 + $0x1ac] sm:$0xf] }
 0x186   :  { %v1357_v2 = vpop.f32.mrf.mxu0  ;;  %v1370_v3 = vpop.f32.mrf.mxu1  ;;  %v1453_v5 = vmax.f32 %v1345_v19, 0.0  ;;  %v6045_v19 = vor.u32 %v7893_v53, %v6044_v52  ;;  %v7921_v52 = vld [vmem:[#allocation11 + $0x254] sm:$0xf0]  ;;  %v7851_v53 = vld [vmem:[#allocation11 + $0x2c] sm:$0xf] }
 0x187   :  { %2345 = vmatpush.bf16.msrb.mxu0 %v5933_v60  ;;  %v1358_v27 = vadd.f32 %v1357_v2, %v598_v13  ;;  %2335 = vmatpush.bf16.msra.mxu3 %v6265_v44  ;;  %v7871_v60 = vld [vmem:[#allocation11 + $0xcc] sm:$0xf]  ;;  %v7889_v2 = vld [vmem:[#allocation11 + $0x154] sm:$0xf0] }
 0x188   :  { %v8936_v46 = vpack.c.bf16 %v1453_v5, %v1453_v5  ;;  %v5969_v0 = vor.u32 %v7871_v60, %v5966_v61  ;;  %v7937_v5 = vld [vmem:[#allocation11 + $0x2d4] sm:$0xf0]  ;;  %v6029_v10 = vor.u32 %v7889_v2, %v6028_v1  ;;  %v7903_v44 = vld [vmem:[#allocation11 + $0x1cc] sm:$0xf]  ;;  %v6140_v61 = vld [vmem:[#allocation11 + $0x228] sm:$0xf] }
 0x189   :  { %v1333_v14 = vpop.f32.mrf.mxu2  ;;  %v1346_v15 = vpop.f32.mrf.mxu3  ;;  %v1371_v41 = vadd.f32 %v1370_v3, %v1358_v27  ;;  %v6220_v3 = vld [vmem:[#allocation11 + $0x2c8] sm:$0xf]  ;;  %v7885_v13 = vld [vmem:[#allocation11 + $0x134] sm:$0xf0]  ;;  %v7859_v27 = vld [vmem:[#allocation11 + $0x6c] sm:$0xf] }
 0x18a   :  { %2259 = vmatmul.bf16.vlgmr.msrb.gmra.mxu1 %v8936_v46  ;;  %2298 = vmatmul.bf16.vlgmr.msra.gmra.mxu0 %v8933_v30  ;;  %v6221_v47 = vor.u32 %v7937_v5, %v6220_v3  ;;  %v6204_v14 = vld [vmem:[#allocation11 + $0x2a8] sm:$0xf]  ;;  %v7933_v15 = vld [vmem:[#allocation11 + $0x2b4] sm:$0xf0]  ;;  %v7895_v3 = vld [vmem:[#allocation11 + $0x18c] sm:$0xf] }
 0x18b   :  { %2346 = vmatpush.bf16.msrb.mxu0 %v5917_v6  ;;  %2355 = vmatpush.bf16.msrb.mxu1 %v6109_v7  ;;  %v7867_v6 = vld [vmem:[#allocation11 + $0xac] sm:$0xf]  ;;  %v5950_v7 = vld [vmem:[#allocation11 + $0xb8] sm:$0xf0]  ;;  %v6205_v21 = vor.u32 %v7933_v15, %v6204_v14 }
 0x18c   :  { %2336 = vmatpush.bf16.msra.mxu3 %v6249_v62  ;;  %v5953_v11 = vor.u32 %v7867_v6, %v5950_v7  ;;  %v6062_v5 = vld [vmem:[#allocation11 + $0x198] sm:$0xf0]  ;;  %v7891_v14 = vld [vmem:[#allocation11 + $0x16c] sm:$0xf] }
 0x18d   :  { %v6046_v15 = vld [vmem:[#allocation11 + $0x178] sm:$0xf0] }
 0x18e   :  { %v1359_v28 = vpop.f32.mrf.mxu0  ;;  %v1372_v29 = vpop.f32.mrf.mxu1  ;;  %v6049_v24 = vor.u32 %v7891_v14, %v6046_v15  ;;  %v6366_v14 = vld [vmem:[#allocation11 + $0x3f8] sm:$0xf0] }
 0x18f   :  { %2347 = vmatpush.bf16.msrb.mxu0 %v5901_v17  ;;  %2356 = vmatpush.bf16.msrb.mxu1 %v6093_v18  ;;  %v5934_v17 = vld [vmem:[#allocation11 + $0x98] sm:$0xf0]  ;;  %v6013_v18 = vor.u32 %v7885_v13, %v6012_v12  ;;  %v6364_v12 = vld [vmem:[#allocation11 + $0x3e8] sm:$0xf]  ;;  %v7973_v13 = vld [vmem:[#allocation11 + $0x3f4] sm:$0xf0] }
 0x190   :  { %v5937_v22 = vor.u32 %v7863_v16, %v5934_v17  ;;  %v5918_v28 = vld [vmem:[#allocation11 + $0x78] sm:$0xf0]  ;;  %v7939_v16 = vld [vmem:[#allocation11 + $0x2ec] sm:$0xf] }
 0x191   :  { %v1383_v45 = vpop.f32.mrf.mxu2  ;;  %v1396_v48 = vpop.f32.mrf.mxu3  ;;  %v5921_v38 = vor.u32 %v7859_v27, %v5918_v28  ;;  %v6238_v17 = vld [vmem:[#allocation11 + $0x2f8] sm:$0xf0]  ;;  %v7969_v27 = vld [vmem:[#allocation11 + $0x3d4] sm:$0xf0]  ;;  %v7887_v28 = vld [vmem:[#allocation11 + $0x14c] sm:$0xf] }
 0x192   :  { %v1384_v49 = vadd.f32 %v1383_v45, %v1371_v41  ;;  %v7925_v41 = vld [vmem:[#allocation11 + $0x274] sm:$0xf0]  ;;  %v6094_v45 = vld [vmem:[#allocation11 + $0x1d8] sm:$0xf0]  ;;  %v6241_v25 = vor.u32 %v7939_v16, %v6238_v17  ;;  %v7967_v17 = vld [vmem:[#allocation11 + $0x3cc] sm:$0xf] }
 0x193   :  { %2348 = vmatpush.bf16.msrb.mxu0 %v5885_v32  ;;  %2357 = vmatpush.bf16.msrb.mxu1 %v6077_v34  ;;  %v7907_v32 = vld [vmem:[#allocation11 + $0x1ec] sm:$0xf]  ;;  %v6110_v34 = vld [vmem:[#allocation11 + $0x1f8] sm:$0xf0]  ;;  %v6097_v33 = vor.u32 %v7903_v44, %v6094_v45 }
 0x194   :  { %v1397_v58 = vadd.f32 %v1396_v48, %v1384_v49  ;;  %v6113_v40 = vor.u32 %v7907_v32, %v6110_v34  ;;  %v6173_v48 = vor.u32 %v7925_v41, %v6172_v39  ;;  %v5905_v49 = vor.u32 %v7855_v42, %v5902_v43  ;;  %v6030_v32 = vld [vmem:[#allocation11 + $0x158] sm:$0xf0]  ;;  %v7935_v34 = vld [vmem:[#allocation11 + $0x2cc] sm:$0xf]  ;;  %v6332_v39 = vld [vmem:[#allocation11 + $0x3a8] sm:$0xf] }
 0x195   :  { %v7883_v41 = vld [vmem:[#allocation11 + $0x12c] sm:$0xf]  ;;  %v6014_v42 = vld [vmem:[#allocation11 + $0x138] sm:$0xf0] }
 0x196   :  { %v1454_v63 = vmax.f32 %v1397_v58, 0.0  ;;  %v6078_v58 = vld [vmem:[#allocation11 + $0x1b8] sm:$0xf0]  ;;  %v7931_v43 = vld [vmem:[#allocation11 + $0x2ac] sm:$0xf] }
 0x197   :  { %2349 = vmatpush.bf16.msrb.mxu0 %v5869_v50  ;;  %2358 = vmatpush.bf16.msrb.mxu1 %v6061_v51  ;;  %v6156_v50 = vld [vmem:[#allocation11 + $0x248] sm:$0xf]  ;;  %v6206_v44 = vld [vmem:[#allocation11 + $0x2b8] sm:$0xf0] }
 0x198   :  { %v8941_v4 = vpack.c.bf16 %v1454_v63, %v1454_v63  ;;  %v6157_v59 = vor.u32 %v7921_v52, %v6156_v50  ;;  %v6081_v63 = vor.u32 %v7899_v57, %v6078_v58  ;;  %v7961_v50 = vld [vmem:[#allocation11 + $0x394] sm:$0xf0]  ;;  %v7927_v52 = vld [vmem:[#allocation11 + $0x28c] sm:$0xf]  ;;  %v6300_v57 = vld [vmem:[#allocation11 + $0x368] sm:$0xf] }
 0x199   :  { %v1385_v8 = vpop.f32.mrf.mxu2  ;;  %v1398_v9 = vpop.f32.mrf.mxu3  ;;  %v7957_v58 = vld [vmem:[#allocation11 + $0x374] sm:$0xf0] }
 0x19a   :  { %2311 = vmatmul.bf16.vlgmr.msra.gmra.mxu1 %v8936_v46  ;;  %2350 = vmatmul.bf16.vlgmr.msrb.gmra.mxu0 %v8933_v30  ;;  %v6124_v9 = vld [vmem:[#allocation11 + $0x208] sm:$0xf] }
 0x19b   :  { %2394 = vmatpush.bf16.msra.mxu0 %v5985_v54  ;;  %2272 = vmatmul.bf16.vlgmr.msrb.gmra.mxu2 %v8941_v4  ;;  %v5886_v54 = vld [vmem:[#allocation11 + $0x38] sm:$0xf0] }
 0x19c   :  { %2359 = vmatpush.bf16.msrb.mxu1 %v6045_v19  ;;  %2368 = vmatpush.bf16.msrb.mxu2 %v6237_v20  ;;  %v5889_v60 = vor.u32 %v7851_v53, %v5886_v54  ;;  %v7917_v19 = vld [vmem:[#allocation11 + $0x234] sm:$0xf0]  ;;  %v7847_v20 = vld [vmem:[#allocation11 + $0xc] sm:$0xf]  ;;  %v6190_v53 = vld [vmem:[#allocation11 + $0x298] sm:$0xf0] }
 0x19d   :  { %v6141_v7 = vor.u32 %v7917_v19, %v6140_v61  ;;  %v6301_v61 = vor.u32 %v7957_v58, %v6300_v57  ;;  %v7953_v19 = vld [vmem:[#allocation11 + $0x354] sm:$0xf0]  ;;  %v7975_v57 = vld [vmem:[#allocation14 + $0x8] sm:$0xff] }
 0x19e   :  { %v7987_v58 = vld [vmem:[#allocation14 + $0x68] sm:$0xff] }
 0x19f   :  { %2395 = vmatpush.bf16.msra.mxu0 %v5969_v0  ;;  %v5870_v0 = vld [vmem:[#allocation11 + $0x18] sm:$0xf0] }
 0x1a0   :  { %2360 = vmatpush.bf16.msrb.mxu1 %v6029_v10  ;;  %2369 = vmatpush.bf16.msrb.mxu2 %v6221_v47  ;;  %v5873_v8 = vor.u32 %v7847_v20, %v5870_v0  ;;  %v7913_v10 = vld [vmem:[#allocation11 + $0x214] sm:$0xf0]  ;;  %v7919_v20 = vld [vmem:[#allocation11 + $0x24c] sm:$0xf]  ;;  %v6158_v0 = vld [vmem:[#allocation11 + $0x258] sm:$0xf0] }
 0x1a3   :  { %2396 = vmatpush.bf16.msra.mxu0 %v5953_v11  ;;  %v6065_v11 = vor.u32 %v7895_v3, %v6062_v5  ;;  %v6268_v3 = vld [vmem:[#allocation11 + $0x328] sm:$0xf]  ;;  %v7949_v5 = vld [vmem:[#allocation11 + $0x334] sm:$0xf0] }
 0x1a4   :  { %2361 = vmatpush.bf16.msrb.mxu1 %v6013_v18  ;;  %2370 = vmatpush.bf16.msrb.mxu2 %v6205_v21  ;;  %v6125_v21 = vor.u32 %v7913_v10, %v6124_v9  ;;  %v6252_v10 = vld [vmem:[#allocation11 + $0x308] sm:$0xf] }
 0x1a6   :  { %v1409_v29 = vpop.f32.mrf.mxu0  ;;  %v1422_v31 = vpop.f32.mrf.mxu1 }
 0x1a7   :  { %2397 = vmatpush.bf16.msra.mxu0 %v5937_v22  ;;  %v1410_v51 = vadd.f32 %v1409_v29, %v599_v36  ;;  %v6365_v22 = vor.u32 %v7973_v13, %v6364_v12  ;;  %v6349_v36 = vor.u32 %v7969_v27, %v6348_v26  ;;  %v6126_v12 = vld [vmem:[#allocation11 + $0x218] sm:$0xf0]  ;;  %v7971_v13 = vld [vmem:[#allocation11 + $0x3ec] sm:$0xf] }
 0x1a8   :  { %2362 = vmatpush.bf16.msrb.mxu1 %v5997_v35  ;;  %2371 = vmatpush.bf16.msrb.mxu2 %v6189_v37  ;;  %v6222_v35 = vld [vmem:[#allocation11 + $0x2d8] sm:$0xf0]  ;;  %v6033_v37 = vor.u32 %v7887_v28, %v6030_v32  ;;  %v6369_v16 = vor.u32 %v7971_v13, %v6366_v14  ;;  %v7959_v26 = vld [vmem:[#allocation11 + $0x38c] sm:$0xf]  ;;  %v7992_v13 = vld [vmem:[#allocation14 + $0x90] sm:$0xff] }
 0x1a9   :  { %v1423_v62 = vadd.f32 %v1422_v31, %v1410_v51  ;;  %v7879_v51 = vld [vmem:[#allocation11 + $0x10c] sm:$0xf]  ;;  %v6318_v27 = vld [vmem:[#allocation11 + $0x398] sm:$0xf0] }
 0x1aa   :  { %v6321_v28 = vor.u32 %v7959_v26, %v6318_v27  ;;  %v7990_v26 = vld [vmem:[#allocation14 + $0x80] sm:$0xff]  ;;  %v8005_v27 = vld [vmem:[#allocation14 + $0xf8] sm:$0xff] }
 0x1ab   :  { %2398 = vmatpush.bf16.msra.mxu0 %v5921_v38  ;;  %2363 = vmatmul.bf16.vlgmr.msrb.gmra.mxu1 %v8936_v46  ;;  %v6225_v38 = vor.u32 %v7935_v34, %v6222_v35  ;;  %v7951_v34 = vld [vmem:[#allocation11 + $0x34c] sm:$0xf]  ;;  %v6286_v35 = vld [vmem:[#allocation11 + $0x358] sm:$0xf0] }
 0x1ac   :  { %2407 = vmatpush.bf16.msra.mxu1 %v6113_v40  ;;  %2324 = vmatmul.bf16.vlgmr.msra.gmra.mxu2 %v8941_v4  ;;  %v7965_v40 = vld [vmem:[#allocation11 + $0x3b4] sm:$0xf0] }
 0x1ad   :  { %2372 = vmatpush.bf16.msrb.mxu2 %v6173_v48  ;;  %v6333_v45 = vor.u32 %v7965_v40, %v6332_v39  ;;  %v6209_v48 = vor.u32 %v7931_v43, %v6206_v44  ;;  %v7943_v40 = vld [vmem:[#allocation11 + $0x30c] sm:$0xf]  ;;  %v7981_v44 = vld [vmem:[#allocation14 + $0x38] sm:$0xff] }
 0x1ae   :  { %v1411_v55 = vpop.f32.mrf.mxu0  ;;  %v1424_v56 = vpop.f32.mrf.mxu1 }
 0x1af   :  { %2399 = vmatpush.bf16.msra.mxu0 %v5905_v49  ;;  %v6316_v49 = vld [vmem:[#allocation11 + $0x388] sm:$0xf]  ;;  %v6193_v56 = vor.u32 %v7927_v52, %v6190_v53  ;;  %v7977_v52 = vld [vmem:[#allocation14 + $0x18] sm:$0xff] }
 0x1b0   :  { %2408 = vmatpush.bf16.msra.mxu1 %v6097_v33  ;;  %v5998_v33 = vld [vmem:[#allocation11 + $0x118] sm:$0xf0]  ;;  %v6317_v54 = vor.u32 %v7961_v50, %v6316_v49  ;;  %v7979_v49 = vld [vmem:[#allocation14 + $0x28] sm:$0xff]  ;;  %v7978_v50 = vld [vmem:[#allocation14 + $0x20] sm:$0xff] }
 0x1b1   :  { %v1435_v1 = vpop.f32.mrf.mxu2  ;;  %v1448_v2 = vpop.f32.mrf.mxu3  ;;  %2373 = vmatpush.bf16.msrb.mxu2 %v6157_v59  ;;  %v6001_v55 = vor.u32 %v7879_v51, %v5998_v33  ;;  %v7923_v59 = vld [vmem:[#allocation11 + $0x26c] sm:$0xf]  ;;  %v7989_v53 = vld [vmem:[#allocation14 + $0x78] sm:$0xff] }
 0x1b2   :  { %v1436_v6 = vadd.f32 %v1435_v1, %v1423_v62 }
 0x1b3   :  { %2400 = vmatpush.bf16.msra.mxu0 %v5889_v60  ;;  %v6174_v60 = vld [vmem:[#allocation11 + $0x278] sm:$0xf0] }
 0x1b4   :  { %v1449_v47 = vadd.f32 %v1448_v2, %v1436_v6  ;;  %2409 = vmatpush.bf16.msra.mxu1 %v6081_v63  ;;  %v6177_v62 = vor.u32 %v7923_v59, %v6174_v60  ;;  %v6284_v63 = vld [vmem:[#allocation11 + $0x348] sm:$0xf]  ;;  %v6161_v2 = vor.u32 %v7919_v20, %v6158_v0  ;;  %v7915_v6 = vld [vmem:[#allocation11 + $0x22c] sm:$0xf]  ;;  %v7997_v20 = vld [vmem:[#allocation14 + $0xb8] sm:$0xff] }
 0x1b5   :  { %2374 = vmatpush.bf16.msrb.mxu2 %v6141_v7  ;;  %v6285_v1 = vor.u32 %v7953_v19, %v6284_v63  ;;  %v6142_v7 = vld [vmem:[#allocation11 + $0x238] sm:$0xf0]  ;;  %v7974_v59 = vld [vmem:[#allocation14] sm:$0xff]  ;;  %v7984_v0 = vld [vmem:[#allocation14 + $0x50] sm:$0xff] }
 0x1b6   :  { %v1455_v18 = vmax.f32 %v1449_v47, 0.0  ;;  %v6145_v9 = vor.u32 %v7915_v6, %v6142_v7  ;;  %v7945_v47 = vld [vmem:[#allocation11 + $0x314] sm:$0xf0]  ;;  %v7986_v60 = vld [vmem:[#allocation14 + $0x60] sm:$0xff]  ;;  %v7985_v19 = vld [vmem:[#allocation14 + $0x58] sm:$0xff] }
 0x1b7   :  { %2401 = vmatpush.bf16.msra.mxu0 %v5873_v8  ;;  %v6269_v8 = vor.u32 %v7949_v5, %v6268_v3  ;;  %v6253_v15 = vor.u32 %v7945_v47, %v6252_v10  ;;  %v7983_v5 = vld [vmem:[#allocation14 + $0x48] sm:$0xff]  ;;  %v7982_v7 = vld [vmem:[#allocation14 + $0x40] sm:$0xff] }
 0x1b8   :  { %v8949_v23 = vpack.c.bf16 %v1455_v18, %v1455_v18  ;;  %2410 = vmatpush.bf16.msra.mxu1 %v6065_v11  ;;  %v7911_v11 = vld [vmem:[#allocation11 + $0x20c] sm:$0xf]  ;;  %v6350_v18 = vld [vmem:[#allocation11 + $0x3d8] sm:$0xf0] }
 0x1b9   :  { %v1437_v29 = vpop.f32.mrf.mxu2  ;;  %v1450_v31 = vpop.f32.mrf.mxu3  ;;  %2375 = vmatpush.bf16.msrb.mxu2 %v6125_v21  ;;  %v6353_v21 = vor.u32 %v7967_v17, %v6350_v18  ;;  %v7995_v6 = vld [vmem:[#allocation14 + $0xa8] sm:$0xff] }
 0x1ba   :  { %2285 = vmatmul.bf16.vlgmr.msrb.gmra.mxu3 %v8949_v23  ;;  %2402 = vmatmul.bf16.vlgmr.msra.gmra.mxu0 %v8933_v30  ;;  %v6017_v30 = vor.u32 %v7883_v41, %v6014_v42  ;;  %v7955_v29 = vld [vmem:[#allocation11 + $0x36c] sm:$0xf]  ;;  %v6302_v31 = vld [vmem:[#allocation11 + $0x378] sm:$0xf0] }
 0x1bb   :  { %2381 = vmatpush.bf16.msrb.mxu3 %v6365_v22  ;;  %v7963_v22 = vld [vmem:[#allocation11 + $0x3ac] sm:$0xf]  ;;  %v6305_v32 = vor.u32 %v7955_v29, %v6302_v31  ;;  %2714 = vmatpush.bf16.msrb.mxu0 %v7981_v44 }
 0x1bc   :  { %2411 = vmatpush.bf16.msra.mxu1 %v6049_v24  ;;  %2376 = vmatmul.bf16.vlgmr.msrb.gmra.mxu2 %v8941_v4  ;;  %v6334_v24 = vld [vmem:[#allocation11 + $0x3b8] sm:$0xf0]  ;;  %v7991_v18 = vld [vmem:[#allocation14 + $0x88] sm:$0xff] }
 0x1bd   :  { %2420 = vmatpush.bf16.msra.mxu2 %v6241_v25  ;;  %v6337_v25 = vor.u32 %v7963_v22, %v6334_v24 }
 0x1bf   :  { %2382 = vmatpush.bf16.msrb.mxu3 %v6349_v36  ;;  %v6289_v36 = vor.u32 %v7951_v34, %v6286_v35  ;;  %v8003_v35 = vld [vmem:[#allocation14 + $0xe8] sm:$0xff] }
 0x1c0   :  { %2412 = vmatpush.bf16.msra.mxu1 %v6033_v37  ;;  %v7947_v37 = vld [vmem:[#allocation11 + $0x32c] sm:$0xf] }
 0x1c1   :  { %2421 = vmatpush.bf16.msra.mxu2 %v6225_v38  ;;  %v6270_v38 = vld [vmem:[#allocation11 + $0x338] sm:$0xf0] }
 0x1c2   :  { %v6273_v39 = vor.u32 %v7947_v37, %v6270_v38 }
 0x1c3   :  { %2383 = vmatpush.bf16.msrb.mxu3 %v6333_v45  ;;  %v7980_v45 = vld [vmem:[#allocation14 + $0x30] sm:$0xff] }
 0x1c4   :  { %2413 = vmatpush.bf16.msra.mxu1 %v6017_v30  ;;  %2715 = vmatpush.bf16.msrb.mxu0 %v7980_v45 }
 0x1c5   :  { %2422 = vmatpush.bf16.msra.mxu2 %v6209_v48 }
 0x1c7   :  { %2384 = vmatpush.bf16.msrb.mxu3 %v6317_v54  ;;  %v7988_v54 = vld [vmem:[#allocation14 + $0x70] sm:$0xff] }
 0x1c8   :  { %2414 = vmatpush.bf16.msra.mxu1 %v6001_v55  ;;  %2716 = vmatpush.bf16.msrb.mxu0 %v7979_v49  ;;  %v8000_v49 = vld [vmem:[#allocation14 + $0xd0] sm:$0xff] }
 0x1c9   :  { %2423 = vmatpush.bf16.msra.mxu2 %v6193_v56 }
 0x1ca   :  { %2337 = vmatmul.bf16.vlgmr.msra.gmra.mxu3 %v8949_v23 }
 0x1cb   :  { %2385 = vmatpush.bf16.msrb.mxu3 %v6301_v61  ;;  %2415 = vmatmul.bf16.vlgmr.msra.gmra.mxu1 %v8936_v46  ;;  %v6129_v46 = vor.u32 %v7911_v11, %v6126_v12  ;;  %v7993_v12 = vld [vmem:[#allocation14 + $0x98] sm:$0xff] }
 0x1cc   :  { %2717 = vmatpush.bf16.msrb.mxu0 %v7978_v50  ;;  %2727 = vmatpush.bf16.msrb.mxu1 %v7989_v53 }
 0x1cd   :  { %2424 = vmatpush.bf16.msra.mxu2 %v6177_v62 }
 0x1cf   :  { %2386 = vmatpush.bf16.msrb.mxu3 %v6285_v1  ;;  %v7996_v1 = vld [vmem:[#allocation14 + $0xb0] sm:$0xff] }
 0x1d0   :  { %2718 = vmatpush.bf16.msrb.mxu0 %v7977_v52  ;;  %2728 = vmatpush.bf16.msrb.mxu1 %v7988_v54 }
 0x1d1   :  { %2425 = vmatpush.bf16.msra.mxu2 %v6161_v2 }
 0x1d3   :  { %2387 = vmatpush.bf16.msrb.mxu3 %v6269_v8  ;;  %v7994_v8 = vld [vmem:[#allocation14 + $0xa0] sm:$0xff] }
 0x1d4   :  { %2729 = vmatpush.bf16.msrb.mxu1 %v7987_v58 }
 0x1d5   :  { %2426 = vmatpush.bf16.msra.mxu2 %v6145_v9  ;;  %v8967_v9 = vld [vmem:[#allocation13] sm:$0xf] }
 0x1d6   :  { %v1590_v11 = vperm.slane %v8967_v9, 0  ;;  %v1591_v31 = vperm.slane %v8967_v9, 1  ;;  %v1592_v50 = vperm.slane %v8967_v9, 2 }
 0x1d7   :  { %2388 = vmatpush.bf16.msrb.mxu3 %v6253_v15 }
 0x1d8   :  { %2730 = vmatpush.bf16.msrb.mxu1 %v7986_v60 }
 0x1d9   :  { %2427 = vmatpush.bf16.msra.mxu2 %v6129_v46 }
 0x1da   :  { %2389 = vmatmul.bf16.vlgmr.msrb.gmra.mxu3 %v8949_v23 }
 0x1db   :  { %2433 = vmatpush.bf16.msra.mxu3 %v6369_v16 }
 0x1dc   :  { %2428 = vmatmul.bf16.vlgmr.msra.gmra.mxu2 %v8941_v4  ;;  %v6254_v4 = vld [vmem:[#allocation11 + $0x318] sm:$0xf0]  ;;  %2731 = vmatpush.bf16.msrb.mxu1 %v7985_v19 }
 0x1dd   :  { %v6257_v41 = vor.u32 %v7943_v40, %v6254_v4  ;;  %2740 = vmatpush.bf16.msrb.mxu2 %v7997_v20  ;;  %v8002_v40 = vld [vmem:[#allocation14 + $0xe0] sm:$0xff] }
 0x1df   :  { %2434 = vmatpush.bf16.msra.mxu3 %v6353_v21 }
 0x1e0   :  { %2732 = vmatpush.bf16.msrb.mxu1 %v7984_v0 }
 0x1e1   :  { %2741 = vmatpush.bf16.msrb.mxu2 %v7996_v1 }
 0x1e3   :  { %2435 = vmatpush.bf16.msra.mxu3 %v6337_v25 }
 0x1e4   :  { %2733 = vmatpush.bf16.msrb.mxu1 %v7983_v5 }
 0x1e5   :  { %2742 = vmatpush.bf16.msrb.mxu2 %v7995_v6 }
 0x1e7   :  { %2436 = vmatpush.bf16.msra.mxu3 %v6321_v28 }
 0x1e8   :  { %2734 = vmatpush.bf16.msrb.mxu1 %v7982_v7 }
 0x1e9   :  { %2743 = vmatpush.bf16.msrb.mxu2 %v7994_v8 }
 0x1eb   :  { %2437 = vmatpush.bf16.msra.mxu3 %v6305_v32  ;;  %v8004_v32 = vld [vmem:[#allocation14 + $0xf0] sm:$0xff] }
 0x1ed   :  { %2744 = vmatpush.bf16.msrb.mxu2 %v7993_v12  ;;  %v2790_v12 = vld [vmem:[#allocation17 + $0x68] sm:$0x11] }
 0x1ef   :  { %2438 = vmatpush.bf16.msra.mxu3 %v6289_v36 }
 0x1f1   :  { %2745 = vmatpush.bf16.msrb.mxu2 %v7992_v13 }
 0x1f3   :  { %2439 = vmatpush.bf16.msra.mxu3 %v6273_v39 }
 0x1f5   :  { %2746 = vmatpush.bf16.msrb.mxu2 %v7991_v18 }
 0x1f7   :  { %2440 = vmatpush.bf16.msra.mxu3 %v6257_v41  ;;  %v2247_v42 = vpop.f32.mrf.mxu0 }
 0x1f8   :  { %v2248_v15 = vadd.f32 %v2247_v42, %v1590_v11  ;;  %v2789_v11 = vld [vmem:[#allocation17 + $0x60] sm:$0x11] }
 0x1f9   :  { %2747 = vmatpush.bf16.msrb.mxu2 %v7990_v26  ;;  %v2839_v13 = vunpack.c.l.b16 %v2789_v11  ;;  %v6540_v26 = vld [vmem:[#allocation17 + $0x48] sm:$0xf] }
 0x1fa   :  { %2441 = vmatmul.bf16.vlgmr.msra.gmra.mxu3 %v8949_v23  ;;  %v7976_v23 = vld [vmem:[#allocation14 + $0x10] sm:$0xff] }
 0x1fb   :  { %2719 = vmatpush.bf16.msrb.mxu0 %v7976_v23  ;;  %2753 = vmatpush.bf16.msrb.mxu3 %v8005_v27  ;;  %v7998_v23 = vld [vmem:[#allocation14 + $0xc0] sm:$0xff]  ;;  %v8017_v27 = vld [vmem:[#allocation17 + $0x54] sm:$0xf0] }
 0x1ff   :  { %v2249_v43 = vpop.f32.mrf.mxu0  ;;  %2720 = vmatpush.bf16.msrb.mxu0 %v7975_v57  ;;  %2754 = vmatpush.bf16.msrb.mxu3 %v8004_v32 }
 0x200   :  { %v8001_v43 = vld [vmem:[#allocation14 + $0xd8] sm:$0xff] }
 0x203   :  { %2721 = vmatpush.bf16.msrb.mxu0 %v7974_v59  ;;  %2755 = vmatpush.bf16.msrb.mxu3 %v8003_v35 }
 0x207   :  { %v2260_v30 = vpop.f32.mrf.mxu1  ;;  %v8959_v48 = vpop.f32.mrf.mxu0  ;;  %2756 = vmatpush.bf16.msrb.mxu3 %v8002_v40  ;;  %v8326_v40 = vld [vmem:[#allocation16] ss:$0 sm:$0xff] }
 0x208   :  { %v2261_v16 = vadd.f32 %v2260_v30, %v2248_v15  ;;  %v2300_v36 = vadd.f32 %v8959_v48, %v1591_v31  ;;  %v2840_v15 = vunpack.c.h.b16 %v2789_v11  ;;  %v8080_v11 = vld [vmem:[#allocation19 + $0x1ec] sm:$0xf0] }
 0x20a   :  { %v2856_v18 = vpack.c.b16 %v2840_v15, %v2840_v15 }
 0x20b   :  { %2757 = vmatpush.bf16.msrb.mxu3 %v8001_v43 }
 0x20c   :  { %v2880_v32 = vsel %vm2875_vm2, %v2856_v18, 0  ;;  %v7048_v18 = vld [vmem:[#allocation19 + $0x3e0] sm:$0xf] }
 0x20d   :  { %2905 = vmatpush.bf16.msra.mxu1 %v2880_v32  ;;  %v8108_v32 = vld [vmem:[#allocation19 + $0x2cc] sm:$0xf0] }
 0x20f   :  { %v2262_v51 = vpop.f32.mrf.mxu1  ;;  %v2301_v33 = vpop.f32.mrf.mxu0  ;;  %2758 = vmatpush.bf16.msrb.mxu3 %v8000_v49 }
 0x210   :  { %v7999_v33 = vld [vmem:[#allocation14 + $0xc8] sm:$0xff] }
 0x213   :  { %2759 = vmatpush.bf16.msrb.mxu3 %v7999_v33  ;;  %v8010_v33 = vld [vmem:[#allocation17 + $0x24] sm:$0xf] }
 0x217   :  { %v8961_v55 = vpop.f32.mrf.mxu1  ;;  %v8963_v56 = vpop.f32.mrf.mxu0  ;;  %2760 = vmatpush.bf16.msrb.mxu3 %v7998_v23  ;;  %v6524_v23 = vld [vmem:[#allocation17 + $0x28] sm:$0xf] }
 0x218   :  { %v2313_v39 = vadd.f32 %v8961_v55, %v2300_v36  ;;  %v2352_v51 = vadd.f32 %v8963_v56, %v1592_v50 }
 0x21e   :  { %v2273_v61 = vpop.f32.mrf.mxu2 }
 0x21f   :  { %v2314_v62 = vpop.f32.mrf.mxu1  ;;  %v2353_v63 = vpop.f32.mrf.mxu0  ;;  %v2274_v17 = vadd.f32 %v2273_v61, %v2261_v16  ;;  %v8016_v16 = vld [vmem:[#allocation17 + $0x4c] sm:$0xf0] }
 0x220   :  { %v1593_v62 = vperm.slane %v8967_v9, 3  ;;  %v2841_v9 = vunpack.c.l.b16 %v2790_v12 }
 0x226   :  { %v2275_v2 = vpop.f32.mrf.mxu2 }
 0x228   :  { %v8965_v3 = vpop.f32.mrf.mxu1 }
 0x229   :  { %v2365_v52 = vadd.f32 %v8965_v3, %v2352_v51  ;;  %v8012_v51 = vld [vmem:[#allocation17 + $0x2c] sm:$0xf0] }
 0x22f   :  { %v2325_v10 = vpop.f32.mrf.mxu2 }
 0x230   :  { %v2366_v47 = vpop.f32.mrf.mxu1  ;;  %v2326_v4 = vadd.f32 %v2325_v10, %v2313_v39 }
 0x237   :  { %v2403_v14 = vpop.f32.mrf.mxu0  ;;  %v2327_v46 = vpop.f32.mrf.mxu2 }
 0x238   :  { %v2404_v63 = vadd.f32 %v2403_v14, %v1593_v62  ;;  %v2842_v14 = vunpack.c.h.b16 %v2790_v12  ;;  %v6532_v46 = vld [vmem:[#allocation17 + $0x40] sm:$0xf]  ;;  %v8008_v62 = vld [vmem:[#allocation17 + $0xc] sm:$0xf0] }
 0x239   :  { %v6533_v36 = vor.u32 %v8016_v16, %v6532_v46  ;;  %v6648_v12 = vld [vmem:[#allocation19 + $0xc0] sm:$0xf] }
 0x23a   :  { %v6920_v46 = vld [vmem:[#allocation19 + $0x2e0] sm:$0xf] }
 0x23d   :  { %v2286_v21 = vpop.f32.mrf.mxu3 }
 0x23e   :  { %v2287_v22 = vadd.f32 %v2286_v21, %v2274_v17  ;;  %v2855_v17 = vpack.c.b16 %v2839_v13, %v2839_v13  ;;  %v2857_v21 = vpack.c.b16 %v2841_v9, %v2841_v9  ;;  %v8044_v13 = vld [vmem:[#allocation19 + $0xcc] sm:$0xf0]  ;;  %v6776_v9 = vld [vmem:[#allocation19 + $0x1c0] sm:$0xf] }
 0x23f   :  { %v2405_v24 = vpop.f32.mrf.mxu0  ;;  %v2377_v28 = vpop.f32.mrf.mxu2  ;;  %v6649_v16 = vor.u32 %v8044_v13, %v6648_v12  ;;  %v8124_v12 = vld [vmem:[#allocation19 + $0x34c] sm:$0xf0] }
 0x240   :  { %v2446_v25 = vmax.f32 %v2287_v22, 0.0  ;;  %v2378_v53 = vadd.f32 %v2377_v28, %v2365_v52  ;;  %v2858_v22 = vpack.c.b16 %v2842_v14, %v2842_v14  ;;  %v8014_v24 = vld [vmem:[#allocation17 + $0x44] sm:$0xf]  ;;  %v8015_v28 = vld [vmem:[#allocation17 + $0x4c] sm:$0xf]  ;;  %v2877_v31 = vsel %vm2875_vm2, %v2855_v17, 0 }
 0x241   :  { %2892 = vmatpush.bf16.msra.mxu0 %v2877_v31  ;;  %v8076_v14 = vld [vmem:[#allocation19 + $0x1cc] sm:$0xf0]  ;;  %v6904_v31 = vld [vmem:[#allocation19 + $0x2c0] sm:$0xf] }
 0x242   :  { %v2450_v29 = vpack.c.bf16 %v2446_v25, %v2446_v25  ;;  %v6534_v25 = vld [vmem:[#allocation17 + $0x50] sm:$0xf0]  ;;  %v2886_v35 = vsel %vm2875_vm2, %v2858_v22, 0  ;;  %v8112_v17 = vld [vmem:[#allocation19 + $0x2ec] sm:$0xf0]  ;;  %v6777_v22 = vor.u32 %v8076_v14, %v6776_v9 }
 0x243   :  { %2931 = vmatpush.bf16.msra.mxu3 %v2886_v35  ;;  %v7032_v35 = vld [vmem:[#allocation19 + $0x3c0] sm:$0xf]  ;;  %v8024_v9 = vld [vmem:[#allocation19 + $0x2c] sm:$0xf0] }
 0x244   :  { %2722 = vmatmul.bf16.vlgmr.msrb.gmra.mxu0 %v2450_v29  ;;  %v6542_v29 = vld [vmem:[#allocation17 + $0x58] sm:$0xf0]  ;;  %v6696_v14 = vld [vmem:[#allocation19 + $0x120] sm:$0xf] }
 0x245   :  { %v2288_v34 = vpop.f32.mrf.mxu3  ;;  %v6545_v39 = vor.u32 %v8015_v28, %v6542_v29  ;;  %2893 = vmatpush.bf16.msra.mxu0 %v6533_v36  ;;  %v6760_v28 = vld [vmem:[#allocation19 + $0x1a0] sm:$0xf]  ;;  %v8072_v29 = vld [vmem:[#allocation19 + $0x1ac] sm:$0xf0] }
 0x246   :  { %v2883_v34 = vsel %vm2875_vm2, %v2857_v21, 0  ;;  %v8144_v21 = vld [vmem:[#allocation19 + $0x3ec] sm:$0xf0] }
 0x247   :  { %v2379_v38 = vpop.f32.mrf.mxu2  ;;  %2918 = vmatpush.bf16.msra.mxu2 %v2883_v34  ;;  %2932 = vmatpush.bf16.msra.mxu3 %v6545_v39  ;;  %v6905_v34 = vor.u32 %v8108_v32, %v6904_v31  ;;  %v8140_v36 = vld [vmem:[#allocation19 + $0x3cc] sm:$0xf0]  ;;  %v6616_v39 = vld [vmem:[#allocation19 + $0x80] sm:$0xf] }
 0x248   :  { %v2416_v37 = vpop.f32.mrf.mxu1  ;;  %v6541_v38 = vor.u32 %v8017_v27, %v6540_v26  ;;  %v6632_v26 = vld [vmem:[#allocation19 + $0xa0] sm:$0xf]  ;;  %v8040_v27 = vld [vmem:[#allocation19 + $0xac] sm:$0xf0] }
 0x249   :  { %v2417_v19 = vadd.f32 %v2416_v37, %v2404_v63  ;;  %v6537_v37 = vor.u32 %v8014_v24, %v6534_v25  ;;  %v8006_v63 = vld [vmem:[#allocation17 + $0x4] sm:$0xf]  ;;  %v6921_v24 = vor.u32 %v8112_v17, %v6920_v46  ;;  %v7049_v25 = vor.u32 %v8144_v21, %v7048_v18  ;;  %v8056_v46 = vld [vmem:[#allocation19 + $0x12c] sm:$0xf0]  ;;  %v6824_v21 = vld [vmem:[#allocation19 + $0x220] sm:$0xf] }
 0x24a   :  { %v8020_v32 = vld [vmem:[#allocation19 + $0xc] sm:$0xf0] }
 0x24b   :  { %2906 = vmatpush.bf16.msra.mxu1 %v6537_v37  ;;  %2919 = vmatpush.bf16.msra.mxu2 %v6541_v38  ;;  %v6633_v37 = vor.u32 %v8040_v27, %v6632_v26  ;;  %v7033_v38 = vor.u32 %v8140_v36, %v7032_v35  ;;  %v8120_v26 = vld [vmem:[#allocation19 + $0x32c] sm:$0xf0]  ;;  %v8046_v36 = vld [vmem:[#allocation19 + $0xe4] sm:$0xf] }
 0x24c   :  { %v8052_v35 = vld [vmem:[#allocation19 + $0x10c] sm:$0xf0] }
 0x24d   :  { %v2338_v41 = vpop.f32.mrf.mxu3 }
 0x24e   :  { %v2339_v42 = vadd.f32 %v2338_v41, %v2326_v4 }
 0x250   :  { %v2447_v44 = vmax.f32 %v2339_v42, 0.0  ;;  %v2418_v45 = vpop.f32.mrf.mxu1 }
 0x252   :  { %v2451_v30 = vpack.c.bf16 %v2447_v44, %v2447_v44 }
 0x254   :  { %2735 = vmatmul.bf16.vlgmr.msrb.gmra.mxu1 %v2451_v30 }
 0x255   :  { %v2340_v48 = vpop.f32.mrf.mxu3 }
 0x256   :  { %v6516_v48 = vld [vmem:[#allocation17 + $0x20] sm:$0xf] }
 0x257   :  { %v6517_v52 = vor.u32 %v8012_v51, %v6516_v48  ;;  %v6872_v51 = vld [vmem:[#allocation19 + $0x280] sm:$0xf] }
 0x259   :  { %2894 = vmatpush.bf16.msra.mxu0 %v6517_v52  ;;  %v8100_v52 = vld [vmem:[#allocation19 + $0x28c] sm:$0xf0] }
 0x25d   :  { %v2390_v54 = vpop.f32.mrf.mxu3 }
 0x25e   :  { %v2391_v55 = vadd.f32 %v2390_v54, %v2378_v53  ;;  %v6518_v53 = vld [vmem:[#allocation17 + $0x30] sm:$0xf0]  ;;  %v8013_v54 = vld [vmem:[#allocation17 + $0x34] sm:$0xf0] }
 0x25f   :  { %v2429_v57 = vpop.f32.mrf.mxu2 }
 0x260   :  { %v2448_v58 = vmax.f32 %v2391_v55, 0.0  ;;  %v2430_v56 = vadd.f32 %v2429_v57, %v2417_v19  ;;  %v6521_v55 = vor.u32 %v8010_v33, %v6518_v53  ;;  %v6525_v57 = vor.u32 %v8013_v54, %v6524_v23  ;;  %v7000_v53 = vld [vmem:[#allocation19 + $0x380] sm:$0xf]  ;;  %v8132_v23 = vld [vmem:[#allocation19 + $0x38c] sm:$0xf0] }
 0x262   :  { %v2452_v59 = vpack.c.bf16 %v2448_v58, %v2448_v58  ;;  %v8011_v58 = vld [vmem:[#allocation17 + $0x2c] sm:$0xf]  ;;  %2907 = vmatpush.bf16.msra.mxu1 %v6521_v55  ;;  %2920 = vmatpush.bf16.msra.mxu2 %v6525_v57  ;;  %v6600_v55 = vld [vmem:[#allocation19 + $0x60] sm:$0xf]  ;;  %v8032_v57 = vld [vmem:[#allocation19 + $0x6c] sm:$0xf0] }
 0x264   :  { %2748 = vmatmul.bf16.vlgmr.msrb.gmra.mxu2 %v2452_v59  ;;  %v6526_v59 = vld [vmem:[#allocation17 + $0x38] sm:$0xf0] }
 0x265   :  { %v2392_v60 = vpop.f32.mrf.mxu3 }
 0x266   :  { %v6529_v60 = vor.u32 %v8011_v58, %v6526_v59  ;;  %v6728_v58 = vld [vmem:[#allocation19 + $0x160] sm:$0xf]  ;;  %v8064_v59 = vld [vmem:[#allocation19 + $0x16c] sm:$0xf0] }
 0x267   :  { %v2431_v61 = vpop.f32.mrf.mxu2 }
 0x268   :  { %v6500_v61 = vld [vmem:[#allocation17] sm:$0xf]  ;;  %2933 = vmatpush.bf16.msra.mxu3 %v6529_v60  ;;  %v6873_v60 = vor.u32 %v8100_v52, %v6872_v51  ;;  %v8142_v52 = vld [vmem:[#allocation19 + $0x3e4] sm:$0xf] }
 0x269   :  { %v6501_v19 = vor.u32 %v8008_v62, %v6500_v61  ;;  %v7001_v61 = vor.u32 %v8132_v23, %v7000_v53  ;;  %v6856_v62 = vld [vmem:[#allocation19 + $0x260] sm:$0xf]  ;;  %v7050_v53 = vld [vmem:[#allocation19 + $0x3f0] sm:$0xf0] }
 0x26b   :  { %2895 = vmatpush.bf16.msra.mxu0 %v6501_v19  ;;  %v8096_v19 = vld [vmem:[#allocation19 + $0x26c] sm:$0xf0] }
 0x27d   :  { %v2442_v20 = vpop.f32.mrf.mxu3 }
 0x27e   :  { %v2443_v0 = vadd.f32 %v2442_v20, %v2430_v56  ;;  %v6502_v56 = vld [vmem:[#allocation17 + $0x10] sm:$0xf0]  ;;  %v6508_v20 = vld [vmem:[#allocation17 + $0x8] sm:$0xf] }
 0x280   :  { %v2449_v1 = vmax.f32 %v2443_v0, 0.0  ;;  %v8009_v0 = vld [vmem:[#allocation17 + $0x14] sm:$0xf0] }
 0x282   :  { %v2453_v2 = vpack.c.bf16 %v2449_v1, %v2449_v1  ;;  %v6505_v1 = vor.u32 %v8006_v63, %v6502_v56  ;;  %v6601_v63 = vor.u32 %v8032_v57, %v6600_v55  ;;  %v6984_v56 = vld [vmem:[#allocation19 + $0x360] sm:$0xf]  ;;  %v8042_v55 = vld [vmem:[#allocation19 + $0xc4] sm:$0xf] }
 0x283   :  { %v8074_v57 = vld [vmem:[#allocation19 + $0x1c4] sm:$0xf] }
 0x284   :  { %2761 = vmatmul.bf16.vlgmr.msrb.gmra.mxu3 %v2453_v2  ;;  %v6509_v2 = vor.u32 %v8009_v0, %v6508_v20  ;;  %2908 = vmatpush.bf16.msra.mxu1 %v6505_v1  ;;  %v8128_v20 = vld [vmem:[#allocation19 + $0x36c] sm:$0xf0]  ;;  %v6729_v0 = vor.u32 %v8064_v59, %v6728_v58  ;;  %v6584_v1 = vld [vmem:[#allocation19 + $0x40] sm:$0xf]  ;;  %v6778_v58 = vld [vmem:[#allocation19 + $0x1d0] sm:$0xf0] }
 0x285   :  { %v2444_v3 = vpop.f32.mrf.mxu3 }
 0x286   :  { %v8007_v3 = vld [vmem:[#allocation17 + $0xc] sm:$0xf]  ;;  %2921 = vmatpush.bf16.msra.mxu2 %v6509_v2  ;;  %v8028_v2 = vld [vmem:[#allocation19 + $0x4c] sm:$0xf0] }
 0x28a   :  { %3752 = vmatpush.bf16.msrb.mxu2 %v6921_v24  ;;  %v8088_v24 = vld [vmem:[#allocation19 + $0x22c] sm:$0xf0] }
 0x28e   :  { %3753 = vmatpush.bf16.msrb.mxu2 %v6905_v34  ;;  %v6680_v34 = vld [vmem:[#allocation19 + $0x100] sm:$0xf] }
 0x28f   :  { %v6681_v51 = vor.u32 %v8052_v35, %v6680_v34 }
 0x2c1   :  { %v2723_v5 = vpop.f32.mrf.mxu0 }
 0x2c2   :  { %v2724_v4 = vadd.f32 %v8326_v40, %v2723_v5  ;;  %v6510_v5 = vld [vmem:[#allocation17 + $0x18] sm:$0xf0]  ;;  %v8036_v40 = vld [vmem:[#allocation19 + $0x8c] sm:$0xf0] }
 0x2c3   :  { %v6617_v33 = vor.u32 %v8036_v40, %v6616_v39  ;;  %v6825_v39 = vor.u32 %v8088_v24, %v6824_v21  ;;  %v8098_v21 = vld [vmem:[#allocation19 + $0x284] sm:$0xf] }
 0x2c4   :  { %v8130_v24 = vld [vmem:[#allocation19 + $0x384] sm:$0xf] }
 0x2c9   :  { %v2725_v6 = vpop.f32.mrf.mxu0 }
 0x2ca   :  { %v6513_v6 = vor.u32 %v8007_v3, %v6510_v5  ;;  %v6712_v3 = vld [vmem:[#allocation19 + $0x140] sm:$0xf]  ;;  %v8060_v5 = vld [vmem:[#allocation19 + $0x14c] sm:$0xf0] }
 0x2cb   :  { %v6713_v13 = vor.u32 %v8060_v5, %v6712_v3  ;;  %v6634_v3 = vld [vmem:[#allocation19 + $0xb0] sm:$0xf0]  ;;  %v8070_v5 = vld [vmem:[#allocation19 + $0x1a4] sm:$0xf] }
 0x2cc   :  { %2934 = vmatpush.bf16.msra.mxu3 %v6513_v6  ;;  %v6857_v6 = vor.u32 %v8096_v19, %v6856_v62  ;;  %v7053_v62 = vor.u32 %v8142_v52, %v7050_v53  ;;  %v6906_v19 = vld [vmem:[#allocation19 + $0x2d0] sm:$0xf0]  ;;  %v8054_v53 = vld [vmem:[#allocation19 + $0x124] sm:$0xf] }
 0x2d0   :  { %3765 = vmatpush.bf16.msrb.mxu3 %v7049_v25  ;;  %v6952_v25 = vld [vmem:[#allocation19 + $0x320] sm:$0xf] }
 0x2d1   :  { %v2736_v7 = vpop.f32.mrf.mxu1  ;;  %v6953_v40 = vor.u32 %v8120_v26, %v6952_v25  ;;  %v7002_v25 = vld [vmem:[#allocation19 + $0x390] sm:$0xf0] }
 0x2d2   :  { %v2737_v41 = vadd.f32 %v2736_v7, %v2724_v4  ;;  %v6664_v7 = vld [vmem:[#allocation19 + $0xe0] sm:$0xf]  ;;  %v6761_v4 = vor.u32 %v8072_v29, %v6760_v28  ;;  %v6697_v28 = vor.u32 %v8056_v46, %v6696_v14  ;;  %v6618_v14 = vld [vmem:[#allocation19 + $0x90] sm:$0xf0]  ;;  %v8066_v46 = vld [vmem:[#allocation19 + $0x184] sm:$0xf]  ;;  %v7005_v35 = vor.u32 %v8130_v24, %v7002_v25 }
 0x2d3   :  { %v6552_v29 = vld [vmem:[#allocation19] sm:$0xf]  ;;  %v8081_v24 = vld [vmem:[#allocation19 + $0x1f4] sm:$0xf0] }
 0x2d4   :  { %3766 = vmatpush.bf16.msrb.mxu3 %v7033_v38  ;;  %v8078_v38 = vld [vmem:[#allocation19 + $0x1e4] sm:$0xf] }
 0x2d9   :  { %v2738_v8 = vpop.f32.mrf.mxu1 }
 0x2da   :  { %v8048_v8 = vld [vmem:[#allocation19 + $0xec] sm:$0xf0] }
 0x2e7   :  { %v2749_v10 = vpop.f32.mrf.mxu2 }
 0x2e8   :  { %v2750_v42 = vadd.f32 %v2749_v10, %v2737_v41  ;;  %v6792_v10 = vld [vmem:[#allocation19 + $0x1e0] sm:$0xf] }
 0x2e9   :  { %v6793_v15 = vor.u32 %v8080_v11, %v6792_v10  ;;  %v6888_v41 = vld [vmem:[#allocation19 + $0x2a0] sm:$0xf]  ;;  %v6585_v10 = vor.u32 %v8028_v2, %v6584_v1  ;;  %v6781_v1 = vor.u32 %v8074_v57, %v6778_v58  ;;  %v8038_v2 = vld [vmem:[#allocation19 + $0xa4] sm:$0xf] }
 0x2ea   :  { %v6968_v11 = vld [vmem:[#allocation19 + $0x340] sm:$0xf]  ;;  %v8122_v57 = vld [vmem:[#allocation19 + $0x344] sm:$0xf] }
 0x2eb   :  { %3739 = vmatpush.bf16.msrb.mxu1 %v6793_v15  ;;  %v6568_v15 = vld [vmem:[#allocation19 + $0x20] sm:$0xf]  ;;  %v6969_v18 = vor.u32 %v8124_v12, %v6968_v11  ;;  %v8134_v11 = vld [vmem:[#allocation19 + $0x3a4] sm:$0xf]  ;;  %v7018_v12 = vld [vmem:[#allocation19 + $0x3b0] sm:$0xf0] }
 0x2ef   :  { %v2751_v47 = vpop.f32.mrf.mxu2  ;;  %3740 = vmatpush.bf16.msrb.mxu1 %v6777_v22  ;;  %v6569_v22 = vor.u32 %v8024_v9, %v6568_v15  ;;  %v8034_v9 = vld [vmem:[#allocation19 + $0x84] sm:$0xf] }
 0x2f0   :  { %v6665_v47 = vor.u32 %v8048_v8, %v6664_v7  ;;  %v6985_v7 = vor.u32 %v8128_v20, %v6984_v56  ;;  %v6840_v8 = vld [vmem:[#allocation19 + $0x240] sm:$0xf]  ;;  %v8138_v56 = vld [vmem:[#allocation19 + $0x3c4] sm:$0xf]  ;;  %v7034_v20 = vld [vmem:[#allocation19 + $0x3d0] sm:$0xf0]  ;;  %v6621_v26 = vor.u32 %v8034_v9, %v6618_v14 }
 0x2f2   :  { %3726 = vmatpush.bf16.msrb.mxu0 %v6665_v47  ;;  %v8092_v47 = vld [vmem:[#allocation19 + $0x24c] sm:$0xf0] }
 0x2f3   :  { %3741 = vmatpush.bf16.msrb.mxu1 %v6761_v4  ;;  %v6841_v17 = vor.u32 %v8092_v47, %v6840_v8  ;;  %v7037_v8 = vor.u32 %v8138_v56, %v7034_v20  ;;  %v6890_v47 = vld [vmem:[#allocation19 + $0x2b0] sm:$0xf0] }
 0x2f4   :  { %v6682_v56 = vld [vmem:[#allocation19 + $0x110] sm:$0xf0] }
 0x2f6   :  { %3727 = vmatpush.bf16.msrb.mxu0 %v6649_v16  ;;  %v2769_v16 = vld [vmem:[#allocation5] sm:$0xff] }
 0x2fa   :  { %3728 = vmatpush.bf16.msrb.mxu0 %v6633_v37  ;;  %v6666_v37 = vld [vmem:[#allocation19 + $0xf0] sm:$0xf0] }
 0x2fb   :  { %v6669_v23 = vor.u32 %v8046_v36, %v6666_v37 }
 0x2fe   :  { %3729 = vmatpush.bf16.msrb.mxu0 %v6617_v33  ;;  %v6922_v33 = vld [vmem:[#allocation19 + $0x2f0] sm:$0xf0] }
 0x302   :  { %3730 = vmatpush.bf16.msrb.mxu0 %v6601_v63  ;;  %v8106_v63 = vld [vmem:[#allocation19 + $0x2c4] sm:$0xf] }
 0x306   :  { %3731 = vmatpush.bf16.msrb.mxu0 %v6585_v10  ;;  %v8102_v10 = vld [vmem:[#allocation19 + $0x2a4] sm:$0xf] }
 0x307   :  { %v2762_v43 = vpop.f32.mrf.mxu3 }
 0x308   :  { %v8981_v44 = vadd.f32 %v2762_v43, %v2750_v42  ;;  %v8104_v42 = vld [vmem:[#allocation19 + $0x2ac] sm:$0xf0]  ;;  %v7016_v43 = vld [vmem:[#allocation19 + $0x3a0] sm:$0xf] }
 0x30a   :  { %v2766_v45 = vmul.f32 0.5, %v8981_v44  ;;  %5249 = vst [vmem:[%s9096_s19] sm:$0xff] %v8981_v44  ;;  %3732 = vmatpush.bf16.msrb.mxu0 %v6569_v22  ;;  %v6874_v22 = vld [vmem:[#allocation19 + $0x290] sm:$0xf0] }
 0x30b   :  { %v6877_v34 = vor.u32 %v8098_v21, %v6874_v22  ;;  %v8049_v21 = vld [vmem:[#allocation19 + $0xf4] sm:$0xf0]  ;;  %v6800_v22 = vld [vmem:[#allocation19 + $0x1e8] sm:$0xf] }
 0x30c   :  { %v2767_v30 = vmul.f32 1.442695, %v2766_v45  ;;  %v6744_v45 = vld [vmem:[#allocation19 + $0x180] sm:$0xf] }
 0x30e   :  { %8328 = vpow2.f32 %v2767_v30  ;;  %v8068_v30 = vld [vmem:[#allocation19 + $0x18c] sm:$0xf0] }
 0x30f   :  { %v2764_v49 = vpop.f32.mrf.mxu3  ;;  %v6745_v54 = vor.u32 %v8068_v30, %v6744_v45  ;;  %v6936_v45 = vld [vmem:[#allocation19 + $0x300] sm:$0xf]  ;;  %v8116_v30 = vld [vmem:[#allocation19 + $0x30c] sm:$0xf0] }
 0x310   :  { %v8136_v49 = vld [vmem:[#allocation19 + $0x3ac] sm:$0xf0] }
 0x311   :  { %v7017_v48 = vor.u32 %v8136_v49, %v7016_v43  ;;  %3742 = vmatpush.bf16.msrb.mxu1 %v6745_v54  ;;  %v8084_v43 = vld [vmem:[#allocation19 + $0x20c] sm:$0xf0]  ;;  %v8110_v49 = vld [vmem:[#allocation19 + $0x2e4] sm:$0xf] }
 0x313   :  { %3767 = vmatpush.bf16.msrb.mxu3 %v7017_v48  ;;  %v6553_v48 = vor.u32 %v8020_v32, %v6552_v29  ;;  %v6602_v29 = vld [vmem:[#allocation19 + $0x70] sm:$0xf0] }
 0x314   :  { %v8329_v50 = vpop.eup %8328  ;;  %v6730_v32 = vld [vmem:[#allocation19 + $0x170] sm:$0xf0] }
 0x315   :  { %2771 = vrot.lane.b32.xlu0 %v8329_v50, %s8726_s23  ;;  %v6889_v50 = vor.u32 %v8104_v42, %v6888_v41  ;;  %3743 = vmatpush.bf16.msrb.mxu1 %v6729_v0  ;;  %v6794_v41 = vld [vmem:[#allocation19 + $0x1f0] sm:$0xf0]  ;;  %v6808_v42 = vld [vmem:[#allocation19 + $0x200] sm:$0xf] }
 0x316   :  { %v6797_v54 = vor.u32 %v8078_v38, %v6794_v41  ;;  %v6809_v59 = vor.u32 %v8084_v43, %v6808_v42  ;;  %3733 = vmatpush.bf16.msrb.mxu0 %v6553_v48  ;;  %v8026_v38 = vld [vmem:[#allocation19 + $0x44] sm:$0xf] }
 0x317   :  { %3754 = vmatpush.bf16.msrb.mxu2 %v6889_v50  ;;  %3768 = vmatpush.bf16.msrb.mxu3 %v7001_v61  ;;  %v6925_v61 = vor.u32 %v8110_v49, %v6922_v33  ;;  %v8094_v43 = vld [vmem:[#allocation19 + $0x264] sm:$0xf]  ;;  %v6570_v33 = vld [vmem:[#allocation19 + $0x30] sm:$0xf0] }
 0x319   :  { %3744 = vmatpush.bf16.msrb.mxu1 %v6713_v13  ;;  %v6637_v13 = vor.u32 %v8038_v2, %v6634_v3  ;;  %v8118_v3 = vld [vmem:[#allocation19 + $0x324] sm:$0xf] }
 0x31b   :  { %3755 = vmatpush.bf16.msrb.mxu2 %v6873_v60  ;;  %3769 = vmatpush.bf16.msrb.mxu3 %v6985_v7  ;;  %v6937_v60 = vor.u32 %v8116_v30, %v6936_v45  ;;  %v6909_v7 = vor.u32 %v8106_v63, %v6906_v19  ;;  %v6858_v45 = vld [vmem:[#allocation19 + $0x270] sm:$0xf0]  ;;  %v8126_v30 = vld [vmem:[#allocation19 + $0x364] sm:$0xf] }
 0x31c   :  { %v6861_v49 = vor.u32 %v8094_v43, %v6858_v45  ;;  %v8050_v63 = vld [vmem:[#allocation19 + $0x104] sm:$0xf]  ;;  %v7056_v43 = vld [vmem:[#allocation19 + $0x3e8] sm:$0xf] }
 0x31d   :  { %3745 = vmatpush.bf16.msrb.mxu1 %v6697_v28  ;;  %v8030_v28 = vld [vmem:[#allocation19 + $0x64] sm:$0xf]  ;;  %v6685_v20 = vor.u32 %v8050_v63, %v6682_v56  ;;  %v8141_v56 = vld [vmem:[#allocation19 + $0x3d4] sm:$0xf0] }
 0x31e   :  { %v6605_v36 = vor.u32 %v8030_v28, %v6602_v29 }
 0x31f   :  { %3756 = vmatpush.bf16.msrb.mxu2 %v6857_v6  ;;  %3770 = vmatpush.bf16.msrb.mxu3 %v6969_v18  ;;  %v6762_v6 = vld [vmem:[#allocation19 + $0x1b0] sm:$0xf0]  ;;  %v7021_v18 = vor.u32 %v8134_v11, %v7018_v12 }
 0x320   :  { %v6765_v15 = vor.u32 %v8070_v5, %v6762_v6  ;;  %v6954_v5 = vld [vmem:[#allocation19 + $0x330] sm:$0xf0] }
 0x321   :  { %3746 = vmatpush.bf16.msrb.mxu1 %v6681_v51  ;;  %v8022_v51 = vld [vmem:[#allocation19 + $0x24] sm:$0xf]  ;;  %v6957_v6 = vor.u32 %v8118_v3, %v6954_v5  ;;  %v6938_v11 = vld [vmem:[#allocation19 + $0x310] sm:$0xf0] }
 0x322   :  { %v6573_v52 = vor.u32 %v8022_v51, %v6570_v33  ;;  %v8145_v51 = vld [vmem:[#allocation19 + $0x3f4] sm:$0xf0]  ;;  %v6640_v33 = vld [vmem:[#allocation19 + $0xa8] sm:$0xf] }
 0x323   :  { %3757 = vmatpush.bf16.msrb.mxu2 %v6841_v17  ;;  %3771 = vmatpush.bf16.msrb.mxu3 %v6953_v40  ;;  %v6893_v17 = vor.u32 %v8102_v10, %v6890_v47  ;;  %v8058_v40 = vld [vmem:[#allocation19 + $0x144] sm:$0xf] }
 0x324   :  { %v8114_v47 = vld [vmem:[#allocation19 + $0x304] sm:$0xf] }
 0x325   :  { %v6941_v12 = vor.u32 %v8114_v47, %v6938_v11  ;;  %v8105_v11 = vld [vmem:[#allocation19 + $0x2b4] sm:$0xf0] }
 0x327   :  { %3758 = vmatpush.bf16.msrb.mxu2 %v6825_v39  ;;  %3772 = vmatpush.bf16.msrb.mxu3 %v6937_v60  ;;  %v6586_v39 = vld [vmem:[#allocation19 + $0x50] sm:$0xf0] }
 0x328   :  { %v6589_v41 = vor.u32 %v8026_v38, %v6586_v39  ;;  %v8077_v38 = vld [vmem:[#allocation19 + $0x1d4] sm:$0xf0] }
 0x32b   :  { %3759 = vmatpush.bf16.msrb.mxu2 %v6809_v59  ;;  %v6970_v59 = vld [vmem:[#allocation19 + $0x350] sm:$0xf0] }
 0x32c   :  { %v6973_v60 = vor.u32 %v8122_v57, %v6970_v59  ;;  %v7057_v57 = vor.u32 %v8145_v51, %v7056_v43  ;;  %v6912_v59 = vld [vmem:[#allocation19 + $0x2c8] sm:$0xf]  ;;  %v8025_v43 = vld [vmem:[#allocation19 + $0x34] sm:$0xf0] }
 0x32d   :  { %v8093_v51 = vld [vmem:[#allocation19 + $0x254] sm:$0xf0] }
 0x387   :  { %v2772_v27 = vpop.permute.xlu0 %2771 }
 0x388   :  { %v2774_v31 = vmul.f32 %v2772_v27, %v2769_v16  ;;  %v6746_v16 = vld [vmem:[#allocation19 + $0x190] sm:$0xf0] }
 0x389   :  { %v6749_v27 = vor.u32 %v8066_v46, %v6746_v16  ;;  %v6672_v16 = vld [vmem:[#allocation19 + $0xe8] sm:$0xf] }
 0x38a   :  { %v2775_v4 = vadd.f32 %v2774_v31, %v8981_v44  ;;  %v6650_v44 = vld [vmem:[#allocation19 + $0xd0] sm:$0xf0]  ;;  %v8062_v31 = vld [vmem:[#allocation19 + $0x164] sm:$0xf]  ;;  %v6673_v29 = vor.u32 %v8049_v21, %v6672_v16  ;;  %v8101_v21 = vld [vmem:[#allocation19 + $0x294] sm:$0xf0] }
 0x38b   :  { %v6653_v0 = vor.u32 %v8042_v55, %v6650_v44  ;;  %v6733_v37 = vor.u32 %v8062_v31, %v6730_v32  ;;  %v8090_v55 = vld [vmem:[#allocation19 + $0x244] sm:$0xf]  ;;  %v6842_v44 = vld [vmem:[#allocation19 + $0x250] sm:$0xf0]  ;;  %v6801_v31 = vor.u32 %v8081_v24, %v6800_v22  ;;  %v6656_v32 = vld [vmem:[#allocation19 + $0xc8] sm:$0xf] }
 0x38c   :  { %v2776_v50 = vpack.c.bf16 %v2775_v4, %v2775_v4  ;;  %v6714_v4 = vld [vmem:[#allocation19 + $0x150] sm:$0xf0]  ;;  %v6845_v58 = vor.u32 %v8090_v55, %v6842_v44  ;;  %v7008_v22 = vld [vmem:[#allocation19 + $0x388] sm:$0xf]  ;;  %v8133_v24 = vld [vmem:[#allocation19 + $0x394] sm:$0xf0] }
 0x38d   :  { %v6717_v42 = vor.u32 %v8058_v40, %v6714_v4 }
 0x38e   :  { %6546 = vmatmul.msk.bf16.vlgmr.msra.gmra.mxu0 %vm2871_vm3, %v2776_v50  ;;  %6547 = vmatmul.msk.bf16.vlgmr.msra.gmra.mxu1 %vm2871_vm3, %v2776_v50 }
 0x38f   :  { %6548 = vmatmul.msk.bf16.vlgmr.msra.gmra.mxu2 %vm2871_vm3, %v2776_v50  ;;  %6549 = vmatmul.msk.bf16.vlgmr.msra.gmra.mxu3 %vm2871_vm3, %v2776_v50  ;;  %v6986_v50 = vld [vmem:[#allocation19 + $0x370] sm:$0xf0] }
 0x390   :  { %3778 = vmatpush.bf16.msra.mxu0 %v6669_v23  ;;  %3791 = vmatpush.bf16.msra.mxu1 %v6797_v54  ;;  %v6989_v48 = vor.u32 %v8126_v30, %v6986_v50  ;;  %v6698_v23 = vld [vmem:[#allocation19 + $0x130] sm:$0xf0] }
 0x391   :  { %3804 = vmatpush.bf16.msra.mxu2 %v6925_v61  ;;  %3817 = vmatpush.bf16.msra.mxu3 %v7053_v62  ;;  %v6701_v54 = vor.u32 %v8054_v53, %v6698_v23  ;;  %v8018_v61 = vld [vmem:[#allocation19 + $0x4] sm:$0xf]  ;;  %v6554_v62 = vld [vmem:[#allocation19 + $0x10] sm:$0xf0]  ;;  %v6768_v53 = vld [vmem:[#allocation19 + $0x1a8] sm:$0xf] }
 0x392   :  { %v6557_v19 = vor.u32 %v8018_v61, %v6554_v62  ;;  %v8073_v23 = vld [vmem:[#allocation19 + $0x1b4] sm:$0xf0] }
 0x393   :  { %v6769_v63 = vor.u32 %v8073_v23, %v6768_v53 }
 0x394   :  { %3779 = vmatpush.bf16.msra.mxu0 %v6653_v0  ;;  %3792 = vmatpush.bf16.msra.mxu1 %v6781_v1  ;;  %v8086_v0 = vld [vmem:[#allocation19 + $0x224] sm:$0xf]  ;;  %v6826_v1 = vld [vmem:[#allocation19 + $0x230] sm:$0xf0] }
 0x395   :  { %3805 = vmatpush.bf16.msra.mxu2 %v6909_v7  ;;  %3818 = vmatpush.bf16.msra.mxu3 %v7037_v8  ;;  %v6829_v2 = vor.u32 %v8086_v0, %v6826_v1  ;;  %v8082_v7 = vld [vmem:[#allocation19 + $0x204] sm:$0xf]  ;;  %v6810_v8 = vld [vmem:[#allocation19 + $0x210] sm:$0xf0]  ;;  %v8037_v0 = vld [vmem:[#allocation19 + $0x94] sm:$0xf0] }
 0x396   :  { %v6813_v10 = vor.u32 %v8082_v7, %v6810_v8  ;;  %v6752_v1 = vld [vmem:[#allocation19 + $0x188] sm:$0xf] }
 0x397   :  { %v6896_v8 = vld [vmem:[#allocation19 + $0x2a8] sm:$0xf] }
 0x398   :  { %3780 = vmatpush.bf16.msra.mxu0 %v6637_v13  ;;  %3793 = vmatpush.bf16.msra.mxu1 %v6765_v15  ;;  %v2791_v13 = vld [vmem:[%s9088_s11] sm:$0xf]  ;;  %v6897_v16 = vor.u32 %v8105_v11, %v6896_v8  ;;  %v8043_v8 = vld [vmem:[#allocation19 + $0xcc] sm:$0xf] }
 0x399   :  { %3806 = vmatpush.bf16.msra.mxu2 %v6893_v17  ;;  %3819 = vmatpush.bf16.msra.mxu3 %v7021_v18  ;;  %v2793_v15 = vperm.slane %v2791_v13, 0  ;;  %v2794_v9 = vperm.slane %v2791_v13, 1  ;;  %v2796_v28 = vperm.slane %v2791_v13, 3 }
 0x39c   :  { %3781 = vmatpush.bf16.msra.mxu0 %v6621_v26  ;;  %3794 = vmatpush.bf16.msra.mxu1 %v6749_v27  ;;  %v2795_v27 = vperm.slane %v2791_v13, 2  ;;  %v8137_v13 = vld [vmem:[#allocation19 + $0x3b4] sm:$0xf0] }
 0x39d   :  { %3807 = vmatpush.bf16.msra.mxu2 %v6877_v34  ;;  %3820 = vmatpush.bf16.msra.mxu3 %v7005_v35  ;;  %v8045_v34 = vld [vmem:[#allocation19 + $0xd4] sm:$0xf0] }
 0x39e   :  { %v6657_v4 = vor.u32 %v8045_v34, %v6656_v32  ;;  %v7009_v34 = vor.u32 %v8133_v24, %v7008_v22 }
 0x3a0   :  { %3782 = vmatpush.bf16.msra.mxu0 %v6605_v36  ;;  %3795 = vmatpush.bf16.msra.mxu1 %v6733_v37  ;;  %v6784_v37 = vld [vmem:[#allocation19 + $0x1c8] sm:$0xf] }
 0x3a1   :  { %3808 = vmatpush.bf16.msra.mxu2 %v6861_v49  ;;  %3821 = vmatpush.bf16.msra.mxu3 %v6989_v48  ;;  %v6785_v48 = vor.u32 %v8077_v38, %v6784_v37  ;;  %v6864_v37 = vld [vmem:[#allocation19 + $0x268] sm:$0xf]  ;;  %v8097_v38 = vld [vmem:[#allocation19 + $0x274] sm:$0xf0] }
 0x3a4   :  { %3783 = vmatpush.bf16.msra.mxu0 %v6589_v41  ;;  %3796 = vmatpush.bf16.msra.mxu1 %v6717_v42  ;;  %v6928_v41 = vld [vmem:[#allocation19 + $0x2e8] sm:$0xf]  ;;  %v8113_v42 = vld [vmem:[#allocation19 + $0x2f4] sm:$0xf0] }
 0x3a5   :  { %3809 = vmatpush.bf16.msra.mxu2 %v6845_v58  ;;  %3822 = vmatpush.bf16.msra.mxu3 %v6973_v60  ;;  %v6929_v44 = vor.u32 %v8113_v42, %v6928_v41  ;;  %v8109_v60 = vld [vmem:[#allocation19 + $0x2d4] sm:$0xf0]  ;;  %v6576_v42 = vld [vmem:[#allocation19 + $0x28] sm:$0xf] }
 0x3a6   :  { %v6577_v53 = vor.u32 %v8025_v43, %v6576_v42  ;;  %v8035_v42 = vld [vmem:[#allocation19 + $0x8c] sm:$0xf]  ;;  %v6626_v43 = vld [vmem:[#allocation19 + $0x98] sm:$0xf0] }
 0x3a8   :  { %3784 = vmatpush.bf16.msra.mxu0 %v6573_v52  ;;  %3797 = vmatpush.bf16.msra.mxu1 %v6701_v54  ;;  %v8041_v52 = vld [vmem:[#allocation19 + $0xb4] sm:$0xf0] }
 0x3a9   :  { %3810 = vmatpush.bf16.msra.mxu2 %v6829_v2  ;;  %3823 = vmatpush.bf16.msra.mxu3 %v6957_v6  ;;  %v6641_v58 = vor.u32 %v8041_v52, %v6640_v33  ;;  %v8069_v2 = vld [vmem:[#allocation19 + $0x194] sm:$0xf0]  ;;  %v6913_v6 = vor.u32 %v8109_v60, %v6912_v59  ;;  %v6976_v33 = vld [vmem:[#allocation19 + $0x348] sm:$0xf]  ;;  %v6674_v59 = vld [vmem:[#allocation19 + $0xf8] sm:$0xf0] }
 0x3aa   :  { %v6753_v47 = vor.u32 %v8069_v2, %v6752_v1  ;;  %v8125_v52 = vld [vmem:[#allocation19 + $0x354] sm:$0xf0]  ;;  %v6960_v1 = vld [vmem:[#allocation19 + $0x328] sm:$0xf] }
 0x3ab   :  { %v8121_v2 = vld [vmem:[#allocation19 + $0x334] sm:$0xf0] }
 0x3ac   :  { %3785 = vmatpush.bf16.msra.mxu0 %v6557_v19  ;;  %3798 = vmatpush.bf16.msra.mxu1 %v6685_v20  ;;  %v7040_v19 = vld [vmem:[#allocation19 + $0x3c8] sm:$0xf] }
 0x3ad   :  { %3811 = vmatpush.bf16.msra.mxu2 %v6813_v10  ;;  %3824 = vmatpush.bf16.msra.mxu3 %v6941_v12  ;;  %v6624_v20 = vld [vmem:[#allocation19 + $0x88] sm:$0xf]  ;;  %v7041_v7 = vor.u32 %v8141_v56, %v7040_v19  ;;  %v8079_v19 = vld [vmem:[#allocation19 + $0x1ec] sm:$0xf]  ;;  %v6802_v56 = vld [vmem:[#allocation19 + $0x1f8] sm:$0xf0] }
 0x3ae   :  { %v6625_v10 = vor.u32 %v8037_v0, %v6624_v20  ;;  %v7024_v12 = vld [vmem:[#allocation19 + $0x3a8] sm:$0xf]  ;;  %v8089_v0 = vld [vmem:[#allocation19 + $0x234] sm:$0xf0] }
 0x3af   :  { %v6832_v20 = vld [vmem:[#allocation19 + $0x228] sm:$0xf] }
 0x3b0   :  { %v6833_v11 = vor.u32 %v8089_v0, %v6832_v20 }
 0x40b   :  { %v2897_v14 = vpop.f32.mrf.mxu0  ;;  %v2910_v46 = vpop.f32.mrf.mxu1 }
 0x40c   :  { %v2898_v17 = vadd.f32 %v2897_v14, %v2793_v15  ;;  %v2911_v18 = vadd.f32 %v2910_v46, %v2794_v9  ;;  %v6608_v15 = vld [vmem:[#allocation19 + $0x68] sm:$0xf]  ;;  %v8033_v9 = vld [vmem:[#allocation19 + $0x74] sm:$0xf0] }
 0x40d   :  { %v6736_v14 = vld [vmem:[#allocation19 + $0x168] sm:$0xf]  ;;  %v8065_v46 = vld [vmem:[#allocation19 + $0x174] sm:$0xf0] }
 0x40e   :  { %v2940_v25 = vmax.f32 %v2898_v17, 0.0  ;;  %v2941_v26 = vmax.f32 %v2911_v18, 0.0  ;;  %v7025_v17 = vor.u32 %v8137_v13, %v7024_v12  ;;  %v6880_v18 = vld [vmem:[#allocation19 + $0x288] sm:$0xf]  ;;  %v6961_v12 = vor.u32 %v8121_v2, %v6960_v1  ;;  %v6786_v13 = vld [vmem:[#allocation19 + $0x1d8] sm:$0xf0] }
 0x40f   :  { %v6881_v32 = vor.u32 %v8101_v21, %v6880_v18  ;;  %v8143_v18 = vld [vmem:[#allocation19 + $0x3ec] sm:$0xf]  ;;  %v7058_v21 = vld [vmem:[#allocation19 + $0x3f8] sm:$0xf0] }
 0x410   :  { %v8996_v35 = vpack.c.bf16 %v2940_v25, %v2940_v25  ;;  %v8998_v36 = vpack.c.bf16 %v2941_v26, %v2941_v26  ;;  %v6609_v25 = vor.u32 %v8033_v9, %v6608_v15  ;;  %v6737_v26 = vor.u32 %v8065_v46, %v6736_v14  ;;  %v6816_v15 = vld [vmem:[#allocation19 + $0x208] sm:$0xf]  ;;  %v8085_v9 = vld [vmem:[#allocation19 + $0x214] sm:$0xf0]  ;;  %v8027_v1 = vld [vmem:[#allocation19 + $0x4c] sm:$0xf] }
 0x411   :  { %v6944_v14 = vld [vmem:[#allocation19 + $0x308] sm:$0xf]  ;;  %v8117_v46 = vld [vmem:[#allocation19 + $0x314] sm:$0xf0]  ;;  %v6594_v2 = vld [vmem:[#allocation19 + $0x58] sm:$0xf0] }
 0x412   :  { %v2923_v39 = vpop.f32.mrf.mxu2  ;;  %v2936_v40 = vpop.f32.mrf.mxu3  ;;  %3734 = vmatmul.bf16.vlgmr.msrb.gmra.mxu0 %v8996_v35  ;;  %3747 = vmatmul.bf16.vlgmr.msrb.gmra.mxu1 %v8998_v36 }
 0x413   :  { %v2924_v45 = vadd.f32 %v2923_v39, %v2795_v27  ;;  %v2937_v30 = vadd.f32 %v2936_v40, %v2796_v28  ;;  %3830 = vmatpush.bf16.msrb.mxu0 %v6673_v29  ;;  %3843 = vmatpush.bf16.msrb.mxu1 %v6801_v31  ;;  %v2899_v49 = vpop.f32.mrf.mxu0  ;;  %v2912_v50 = vpop.f32.mrf.mxu1  ;;  %v6592_v27 = vld [vmem:[#allocation19 + $0x48] sm:$0xf]  ;;  %v8029_v28 = vld [vmem:[#allocation19 + $0x54] sm:$0xf0] }
 0x414   :  { %v6720_v29 = vld [vmem:[#allocation19 + $0x148] sm:$0xf]  ;;  %v8061_v31 = vld [vmem:[#allocation19 + $0x154] sm:$0xf0]  ;;  %v6865_v49 = vor.u32 %v8097_v38, %v6864_v37  ;;  %v8107_v37 = vld [vmem:[#allocation19 + $0x2cc] sm:$0xf] }
 0x415   :  { %v2942_v54 = vmax.f32 %v2924_v45, 0.0  ;;  %v2943_v55 = vmax.f32 %v2937_v30, 0.0  ;;  %v6992_v39 = vld [vmem:[#allocation19 + $0x368] sm:$0xf]  ;;  %v8129_v40 = vld [vmem:[#allocation19 + $0x374] sm:$0xf0]  ;;  %v6721_v41 = vor.u32 %v8061_v31, %v6720_v29 }
 0x416   :  { %v6704_v45 = vld [vmem:[#allocation19 + $0x128] sm:$0xf]  ;;  %v8057_v30 = vld [vmem:[#allocation19 + $0x134] sm:$0xf0]  ;;  %v6993_v50 = vor.u32 %v8129_v40, %v6992_v39  ;;  %v8071_v29 = vld [vmem:[#allocation19 + $0x1ac] sm:$0xf] }
 0x417   :  { %v9002_v61 = vpack.c.bf16 %v2942_v54, %v2942_v54  ;;  %v9004_v62 = vpack.c.bf16 %v2943_v55, %v2943_v55  ;;  %3831 = vmatpush.bf16.msrb.mxu0 %v6657_v4  ;;  %3844 = vmatpush.bf16.msrb.mxu1 %v6785_v48  ;;  %v6593_v4 = vor.u32 %v8029_v28, %v6592_v27  ;;  %v6848_v48 = vld [vmem:[#allocation19 + $0x248] sm:$0xf]  ;;  %v8021_v55 = vld [vmem:[#allocation19 + $0x14] sm:$0xf0]  ;;  %v6642_v28 = vld [vmem:[#allocation19 + $0xb8] sm:$0xf0] }
 0x418   :  { %v6705_v23 = vor.u32 %v8057_v30, %v6704_v45  ;;  %v6560_v54 = vld [vmem:[#allocation19 + $0x8] sm:$0xf]  ;;  %v6849_v60 = vor.u32 %v8093_v51, %v6848_v48  ;;  %v6945_v27 = vor.u32 %v8117_v46, %v6944_v14  ;;  %v6770_v31 = vld [vmem:[#allocation19 + $0x1b8] sm:$0xf0]  ;;  %v8139_v39 = vld [vmem:[#allocation19 + $0x3cc] sm:$0xf] }
 0x419   :  { %3760 = vmatmul.bf16.vlgmr.msrb.gmra.mxu2 %v9002_v61  ;;  %3773 = vmatmul.bf16.vlgmr.msrb.gmra.mxu3 %v9004_v62  ;;  %v6914_v38 = vld [vmem:[#allocation19 + $0x2d8] sm:$0xf0]  ;;  %v8067_v45 = vld [vmem:[#allocation19 + $0x18c] sm:$0xf] }
 0x41a   :  { %3856 = vmatpush.bf16.msrb.mxu2 %v6929_v44  ;;  %3869 = vmatpush.bf16.msrb.mxu3 %v7057_v57  ;;  %v2925_v3 = vpop.f32.mrf.mxu2  ;;  %v2938_v5 = vpop.f32.mrf.mxu3  ;;  %v6688_v44 = vld [vmem:[#allocation19 + $0x108] sm:$0xf]  ;;  %v8053_v57 = vld [vmem:[#allocation19 + $0x114] sm:$0xf0]  ;;  %v7042_v40 = vld [vmem:[#allocation19 + $0x3d8] sm:$0xf0] }
 0x41b   :  { %3832 = vmatpush.bf16.msrb.mxu0 %v6641_v58  ;;  %3845 = vmatpush.bf16.msrb.mxu1 %v6769_v63  ;;  %v8047_v58 = vld [vmem:[#allocation19 + $0xec] sm:$0xf]  ;;  %v6977_v63 = vor.u32 %v8125_v52, %v6976_v33  ;;  %v6561_v3 = vor.u32 %v8021_v55, %v6560_v54  ;;  %v6689_v5 = vor.u32 %v8053_v57, %v6688_v44  ;;  %v6754_v30 = vld [vmem:[#allocation19 + $0x198] sm:$0xf0] }
 0x41c   :  { %v8103_v48 = vld [vmem:[#allocation19 + $0x2ac] sm:$0xf]  ;;  %v6898_v51 = vld [vmem:[#allocation19 + $0x2b8] sm:$0xf0] }
 0x41d   :  { %v8135_v33 = vld [vmem:[#allocation19 + $0x3ac] sm:$0xf]  ;;  %v7026_v52 = vld [vmem:[#allocation19 + $0x3b8] sm:$0xf0] }
 0x41e   :  { %3857 = vmatpush.bf16.msrb.mxu2 %v6913_v6  ;;  %3870 = vmatpush.bf16.msrb.mxu3 %v7041_v7  ;;  %v6677_v6 = vor.u32 %v8047_v58, %v6674_v59  ;;  %v6805_v7 = vor.u32 %v8079_v19, %v6802_v56  ;;  %v8031_v54 = vld [vmem:[#allocation19 + $0x6c] sm:$0xf]  ;;  %v6610_v55 = vld [vmem:[#allocation19 + $0x78] sm:$0xf0]  ;;  %v6901_v58 = vor.u32 %v8103_v48, %v6898_v51  ;;  %v7160_v48 = vld [vmem:[#allocation20 + $0xc0] sm:$0xf] }
 0x41f   :  { %3833 = vmatpush.bf16.msrb.mxu0 %v6625_v10  ;;  %3846 = vmatpush.bf16.msrb.mxu1 %v6753_v47  ;;  %v6658_v10 = vld [vmem:[#allocation19 + $0xd8] sm:$0xf0]  ;;  %v8075_v47 = vld [vmem:[#allocation19 + $0x1cc] sm:$0xf]  ;;  %v7029_v59 = vor.u32 %v8135_v33, %v7026_v52  ;;  %v6613_v20 = vor.u32 %v8031_v54, %v6610_v55  ;;  %v8204_v54 = vld [vmem:[#allocation20 + $0x1cc] sm:$0xf0] }
 0x420   :  { %v6661_v22 = vor.u32 %v8043_v8, %v6658_v10  ;;  %v6789_v24 = vor.u32 %v8075_v47, %v6786_v13  ;;  %v8063_v44 = vld [vmem:[#allocation19 + $0x16c] sm:$0xf]  ;;  %v6738_v57 = vld [vmem:[#allocation19 + $0x178] sm:$0xf0] }
 0x421   :  { %v8131_v19 = vld [vmem:[#allocation19 + $0x38c] sm:$0xf]  ;;  %v7010_v56 = vld [vmem:[#allocation19 + $0x398] sm:$0xf0]  ;;  %v6741_v0 = vor.u32 %v8063_v44, %v6738_v57 }
 0x422   :  { %3858 = vmatpush.bf16.msrb.mxu2 %v6897_v16  ;;  %3871 = vmatpush.bf16.msrb.mxu3 %v7025_v17  ;;  %v8111_v16 = vld [vmem:[#allocation19 + $0x2ec] sm:$0xf]  ;;  %v6930_v17 = vld [vmem:[#allocation19 + $0x2f8] sm:$0xf0] }
 0x423   :  { %3786 = vmatmul.bf16.vlgmr.msra.gmra.mxu0 %v8996_v35  ;;  %3799 = vmatmul.bf16.vlgmr.msra.gmra.mxu1 %v8998_v36  ;;  %v8095_v8 = vld [vmem:[#allocation19 + $0x26c] sm:$0xf]  ;;  %v6866_v10 = vld [vmem:[#allocation19 + $0x278] sm:$0xf0] }
 0x424   :  { %3834 = vmatpush.bf16.msrb.mxu0 %v6609_v25  ;;  %3847 = vmatpush.bf16.msrb.mxu1 %v6737_v26  ;;  %v8039_v25 = vld [vmem:[#allocation19 + $0xac] sm:$0xf]  ;;  %v6817_v26 = vor.u32 %v8085_v9, %v6816_v15  ;;  %v6578_v9 = vld [vmem:[#allocation19 + $0x38] sm:$0xf0] }
 0x425   :  { %v8127_v47 = vld [vmem:[#allocation19 + $0x36c] sm:$0xf]  ;;  %v6706_v46 = vld [vmem:[#allocation19 + $0x138] sm:$0xf0] }
 0x426   :  { %3859 = vmatpush.bf16.msrb.mxu2 %v6881_v32  ;;  %3872 = vmatpush.bf16.msrb.mxu3 %v7009_v34  ;;  %v6933_v32 = vor.u32 %v8111_v16, %v6930_v17  ;;  %v7061_v34 = vor.u32 %v8143_v18, %v7058_v21  ;;  %v8023_v15 = vld [vmem:[#allocation19 + $0x2c] sm:$0xf]  ;;  %v6869_v16 = vor.u32 %v8095_v8, %v6866_v10  ;;  %v6850_v21 = vld [vmem:[#allocation19 + $0x258] sm:$0xf0]  ;;  %v7128_v8 = vld [vmem:[#allocation20 + $0x80] sm:$0xf] }
 0x427   :  { %v8055_v14 = vld [vmem:[#allocation19 + $0x12c] sm:$0xf]  ;;  %v6818_v55 = vld [vmem:[#allocation19 + $0x218] sm:$0xf0] }
 0x428   :  { %3835 = vmatpush.bf16.msrb.mxu0 %v6593_v4  ;;  %3848 = vmatpush.bf16.msrb.mxu1 %v6721_v41  ;;  %v6645_v4 = vor.u32 %v8039_v25, %v6642_v28  ;;  %v6773_v41 = vor.u32 %v8071_v29, %v6770_v31  ;;  %v8091_v18 = vld [vmem:[#allocation19 + $0x24c] sm:$0xf]  ;;  %v6581_v25 = vor.u32 %v8023_v15, %v6578_v9  ;;  %v6562_v28 = vld [vmem:[#allocation19 + $0x18] sm:$0xf0]  ;;  %v8160_v9 = vld [vmem:[#allocation20 + $0x6c] sm:$0xf0] }
 0x429   :  { %3812 = vmatmul.bf16.vlgmr.msra.gmra.mxu2 %v9002_v61  ;;  %3825 = vmatmul.bf16.vlgmr.msra.gmra.mxu3 %v9004_v62  ;;  %v8051_v29 = vld [vmem:[#allocation19 + $0x10c] sm:$0xf]  ;;  %v6690_v31 = vld [vmem:[#allocation19 + $0x118] sm:$0xf0] }
 0x42a   :  { %3860 = vmatpush.bf16.msrb.mxu2 %v6865_v49  ;;  %3873 = vmatpush.bf16.msrb.mxu3 %v6993_v50  ;;  %v6917_v49 = vor.u32 %v8107_v37, %v6914_v38  ;;  %v7045_v50 = vor.u32 %v8139_v39, %v7042_v40  ;;  %v6853_v37 = vor.u32 %v8091_v18, %v6850_v21  ;;  %v8176_v39 = vld [vmem:[#allocation20 + $0xec] sm:$0xf0]  ;;  %v7304_v40 = vld [vmem:[#allocation20 + $0x1e0] sm:$0xf]  ;;  %v8115_v44 = vld [vmem:[#allocation19 + $0x30c] sm:$0xf] }
 0x42b   :  { %v6946_v57 = vld [vmem:[#allocation19 + $0x318] sm:$0xf0]  ;;  %v8156_v21 = vld [vmem:[#allocation20 + $0x4c] sm:$0xf0] }
 0x42c   :  { %3836 = vmatpush.bf16.msrb.mxu0 %v6577_v53  ;;  %3849 = vmatpush.bf16.msrb.mxu1 %v6705_v23  ;;  %v6629_v53 = vor.u32 %v8035_v42, %v6626_v43  ;;  %v6757_v23 = vor.u32 %v8067_v45, %v6754_v30  ;;  %v8119_v42 = vld [vmem:[#allocation19 + $0x32c] sm:$0xf]  ;;  %v6962_v43 = vld [vmem:[#allocation19 + $0x338] sm:$0xf0]  ;;  %v6693_v30 = vor.u32 %v8051_v29, %v6690_v31  ;;  %v8148_v29 = vld [vmem:[#allocation20 + $0xc] sm:$0xf0] }
 0x42d   :  { %v6965_v52 = vor.u32 %v8119_v42, %v6962_v43  ;;  %v8174_v31 = vld [vmem:[#allocation20 + $0xe4] sm:$0xf]  ;;  %v7208_v43 = vld [vmem:[#allocation20 + $0x120] sm:$0xf] }
 0x42e   :  { %3861 = vmatpush.bf16.msrb.mxu2 %v6849_v60  ;;  %3874 = vmatpush.bf16.msrb.mxu3 %v6977_v63  ;;  %v8099_v60 = vld [vmem:[#allocation19 + $0x28c] sm:$0xf]  ;;  %v6882_v63 = vld [vmem:[#allocation19 + $0x298] sm:$0xf0] }
 0x430   :  { %3837 = vmatpush.bf16.msrb.mxu0 %v6561_v3  ;;  %3850 = vmatpush.bf16.msrb.mxu1 %v6689_v5  ;;  %v8059_v3 = vld [vmem:[#allocation19 + $0x14c] sm:$0xf]  ;;  %v6722_v5 = vld [vmem:[#allocation19 + $0x158] sm:$0xf0] }
 0x431   :  { %v6725_v13 = vor.u32 %v8059_v3, %v6722_v5  ;;  %v7416_v5 = vld [vmem:[#allocation20 + $0x2c0] sm:$0xf] }
 0x432   :  { %3862 = vmatpush.bf16.msrb.mxu2 %v6833_v11  ;;  %3875 = vmatpush.bf16.msrb.mxu3 %v6961_v12  ;;  %v6994_v11 = vld [vmem:[#allocation19 + $0x378] sm:$0xf0]  ;;  %v6597_v12 = vor.u32 %v8027_v1, %v6594_v2  ;;  %v7272_v1 = vld [vmem:[#allocation20 + $0x1a0] sm:$0xf]  ;;  %v8200_v2 = vld [vmem:[#allocation20 + $0x1ac] sm:$0xf0] }
 0x433   :  { %3838 = vmatmul.bf16.vlgmr.msrb.gmra.mxu0 %v8996_v35  ;;  %3851 = vmatmul.bf16.vlgmr.msrb.gmra.mxu1 %v8998_v36  ;;  %v6997_v17 = vor.u32 %v8127_v47, %v6994_v11  ;;  %v7273_v10 = vor.u32 %v8200_v2, %v7272_v1  ;;  %v8164_v47 = vld [vmem:[#allocation20 + $0x8c] sm:$0xf0]  ;;  %v7256_v11 = vld [vmem:[#allocation20 + $0x180] sm:$0xf]  ;;  %v8154_v2 = vld [vmem:[#allocation20 + $0x44] sm:$0xf] }
 0x434   :  { %3882 = vmatpush.bf16.msra.mxu0 %v6677_v6  ;;  %3895 = vmatpush.bf16.msra.mxu1 %v6805_v7  ;;  %v6885_v6 = vor.u32 %v8099_v60, %v6882_v63  ;;  %v7013_v7 = vor.u32 %v8131_v19, %v7010_v56  ;;  %v6949_v56 = vor.u32 %v8115_v44, %v6946_v57  ;;  %v8228_v44 = vld [vmem:[#allocation20 + $0x28c] sm:$0xf0] }
 0x436   :  { %3863 = vmatpush.bf16.msrb.mxu2 %v6817_v26  ;;  %3876 = vmatpush.bf16.msrb.mxu3 %v6945_v27  ;;  %v6709_v26 = vor.u32 %v8055_v14, %v6706_v46  ;;  %v8019_v27 = vld [vmem:[#allocation19 + $0xc] sm:$0xf]  ;;  %v7240_v14 = vld [vmem:[#allocation20 + $0x160] sm:$0xf]  ;;  %v8192_v46 = vld [vmem:[#allocation20 + $0x16c] sm:$0xf0] }
 0x437   :  { %v6565_v45 = vor.u32 %v8019_v27, %v6562_v28  ;;  %v7241_v18 = vor.u32 %v8192_v46, %v7240_v14  ;;  %v7064_v28 = vld [vmem:[#allocation20] sm:$0xf]  ;;  %v8216_v46 = vld [vmem:[#allocation20 + $0x22c] sm:$0xf0] }
 0x438   :  { %3883 = vmatpush.bf16.msra.mxu0 %v6661_v22  ;;  %3896 = vmatpush.bf16.msra.mxu1 %v6789_v24  ;;  %v8123_v22 = vld [vmem:[#allocation19 + $0x34c] sm:$0xf]  ;;  %v6978_v24 = vld [vmem:[#allocation19 + $0x358] sm:$0xf0]  ;;  %v7336_v14 = vld [vmem:[#allocation20 + $0x220] sm:$0xf] }
 0x439   :  { %3864 = vmatmul.bf16.vlgmr.msrb.gmra.mxu2 %v9002_v61  ;;  %3877 = vmatmul.bf16.vlgmr.msrb.gmra.mxu3 %v9004_v62  ;;  %v6981_v38 = vor.u32 %v8123_v22, %v6978_v24  ;;  %v7224_v22 = vld [vmem:[#allocation20 + $0x140] sm:$0xf]  ;;  %v8188_v24 = vld [vmem:[#allocation20 + $0x14c] sm:$0xf0] }
 0x43a   :  { %3908 = vmatpush.bf16.msra.mxu2 %v6933_v32  ;;  %3921 = vmatpush.bf16.msra.mxu3 %v7061_v34  ;;  %v8087_v32 = vld [vmem:[#allocation19 + $0x22c] sm:$0xf]  ;;  %v7176_v34 = vld [vmem:[#allocation20 + $0xe0] sm:$0xf] }
 0x43c   :  { %3884 = vmatpush.bf16.msra.mxu0 %v6645_v4  ;;  %3897 = vmatpush.bf16.msra.mxu1 %v6773_v41  ;;  %v8208_v4 = vld [vmem:[#allocation20 + $0x1ec] sm:$0xf0]  ;;  %v6834_v41 = vld [vmem:[#allocation19 + $0x238] sm:$0xf0] }
 0x43d   :  { %v7305_v51 = vor.u32 %v8208_v4, %v7304_v40  ;;  %v6837_v33 = vor.u32 %v8087_v32, %v6834_v41  ;;  %v7178_v32 = vld [vmem:[#allocation20 + $0xf0] sm:$0xf0]  ;;  %v8166_v4 = vld [vmem:[#allocation20 + $0xa4] sm:$0xf] }
 0x43e   :  { %3909 = vmatpush.bf16.msra.mxu2 %v6917_v49  ;;  %3922 = vmatpush.bf16.msra.mxu3 %v7045_v50  ;;  %v8083_v49 = vld [vmem:[#allocation19 + $0x20c] sm:$0xf]  ;;  %v7177_v50 = vor.u32 %v8176_v39, %v7176_v34  ;;  %v7065_v34 = vor.u32 %v8148_v29, %v7064_v28  ;;  %v7162_v39 = vld [vmem:[#allocation20 + $0xd0] sm:$0xf0]  ;;  %v8272_v28 = vld [vmem:[#allocation20 + $0x3ec] sm:$0xf0] }
 0x43f   :  { %v6821_v19 = vor.u32 %v8083_v49, %v6818_v55  ;;  %v7146_v41 = vld [vmem:[#allocation20 + $0xb0] sm:$0xf0]  ;;  %v8190_v29 = vld [vmem:[#allocation20 + $0x164] sm:$0xf] }
 0x440   :  { %3885 = vmatpush.bf16.msra.mxu0 %v6629_v53  ;;  %3898 = vmatpush.bf16.msra.mxu1 %v6757_v23  ;;  %v8172_v53 = vld [vmem:[#allocation20 + $0xcc] sm:$0xf0]  ;;  %v7288_v23 = vld [vmem:[#allocation20 + $0x1c0] sm:$0xf]  ;;  %v7149_v42 = vor.u32 %v8166_v4, %v7146_v41 }
 0x441   :  { %v7161_v60 = vor.u32 %v8172_v53, %v7160_v48  ;;  %v7289_v63 = vor.u32 %v8204_v54, %v7288_v23  ;;  %v8162_v48 = vld [vmem:[#allocation20 + $0x84] sm:$0xf]  ;;  %v8180_v53 = vld [vmem:[#allocation20 + $0x10c] sm:$0xf0]  ;;  %v7384_v23 = vld [vmem:[#allocation20 + $0x280] sm:$0xf] }
 0x442   :  { %3910 = vmatpush.bf16.msra.mxu2 %v6901_v58  ;;  %3923 = vmatpush.bf16.msra.mxu3 %v7029_v59  ;;  %v7432_v58 = vld [vmem:[#allocation20 + $0x2e0] sm:$0xf]  ;;  %v8240_v59 = vld [vmem:[#allocation20 + $0x2ec] sm:$0xf0]  ;;  %v7385_v57 = vor.u32 %v8228_v44, %v7384_v23  ;;  %v8230_v23 = vld [vmem:[#allocation20 + $0x2a4] sm:$0xf] }
 0x443   :  { %v7433_v3 = vor.u32 %v8240_v59, %v7432_v58  ;;  %v8158_v58 = vld [vmem:[#allocation20 + $0x64] sm:$0xf]  ;;  %v7114_v59 = vld [vmem:[#allocation20 + $0x70] sm:$0xf0]  ;;  %v8268_v4 = vld [vmem:[#allocation20 + $0x3cc] sm:$0xf0] }
 0x444   :  { %3886 = vmatpush.bf16.msra.mxu0 %v6613_v20  ;;  %3899 = vmatpush.bf16.msra.mxu1 %v6741_v0  ;;  %v7144_v20 = vld [vmem:[#allocation20 + $0xa0] sm:$0xf]  ;;  %v8168_v0 = vld [vmem:[#allocation20 + $0xac] sm:$0xf0] }
 0x446   :  { %3911 = vmatpush.bf16.msra.mxu2 %v6885_v6  ;;  %3924 = vmatpush.bf16.msra.mxu3 %v7013_v7  ;;  %v8236_v6 = vld [vmem:[#allocation20 + $0x2cc] sm:$0xf0]  ;;  %v7145_v7 = vor.u32 %v8168_v0, %v7144_v20  ;;  %v7117_v20 = vor.u32 %v8158_v58, %v7114_v59  ;;  %v9023_v58 = vld [vmem:[%s9090_s13] sm:$0xf] }
 0x448   :  { %3887 = vmatpush.bf16.msra.mxu0 %v6597_v12  ;;  %3900 = vmatpush.bf16.msra.mxu1 %v6725_v13  ;;  %v8196_v12 = vld [vmem:[#allocation20 + $0x18c] sm:$0xf0]  ;;  %v7112_v13 = vld [vmem:[#allocation20 + $0x60] sm:$0xf] }
 0x449   :  { %v7257_v15 = vor.u32 %v8196_v12, %v7256_v11  ;;  %v8150_v12 = vld [vmem:[#allocation20 + $0x24] sm:$0xf] }
 0x44a   :  { %3912 = vmatpush.bf16.msra.mxu2 %v6869_v16  ;;  %3925 = vmatpush.bf16.msra.mxu3 %v6997_v17  ;;  %v7113_v16 = vor.u32 %v8160_v9, %v7112_v13  ;;  %v7096_v17 = vld [vmem:[#allocation20 + $0x40] sm:$0xf]  ;;  %v7274_v13 = vld [vmem:[#allocation20 + $0x1b0] sm:$0xf0] }
 0x44c   :  { %3888 = vmatpush.bf16.msra.mxu0 %v6581_v25  ;;  %3901 = vmatpush.bf16.msra.mxu1 %v6709_v26  ;;  %v7080_v25 = vld [vmem:[#allocation20 + $0x20] sm:$0xf]  ;;  %v8152_v26 = vld [vmem:[#allocation20 + $0x2c] sm:$0xf0] }
 0x44d   :  { %v7081_v27 = vor.u32 %v8152_v26, %v7080_v25  ;;  %v8212_v25 = vld [vmem:[#allocation20 + $0x20c] sm:$0xf0]  ;;  %v7560_v26 = vld [vmem:[#allocation20 + $0x3e0] sm:$0xf] }
 0x44e   :  { %3913 = vmatpush.bf16.msra.mxu2 %v6853_v37  ;;  %3926 = vmatpush.bf16.msra.mxu3 %v6981_v38  ;;  %v7181_v37 = vor.u32 %v8174_v31, %v7178_v32  ;;  %v8170_v38 = vld [vmem:[#allocation20 + $0xc4] sm:$0xf]  ;;  %v7242_v31 = vld [vmem:[#allocation20 + $0x170] sm:$0xf0]  ;;  %v7561_v32 = vor.u32 %v8272_v28, %v7560_v26  ;;  %v7184_v28 = vld [vmem:[#allocation20 + $0xe8] sm:$0xf] }
 0x44f   :  { %v7165_v40 = vor.u32 %v8170_v38, %v7162_v39  ;;  %v7434_v38 = vld [vmem:[#allocation20 + $0x2f0] sm:$0xf0] }
 0x450   :  { %3889 = vmatpush.bf16.msra.mxu0 %v6565_v45  ;;  %3902 = vmatpush.bf16.msra.mxu1 %v6693_v30  ;;  %v8184_v45 = vld [vmem:[#allocation20 + $0x12c] sm:$0xf0]  ;;  %v7400_v30 = vld [vmem:[#allocation20 + $0x2a0] sm:$0xf]  ;;  %v7338_v26 = vld [vmem:[#allocation20 + $0x230] sm:$0xf0] }
 0x451   :  { %v7209_v49 = vor.u32 %v8184_v45, %v7208_v43  ;;  %v7226_v43 = vld [vmem:[#allocation20 + $0x150] sm:$0xf0]  ;;  %v8234_v45 = vld [vmem:[#allocation20 + $0x2c4] sm:$0xf] }
 0x452   :  { %3914 = vmatpush.bf16.msra.mxu2 %v6837_v33  ;;  %3927 = vmatpush.bf16.msra.mxu3 %v6965_v52  ;;  %v7192_v52 = vld [vmem:[#allocation20 + $0x100] sm:$0xf] }
 0x453   :  { %3890 = vmatmul.bf16.vlgmr.msra.gmra.mxu0 %v8996_v35  ;;  %3903 = vmatmul.bf16.vlgmr.msra.gmra.mxu1 %v8998_v36  ;;  %v7417_v35 = vor.u32 %v8236_v6, %v7416_v5  ;;  %v7129_v36 = vor.u32 %v8164_v47, %v7128_v8  ;;  %v7193_v55 = vor.u32 %v8180_v53, %v7192_v52  ;;  %v8202_v5 = vld [vmem:[#allocation20 + $0x1c4] sm:$0xf]  ;;  %v7290_v6 = vld [vmem:[#allocation20 + $0x1d0] sm:$0xf0]  ;;  %v8220_v47 = vld [vmem:[#allocation20 + $0x24c] sm:$0xf0] }
 0x454   :  { %4720 = vmatpush.bf16.msrb.mxu0 %v7177_v50  ;;  %4733 = vmatpush.bf16.msrb.mxu1 %v7305_v51  ;;  %v8232_v50 = vld [vmem:[#allocation20 + $0x2ac] sm:$0xf0]  ;;  %v7130_v51 = vld [vmem:[#allocation20 + $0x90] sm:$0xf0]  ;;  %v7293_v8 = vor.u32 %v8202_v5, %v7290_v6  ;;  %v8182_v52 = vld [vmem:[#allocation20 + $0x124] sm:$0xf] }
 0x455   :  { %v7401_v33 = vor.u32 %v8232_v50, %v7400_v30  ;;  %v7133_v54 = vor.u32 %v8162_v48, %v7130_v51  ;;  %v7528_v48 = vld [vmem:[#allocation20 + $0x3a0] sm:$0xf]  ;;  %v8264_v51 = vld [vmem:[#allocation20 + $0x3ac] sm:$0xf0]  ;;  %v7210_v53 = vld [vmem:[#allocation20 + $0x130] sm:$0xf0] }
 0x456   :  { %3915 = vmatpush.bf16.msra.mxu2 %v6821_v19  ;;  %3928 = vmatpush.bf16.msra.mxu3 %v6949_v56  ;;  %v7368_v19 = vld [vmem:[#allocation20 + $0x260] sm:$0xf]  ;;  %v8224_v56 = vld [vmem:[#allocation20 + $0x26c] sm:$0xf0]  ;;  %v7213_v44 = vor.u32 %v8182_v52, %v7210_v53 }
 0x457   :  { %v7369_v1 = vor.u32 %v8224_v56, %v7368_v19  ;;  %v8178_v56 = vld [vmem:[#allocation20 + $0x104] sm:$0xf]  ;;  %v7496_v6 = vld [vmem:[#allocation20 + $0x360] sm:$0xf] }
 0x458   :  { %4721 = vmatpush.bf16.msrb.mxu0 %v7161_v60  ;;  %4734 = vmatpush.bf16.msrb.mxu1 %v7289_v63  ;;  %v8206_v60 = vld [vmem:[#allocation20 + $0x1e4] sm:$0xf]  ;;  %v7306_v63 = vld [vmem:[#allocation20 + $0x1f0] sm:$0xf0] }
 0x459   :  { %3916 = vmatmul.bf16.vlgmr.msra.gmra.mxu2 %v9002_v61  ;;  %3929 = vmatmul.bf16.vlgmr.msra.gmra.mxu3 %v9004_v62  ;;  %v7097_v61 = vor.u32 %v8156_v21, %v7096_v17  ;;  %v7225_v62 = vor.u32 %v8188_v24, %v7224_v22  ;;  %v7309_v0 = vor.u32 %v8206_v60, %v7306_v63  ;;  %v8146_v17 = vld [vmem:[#allocation20 + $0x4] sm:$0xf]  ;;  %v7258_v22 = vld [vmem:[#allocation20 + $0x190] sm:$0xf0]  ;;  %v7512_v60 = vld [vmem:[#allocation20 + $0x380] sm:$0xf] }
 0x45a   :  { %4746 = vmatpush.bf16.msrb.mxu2 %v7433_v3  ;;  %v7098_v3 = vld [vmem:[#allocation20 + $0x50] sm:$0xf0]  ;;  %v8194_v21 = vld [vmem:[#allocation20 + $0x184] sm:$0xf]  ;;  %4759 = vmatpush.bf16.msrb.mxu3 %v7561_v32  ;;  %v8260_v63 = vld [vmem:[#allocation20 + $0x38c] sm:$0xf0] }
 0x45b   :  { %v7513_v19 = vor.u32 %v8260_v63, %v7512_v60 }
 0x45c   :  { %4722 = vmatpush.bf16.msrb.mxu0 %v7145_v7  ;;  %4735 = vmatpush.bf16.msrb.mxu1 %v7273_v10  ;;  %v7101_v7 = vor.u32 %v8154_v2, %v7098_v3  ;;  %v7352_v10 = vld [vmem:[#allocation20 + $0x240] sm:$0xf]  ;;  %v7386_v3 = vld [vmem:[#allocation20 + $0x290] sm:$0xf0] }
 0x45d   :  { %v7353_v11 = vor.u32 %v8220_v47, %v7352_v10  ;;  %v8222_v10 = vld [vmem:[#allocation20 + $0x264] sm:$0xf]  ;;  %v7370_v47 = vld [vmem:[#allocation20 + $0x270] sm:$0xf0] }
 0x45e   :  { %4747 = vmatpush.bf16.msrb.mxu2 %v7417_v35  ;;  %v7082_v35 = vld [vmem:[#allocation20 + $0x30] sm:$0xf0] }
 0x460   :  { %4723 = vmatpush.bf16.msrb.mxu0 %v7129_v36  ;;  %4736 = vmatpush.bf16.msrb.mxu1 %v7257_v15  ;;  %v8198_v36 = vld [vmem:[#allocation20 + $0x1a4] sm:$0xf]  ;;  %v7085_v15 = vor.u32 %v8150_v12, %v7082_v35 }
 0x461   :  { %v7277_v9 = vor.u32 %v8198_v36, %v7274_v13  ;;  %v7373_v36 = vor.u32 %v8222_v10, %v7370_v47  ;;  %v7480_v13 = vld [vmem:[#allocation20 + $0x340] sm:$0xf]  ;;  %v7120_v47 = vld [vmem:[#allocation20 + $0x68] sm:$0xf] }
 0x462   :  { %4748 = vmatpush.bf16.msrb.mxu2 %v7401_v33  ;;  %v7529_v33 = vor.u32 %v8264_v51, %v7528_v48  ;;  %v7562_v51 = vld [vmem:[#allocation20 + $0x3f0] sm:$0xf0] }
 0x464   :  { %4724 = vmatpush.bf16.msrb.mxu0 %v7113_v16  ;;  %4737 = vmatpush.bf16.msrb.mxu1 %v7241_v18  ;;  %v7337_v16 = vor.u32 %v8216_v46, %v7336_v14  ;;  %v7066_v18 = vld [vmem:[#allocation20 + $0x10] sm:$0xf0]  ;;  %v8218_v14 = vld [vmem:[#allocation20 + $0x244] sm:$0xf] }
 0x465   :  { %v7069_v24 = vor.u32 %v8146_v17, %v7066_v18  ;;  %v7354_v46 = vld [vmem:[#allocation20 + $0x250] sm:$0xf0] }
 0x466   :  { %4749 = vmatpush.bf16.msrb.mxu2 %v7385_v57  ;;  %v7402_v57 = vld [vmem:[#allocation20 + $0x2b0] sm:$0xf0]  ;;  %v7357_v17 = vor.u32 %v8218_v14, %v7354_v46 }
 0x467   :  { %v7405_v59 = vor.u32 %v8230_v23, %v7402_v57  ;;  %v8266_v57 = vld [vmem:[#allocation20 + $0x3c4] sm:$0xf] }
 0x468   :  { %4725 = vmatpush.bf16.msrb.mxu0 %v7097_v61  ;;  %4738 = vmatpush.bf16.msrb.mxu1 %v7225_v62  ;;  %v7261_v61 = vor.u32 %v8194_v21, %v7258_v22  ;;  %v7320_v62 = vld [vmem:[#allocation20 + $0x200] sm:$0xf] }
 0x46a   :  { %4750 = vmatpush.bf16.msrb.mxu2 %v7369_v1  ;;  %v3078_v1 = vperm.slane %v9023_v58, 0 }
 0x46c   :  { %4726 = vmatpush.bf16.msrb.mxu0 %v7081_v27  ;;  %4739 = vmatpush.bf16.msrb.mxu1 %v7209_v49  ;;  %v7321_v27 = vor.u32 %v8212_v25, %v7320_v62  ;;  %v7418_v49 = vld [vmem:[#allocation20 + $0x2d0] sm:$0xf0]  ;;  %v8214_v25 = vld [vmem:[#allocation20 + $0x224] sm:$0xf] }
 0x46d   :  { %v7421_v50 = vor.u32 %v8234_v45, %v7418_v49  ;;  %v8270_v45 = vld [vmem:[#allocation20 + $0x3e4] sm:$0xf]  ;;  %v7168_v49 = vld [vmem:[#allocation20 + $0xc8] sm:$0xf] }
 0x46e   :  { %4751 = vmatpush.bf16.msrb.mxu2 %v7353_v11  ;;  %v7565_v53 = vor.u32 %v8270_v45, %v7562_v51  ;;  %v7072_v51 = vld [vmem:[#allocation20 + $0x8] sm:$0xf] }
 0x470   :  { %4727 = vmatpush.bf16.msrb.mxu0 %v7065_v34  ;;  %4740 = vmatpush.bf16.msrb.mxu1 %v7193_v55  ;;  %v7245_v34 = vor.u32 %v8190_v29, %v7242_v31  ;;  %v8177_v29 = vld [vmem:[#allocation20 + $0xf4] sm:$0xf0]  ;;  %v7341_v31 = vor.u32 %v8214_v25, %v7338_v26  ;;  %v8254_v25 = vld [vmem:[#allocation20 + $0x364] sm:$0xf]  ;;  %v7498_v26 = vld [vmem:[#allocation20 + $0x370] sm:$0xf0] }
 0x472   :  { %4752 = vmatpush.bf16.msrb.mxu2 %v7337_v16 }
 0x474   :  { %4772 = vmatpush.bf16.msra.mxu0 %v7181_v37  ;;  %4785 = vmatpush.bf16.msra.mxu1 %v7309_v0  ;;  %v8238_v37 = vld [vmem:[#allocation20 + $0x2e4] sm:$0xf] }
 0x475   :  { %v7437_v39 = vor.u32 %v8238_v37, %v7434_v38  ;;  %v8226_v0 = vld [vmem:[#allocation20 + $0x284] sm:$0xf]  ;;  %v3079_v38 = vperm.slane %v9023_v58, 1 }
 0x476   :  { %4753 = vmatpush.bf16.msrb.mxu2 %v7321_v27  ;;  %v7389_v5 = vor.u32 %v8226_v0, %v7386_v3  ;;  %v7530_v3 = vld [vmem:[#allocation20 + $0x3b0] sm:$0xf0] }
 0x478   :  { %4773 = vmatpush.bf16.msra.mxu0 %v7165_v40  ;;  %4786 = vmatpush.bf16.msra.mxu1 %v7293_v8  ;;  %v7544_v40 = vld [vmem:[#allocation20 + $0x3c0] sm:$0xf] }
 0x479   :  { %v7545_v41 = vor.u32 %v8268_v4, %v7544_v40  ;;  %v8244_v40 = vld [vmem:[#allocation20 + $0x30c] sm:$0xf0]  ;;  %v7185_v4 = vor.u32 %v8177_v29, %v7184_v28 }
 0x47a   :  { %4798 = vmatpush.bf16.msra.mxu2 %v7437_v39  ;;  %v7448_v39 = vld [vmem:[#allocation20 + $0x300] sm:$0xf] }
 0x47b   :  { %4760 = vmatpush.bf16.msrb.mxu3 %v7545_v41  ;;  %v7449_v41 = vor.u32 %v8244_v40, %v7448_v39  ;;  %v7280_v39 = vld [vmem:[#allocation20 + $0x1a8] sm:$0xf]  ;;  %v8201_v40 = vld [vmem:[#allocation20 + $0x1b4] sm:$0xf0] }
 0x47c   :  { %4774 = vmatpush.bf16.msra.mxu0 %v7149_v42  ;;  %4787 = vmatpush.bf16.msra.mxu1 %v7277_v9  ;;  %v8186_v42 = vld [vmem:[#allocation20 + $0x144] sm:$0xf] }
 0x47d   :  { %v7229_v30 = vor.u32 %v8186_v42, %v7226_v43  ;;  %v8210_v42 = vld [vmem:[#allocation20 + $0x204] sm:$0xf]  ;;  %v7322_v43 = vld [vmem:[#allocation20 + $0x210] sm:$0xf0] }
 0x47e   :  { %4799 = vmatpush.bf16.msra.mxu2 %v7421_v50  ;;  %v8173_v50 = vld [vmem:[#allocation20 + $0xd4] sm:$0xf0]  ;;  %v7325_v48 = vor.u32 %v8210_v42, %v7322_v43 }
 0x47f   :  { %4761 = vmatpush.bf16.msrb.mxu3 %v7529_v33  ;;  %v7169_v23 = vor.u32 %v8173_v50, %v7168_v49 }
 0x480   :  { %4775 = vmatpush.bf16.msra.mxu0 %v7133_v54  ;;  %4788 = vmatpush.bf16.msra.mxu1 %v7261_v61  ;;  %v8248_v61 = vld [vmem:[#allocation20 + $0x32c] sm:$0xf0] }
 0x482   :  { %4800 = vmatpush.bf16.msra.mxu2 %v7405_v59  ;;  %v7546_v59 = vld [vmem:[#allocation20 + $0x3d0] sm:$0xf0] }
 0x483   :  { %4762 = vmatpush.bf16.msrb.mxu3 %v7513_v19  ;;  %v7549_v19 = vor.u32 %v8266_v57, %v7546_v59  ;;  %v7186_v57 = vld [vmem:[#allocation20 + $0xf8] sm:$0xf0] }
 0x484   :  { %4776 = vmatpush.bf16.msra.mxu0 %v7117_v20  ;;  %4789 = vmatpush.bf16.msra.mxu1 %v7245_v34  ;;  %v7194_v20 = vld [vmem:[#allocation20 + $0x110] sm:$0xf0] }
 0x485   :  { %v7197_v2 = vor.u32 %v8178_v56, %v7194_v20  ;;  %v7136_v20 = vld [vmem:[#allocation20 + $0x88] sm:$0xf] }
 0x486   :  { %4801 = vmatpush.bf16.msra.mxu2 %v7389_v5 }
 0x488   :  { %4777 = vmatpush.bf16.msra.mxu0 %v7101_v7  ;;  %4790 = vmatpush.bf16.msra.mxu1 %v7229_v30  ;;  %v8256_v7 = vld [vmem:[#allocation20 + $0x36c] sm:$0xf0] }
 0x489   :  { %v7497_v8 = vor.u32 %v8256_v7, %v7496_v6 }
 0x48a   :  { %4802 = vmatpush.bf16.msra.mxu2 %v7373_v36  ;;  %v8209_v36 = vld [vmem:[#allocation20 + $0x1f4] sm:$0xf0] }
 0x48b   :  { %4763 = vmatpush.bf16.msrb.mxu3 %v7497_v8 }
 0x48c   :  { %4778 = vmatpush.bf16.msra.mxu0 %v7085_v15  ;;  %4791 = vmatpush.bf16.msra.mxu1 %v7213_v44  ;;  %v8252_v15 = vld [vmem:[#allocation20 + $0x34c] sm:$0xf0]  ;;  %v8169_v44 = vld [vmem:[#allocation20 + $0xb4] sm:$0xf0] }
 0x48d   :  { %v7481_v9 = vor.u32 %v8252_v15, %v7480_v13  ;;  %v8258_v13 = vld [vmem:[#allocation20 + $0x384] sm:$0xf]  ;;  %v7514_v15 = vld [vmem:[#allocation20 + $0x390] sm:$0xf0] }
 0x48e   :  { %4803 = vmatpush.bf16.msra.mxu2 %v7357_v17  ;;  %v7517_v46 = vor.u32 %v8258_v13, %v7514_v15  ;;  %v7232_v15 = vld [vmem:[#allocation20 + $0x148] sm:$0xf] }
 0x48f   :  { %v3735_v54 = vpop.f32.mrf.mxu0  ;;  %v3748_v55 = vpop.f32.mrf.mxu1  ;;  %4764 = vmatpush.bf16.msrb.mxu3 %v7481_v9 }
 0x490   :  { %4779 = vmatpush.bf16.msra.mxu0 %v7069_v24  ;;  %4792 = vmatpush.bf16.msra.mxu1 %v7197_v2  ;;  %v3736_v11 = vadd.f32 %v3735_v54, %v3078_v1  ;;  %v7464_v24 = vld [vmem:[#allocation20 + $0x320] sm:$0xf]  ;;  %v7152_v54 = vld [vmem:[#allocation20 + $0xa8] sm:$0xf]  ;;  %v8165_v1 = vld [vmem:[#allocation20 + $0x94] sm:$0xf0] }
 0x491   :  { %v7465_v62 = vor.u32 %v8248_v61, %v7464_v24  ;;  %v7153_v56 = vor.u32 %v8169_v44, %v7152_v54  ;;  %v8262_v2 = vld [vmem:[#allocation20 + $0x3a4] sm:$0xf]  ;;  %v7137_v10 = vor.u32 %v8165_v1, %v7136_v20  ;;  %v7296_v24 = vld [vmem:[#allocation20 + $0x1c8] sm:$0xf]  ;;  %v7466_v54 = vld [vmem:[#allocation20 + $0x330] sm:$0xf0] }
 0x492   :  { %v3749_v16 = vadd.f32 %v3748_v55, %v3736_v11  ;;  %4804 = vmatpush.bf16.msra.mxu2 %v7341_v31  ;;  %v7533_v7 = vor.u32 %v8262_v2, %v7530_v3  ;;  %v8161_v11 = vld [vmem:[#allocation20 + $0x74] sm:$0xf0]  ;;  %v7501_v31 = vor.u32 %v8254_v25, %v7498_v26  ;;  %v8175_v44 = vld [vmem:[#allocation20 + $0xec] sm:$0xf]  ;;  %v7440_v3 = vld [vmem:[#allocation20 + $0x2e8] sm:$0xf] }
 0x493   :  { %4765 = vmatpush.bf16.msrb.mxu3 %v7465_v62  ;;  %v7121_v17 = vor.u32 %v8161_v11, %v7120_v47  ;;  %v8205_v62 = vld [vmem:[#allocation20 + $0x1d4] sm:$0xf0]  ;;  %v7189_v2 = vor.u32 %v8175_v44, %v7186_v57  ;;  %v7170_v47 = vld [vmem:[#allocation20 + $0xd8] sm:$0xf0]  ;;  %v7216_v26 = vld [vmem:[#allocation20 + $0x128] sm:$0xf] }
 0x494   :  { %v8193_v1 = vld [vmem:[#allocation20 + $0x174] sm:$0xf0]  ;;  %v8155_v44 = vld [vmem:[#allocation20 + $0x4c] sm:$0xf]  ;;  %v7106_v57 = vld [vmem:[#allocation20 + $0x58] sm:$0xf0] }
 0x496   :  { %4805 = vmatpush.bf16.msra.mxu2 %v7325_v48  ;;  %v7281_v48 = vor.u32 %v8201_v40, %v7280_v39  ;;  %v7200_v39 = vld [vmem:[#allocation20 + $0x108] sm:$0xf]  ;;  %v8181_v40 = vld [vmem:[#allocation20 + $0x114] sm:$0xf0] }
 0x497   :  { %v3737_v12 = vpop.f32.mrf.mxu0  ;;  %v3750_v35 = vpop.f32.mrf.mxu1  ;;  %4766 = vmatpush.bf16.msrb.mxu3 %v7449_v41  ;;  %v7482_v41 = vld [vmem:[#allocation20 + $0x350] sm:$0xf0] }
 0x498   :  { %v7312_v12 = vld [vmem:[#allocation20 + $0x1e8] sm:$0xf] }
 0x49b   :  { %4811 = vmatpush.bf16.msra.mxu3 %v7565_v53  ;;  %v8197_v53 = vld [vmem:[#allocation20 + $0x194] sm:$0xf0] }
 0x49c   :  { %v3761_v18 = vpop.f32.mrf.mxu2  ;;  %v3774_v21 = vpop.f32.mrf.mxu3 }
 0x49d   :  { %v3762_v22 = vadd.f32 %v3761_v18, %v3749_v16  ;;  %v7313_v18 = vor.u32 %v8209_v36, %v7312_v12 }
 0x49f   :  { %v3775_v27 = vadd.f32 %v3774_v21, %v3762_v22  ;;  %4812 = vmatpush.bf16.msra.mxu3 %v7549_v19  ;;  %v7104_v21 = vld [vmem:[#allocation20 + $0x48] sm:$0xf]  ;;  %v8157_v22 = vld [vmem:[#allocation20 + $0x54] sm:$0xf0] }
 0x4a0   :  { %v3787_v32 = vpop.f32.mrf.mxu0  ;;  %v3800_v34 = vpop.f32.mrf.mxu1 }
 0x4a1   :  { %v3934_v37 = vmax.f32 %v3775_v27, 0.0  ;;  %v3788_v55 = vadd.f32 %v3787_v32, %v3079_v38  ;;  %v3080_v27 = vperm.slane %v9023_v58, 2  ;;  %v7105_v32 = vor.u32 %v8157_v22, %v7104_v21  ;;  %v8153_v38 = vld [vmem:[#allocation20 + $0x34] sm:$0xf0] }
 0x4a3   :  { %v9027_v30 = vpack.c.bf16 %v3934_v37, %v3934_v37  ;;  %v3801_v0 = vadd.f32 %v3800_v34, %v3788_v55  ;;  %4813 = vmatpush.bf16.msra.mxu3 %v7533_v7  ;;  %v7297_v34 = vor.u32 %v8205_v62, %v7296_v24  ;;  %v7088_v37 = vld [vmem:[#allocation20 + $0x28] sm:$0xf] }
 0x4a4   :  { %v3763_v33 = vpop.f32.mrf.mxu2  ;;  %v3776_v52 = vpop.f32.mrf.mxu3  ;;  %v7089_v50 = vor.u32 %v8153_v38, %v7088_v37 }
 0x4a5   :  { %4728 = vmatmul.bf16.vlgmr.msrb.gmra.mxu0 %v9027_v30  ;;  %v8149_v33 = vld [vmem:[#allocation20 + $0x14] sm:$0xf0]  ;;  %v7264_v52 = vld [vmem:[#allocation20 + $0x188] sm:$0xf] }
 0x4a6   :  { %4824 = vmatpush.bf16.msrb.mxu0 %v7185_v4  ;;  %v8250_v4 = vld [vmem:[#allocation20 + $0x344] sm:$0xf]  ;;  %v7265_v20 = vor.u32 %v8197_v53, %v7264_v52 }
 0x4a7   :  { %4814 = vmatpush.bf16.msra.mxu3 %v7517_v46  ;;  %v7485_v49 = vor.u32 %v8250_v4, %v7482_v41  ;;  %v7392_v4 = vld [vmem:[#allocation20 + $0x288] sm:$0xf]  ;;  %v8229_v41 = vld [vmem:[#allocation20 + $0x294] sm:$0xf0] }
 0x4a8   :  { %v3789_v60 = vpop.f32.mrf.mxu0  ;;  %v3802_v63 = vpop.f32.mrf.mxu1  ;;  %v7393_v52 = vor.u32 %v8229_v41, %v7392_v4  ;;  %v7552_v41 = vld [vmem:[#allocation20 + $0x3c8] sm:$0xf] }
 0x4aa   :  { %4825 = vmatpush.bf16.msrb.mxu0 %v7169_v23  ;;  %v8246_v23 = vld [vmem:[#allocation20 + $0x324] sm:$0xf] }
 0x4ab   :  { %4815 = vmatpush.bf16.msra.mxu3 %v7501_v31  ;;  %v7469_v59 = vor.u32 %v8246_v23, %v7466_v54  ;;  %v8163_v31 = vld [vmem:[#allocation20 + $0x8c] sm:$0xf]  ;;  %v7376_v23 = vld [vmem:[#allocation20 + $0x268] sm:$0xf] }
 0x4ac   :  { %v3813_v5 = vpop.f32.mrf.mxu2  ;;  %v3826_v6 = vpop.f32.mrf.mxu3 }
 0x4ad   :  { %v3814_v8 = vadd.f32 %v3813_v5, %v3801_v0  ;;  %v7248_v0 = vld [vmem:[#allocation20 + $0x168] sm:$0xf]  ;;  %v8242_v5 = vld [vmem:[#allocation20 + $0x304] sm:$0xf] }
 0x4ae   :  { %4826 = vmatpush.bf16.msrb.mxu0 %v7153_v56  ;;  %v7073_v56 = vor.u32 %v8149_v33, %v7072_v51  ;;  %v7201_v51 = vor.u32 %v8181_v40, %v7200_v39  ;;  %v3081_v33 = vperm.slane %v9023_v58, 3 }
 0x4af   :  { %v3827_v35 = vadd.f32 %v3826_v6, %v3814_v8  ;;  %4816 = vmatpush.bf16.msra.mxu3 %v7485_v49  ;;  %v7450_v6 = vld [vmem:[#allocation20 + $0x310] sm:$0xf0]  ;;  %v8241_v8 = vld [vmem:[#allocation20 + $0x2f4] sm:$0xf0] }
 0x4b0   :  { %v3839_v9 = vpop.f32.mrf.mxu0  ;;  %v3852_v14 = vpop.f32.mrf.mxu1  ;;  %v7453_v11 = vor.u32 %v8242_v5, %v7450_v6  ;;  %v7441_v36 = vor.u32 %v8241_v8, %v7440_v3  ;;  %v8199_v6 = vld [vmem:[#allocation20 + $0x1ac] sm:$0xf] }
 0x4b1   :  { %v3935_v16 = vmax.f32 %v3827_v35, 0.0  ;;  %v3840_v42 = vadd.f32 %v3839_v9, %v3080_v27  ;;  %v7249_v35 = vor.u32 %v8193_v1, %v7248_v0  ;;  %v8189_v9 = vld [vmem:[#allocation20 + $0x154] sm:$0xf0]  ;;  %v8151_v1 = vld [vmem:[#allocation20 + $0x2c] sm:$0xf] }
 0x4b2   :  { %4827 = vmatpush.bf16.msrb.mxu0 %v7137_v10  ;;  %v8171_v10 = vld [vmem:[#allocation20 + $0xcc] sm:$0xf]  ;;  %v7233_v24 = vor.u32 %v8189_v9, %v7232_v15  ;;  %v8185_v27 = vld [vmem:[#allocation20 + $0x134] sm:$0xf0] }
 0x4b3   :  { %v9030_v61 = vpack.c.bf16 %v3935_v16, %v3935_v16  ;;  %v3853_v55 = vadd.f32 %v3852_v14, %v3840_v42  ;;  %4817 = vmatpush.bf16.msra.mxu3 %v7469_v59  ;;  %v7173_v13 = vor.u32 %v8171_v10, %v7170_v47  ;;  %v7424_v14 = vld [vmem:[#allocation20 + $0x2c8] sm:$0xf]  ;;  %v8237_v16 = vld [vmem:[#allocation20 + $0x2d4] sm:$0xf0]  ;;  %v8159_v42 = vld [vmem:[#allocation20 + $0x6c] sm:$0xf] }
 0x4b4   :  { %v3815_v28 = vpop.f32.mrf.mxu2  ;;  %v3828_v29 = vpop.f32.mrf.mxu3  ;;  %v7425_v62 = vor.u32 %v8237_v16, %v7424_v14  ;;  %v8203_v59 = vld [vmem:[#allocation20 + $0x1cc] sm:$0xf]  ;;  %v8221_v0 = vld [vmem:[#allocation20 + $0x254] sm:$0xf0]  ;;  %v7344_v47 = vld [vmem:[#allocation20 + $0x228] sm:$0xf] }
 0x4b5   :  { %4741 = vmatmul.bf16.vlgmr.msrb.gmra.mxu1 %v9030_v61  ;;  %4780 = vmatmul.bf16.vlgmr.msra.gmra.mxu0 %v9027_v30  ;;  %v7408_v28 = vld [vmem:[#allocation20 + $0x2a8] sm:$0xf]  ;;  %v8233_v29 = vld [vmem:[#allocation20 + $0x2b4] sm:$0xf0]  ;;  %v8195_v14 = vld [vmem:[#allocation20 + $0x18c] sm:$0xf] }
 0x4b6   :  { %4828 = vmatpush.bf16.msrb.mxu0 %v7121_v17  ;;  %4837 = vmatpush.bf16.msrb.mxu1 %v7313_v18  ;;  %v8167_v17 = vld [vmem:[#allocation20 + $0xac] sm:$0xf]  ;;  %v7154_v18 = vld [vmem:[#allocation20 + $0xb8] sm:$0xf0]  ;;  %v7409_v37 = vor.u32 %v8233_v29, %v7408_v28 }
 0x4b7   :  { %4818 = vmatpush.bf16.msra.mxu3 %v7453_v11  ;;  %v7157_v25 = vor.u32 %v8167_v17, %v7154_v18  ;;  %v7266_v16 = vld [vmem:[#allocation20 + $0x198] sm:$0xf0]  ;;  %v8191_v28 = vld [vmem:[#allocation20 + $0x16c] sm:$0xf] }
 0x4b8   :  { %v3841_v43 = vpop.f32.mrf.mxu0  ;;  %v3854_v45 = vpop.f32.mrf.mxu1  ;;  %v7250_v29 = vld [vmem:[#allocation20 + $0x178] sm:$0xf0] }
 0x4b9   :  { %v7122_v43 = vld [vmem:[#allocation20 + $0x78] sm:$0xf0]  ;;  %v7253_v40 = vor.u32 %v8191_v28, %v7250_v29 }
 0x4ba   :  { %4829 = vmatpush.bf16.msrb.mxu0 %v7105_v32  ;;  %4838 = vmatpush.bf16.msrb.mxu1 %v7297_v34  ;;  %v7138_v32 = vld [vmem:[#allocation20 + $0x98] sm:$0xf0]  ;;  %v7217_v34 = vor.u32 %v8185_v27, %v7216_v26  ;;  %v7125_v53 = vor.u32 %v8159_v42, %v7122_v43  ;;  %v7568_v26 = vld [vmem:[#allocation20 + $0x3e8] sm:$0xf]  ;;  %v8273_v27 = vld [vmem:[#allocation20 + $0x3f4] sm:$0xf0] }
 0x4bb   :  { %v7141_v38 = vor.u32 %v8163_v31, %v7138_v32  ;;  %v8239_v31 = vld [vmem:[#allocation20 + $0x2ec] sm:$0xf]  ;;  %v7442_v32 = vld [vmem:[#allocation20 + $0x2f8] sm:$0xf0]  ;;  %v8269_v42 = vld [vmem:[#allocation20 + $0x3d4] sm:$0xf0] }
 0x4bc   :  { %v3865_v60 = vpop.f32.mrf.mxu2  ;;  %v3878_v63 = vpop.f32.mrf.mxu3  ;;  %v7445_v4 = vor.u32 %v8239_v31, %v7442_v32  ;;  %v8187_v43 = vld [vmem:[#allocation20 + $0x14c] sm:$0xf]  ;;  %v7570_v28 = vld [vmem:[#allocation20 + $0x3f8] sm:$0xf0] }
 0x4bd   :  { %v3866_v19 = vadd.f32 %v3865_v60, %v3853_v55  ;;  %v8225_v55 = vld [vmem:[#allocation20 + $0x274] sm:$0xf0]  ;;  %v7298_v60 = vld [vmem:[#allocation20 + $0x1d8] sm:$0xf0]  ;;  %v8267_v32 = vld [vmem:[#allocation20 + $0x3cc] sm:$0xf] }
 0x4be   :  { %4830 = vmatpush.bf16.msrb.mxu0 %v7089_v50  ;;  %4839 = vmatpush.bf16.msrb.mxu1 %v7281_v48  ;;  %v8207_v50 = vld [vmem:[#allocation20 + $0x1ec] sm:$0xf]  ;;  %v7314_v48 = vld [vmem:[#allocation20 + $0x1f8] sm:$0xf0]  ;;  %v7301_v58 = vor.u32 %v8203_v59, %v7298_v60 }
 0x4bf   :  { %v3879_v7 = vadd.f32 %v3878_v63, %v3866_v19  ;;  %v7317_v54 = vor.u32 %v8207_v50, %v7314_v48  ;;  %v7377_v63 = vor.u32 %v8225_v55, %v7376_v23  ;;  %v7109_v19 = vor.u32 %v8155_v44, %v7106_v57  ;;  %v7234_v50 = vld [vmem:[#allocation20 + $0x158] sm:$0xf0]  ;;  %v8235_v48 = vld [vmem:[#allocation20 + $0x2cc] sm:$0xf]  ;;  %v7536_v23 = vld [vmem:[#allocation20 + $0x3a8] sm:$0xf] }
 0x4c0   :  { %v8183_v55 = vld [vmem:[#allocation20 + $0x12c] sm:$0xf]  ;;  %v7218_v44 = vld [vmem:[#allocation20 + $0x138] sm:$0xf0] }
 0x4c1   :  { %v3936_v12 = vmax.f32 %v3879_v7, 0.0  ;;  %v7282_v7 = vld [vmem:[#allocation20 + $0x1b8] sm:$0xf0]  ;;  %v8231_v57 = vld [vmem:[#allocation20 + $0x2ac] sm:$0xf] }
 0x4c2   :  { %4831 = vmatpush.bf16.msrb.mxu0 %v7073_v56  ;;  %4840 = vmatpush.bf16.msrb.mxu1 %v7265_v20  ;;  %v7360_v56 = vld [vmem:[#allocation20 + $0x248] sm:$0xf]  ;;  %v7410_v59 = vld [vmem:[#allocation20 + $0x2b8] sm:$0xf0] }
 0x4c3   :  { %v9035_v46 = vpack.c.bf16 %v3936_v12, %v3936_v12  ;;  %v7361_v8 = vor.u32 %v8221_v0, %v7360_v56  ;;  %v7285_v12 = vor.u32 %v8199_v6, %v7282_v7  ;;  %v8261_v56 = vld [vmem:[#allocation20 + $0x394] sm:$0xf0]  ;;  %v8227_v0 = vld [vmem:[#allocation20 + $0x28c] sm:$0xf]  ;;  %v7504_v6 = vld [vmem:[#allocation20 + $0x368] sm:$0xf] }
 0x4c4   :  { %v3867_v21 = vpop.f32.mrf.mxu2  ;;  %v3880_v22 = vpop.f32.mrf.mxu3  ;;  %v8257_v7 = vld [vmem:[#allocation20 + $0x374] sm:$0xf0] }
 0x4c5   :  { %4793 = vmatmul.bf16.vlgmr.msra.gmra.mxu1 %v9030_v61  ;;  %4832 = vmatmul.bf16.vlgmr.msrb.gmra.mxu0 %v9027_v30  ;;  %v7328_v22 = vld [vmem:[#allocation20 + $0x208] sm:$0xf] }
 0x4c6   :  { %4876 = vmatpush.bf16.msra.mxu0 %v7189_v2  ;;  %4754 = vmatmul.bf16.vlgmr.msrb.gmra.mxu2 %v9035_v46  ;;  %v7090_v2 = vld [vmem:[#allocation20 + $0x38] sm:$0xf0] }
 0x4c7   :  { %4841 = vmatpush.bf16.msrb.mxu1 %v7249_v35  ;;  %4850 = vmatpush.bf16.msrb.mxu2 %v7441_v36  ;;  %v7093_v10 = vor.u32 %v8151_v1, %v7090_v2  ;;  %v8217_v35 = vld [vmem:[#allocation20 + $0x234] sm:$0xf0]  ;;  %v8147_v36 = vld [vmem:[#allocation20 + $0xc] sm:$0xf]  ;;  %v7394_v1 = vld [vmem:[#allocation20 + $0x298] sm:$0xf0] }
 0x4c8   :  { %v7345_v18 = vor.u32 %v8217_v35, %v7344_v47  ;;  %v7505_v47 = vor.u32 %v8257_v7, %v7504_v6  ;;  %v8253_v35 = vld [vmem:[#allocation20 + $0x354] sm:$0xf0]  ;;  %v8275_v6 = vld [vmem:[#allocation23 + $0x8] sm:$0xff] }
 0x4c9   :  { %v8287_v7 = vld [vmem:[#allocation23 + $0x68] sm:$0xff] }
 0x4ca   :  { %4877 = vmatpush.bf16.msra.mxu0 %v7173_v13  ;;  %v7074_v13 = vld [vmem:[#allocation20 + $0x18] sm:$0xf0] }
 0x4cb   :  { %4842 = vmatpush.bf16.msrb.mxu1 %v7233_v24  ;;  %4851 = vmatpush.bf16.msrb.mxu2 %v7425_v62  ;;  %v7077_v21 = vor.u32 %v8147_v36, %v7074_v13  ;;  %v8213_v24 = vld [vmem:[#allocation20 + $0x214] sm:$0xf0]  ;;  %v8219_v36 = vld [vmem:[#allocation20 + $0x24c] sm:$0xf]  ;;  %v7362_v13 = vld [vmem:[#allocation20 + $0x258] sm:$0xf0] }
 0x4ce   :  { %4878 = vmatpush.bf16.msra.mxu0 %v7157_v25  ;;  %v7269_v25 = vor.u32 %v8195_v14, %v7266_v16  ;;  %v7472_v14 = vld [vmem:[#allocation20 + $0x328] sm:$0xf]  ;;  %v8249_v16 = vld [vmem:[#allocation20 + $0x334] sm:$0xf0] }
 0x4cf   :  { %4843 = vmatpush.bf16.msrb.mxu1 %v7217_v34  ;;  %4852 = vmatpush.bf16.msrb.mxu2 %v7409_v37  ;;  %v7329_v37 = vor.u32 %v8213_v24, %v7328_v22  ;;  %v7456_v24 = vld [vmem:[#allocation20 + $0x308] sm:$0xf] }
 0x4d0   :  { %v3891_v45 = vpop.f32.mrf.mxu0  ;;  %v3904_v49 = vpop.f32.mrf.mxu1 }
 0x4d1   :  { %v3892_v20 = vadd.f32 %v3891_v45, %v3081_v33  ;;  %v7553_v33 = vor.u32 %v8269_v42, %v7552_v41  ;;  %v8259_v41 = vld [vmem:[#allocation20 + $0x38c] sm:$0xf]  ;;  %v7522_v42 = vld [vmem:[#allocation20 + $0x398] sm:$0xf0] }
 0x4d2   :  { %4879 = vmatpush.bf16.msra.mxu0 %v7141_v38  ;;  %v7569_v38 = vor.u32 %v8273_v27, %v7568_v26  ;;  %v7330_v26 = vld [vmem:[#allocation20 + $0x218] sm:$0xf0]  ;;  %v8271_v27 = vld [vmem:[#allocation20 + $0x3ec] sm:$0xf] }
 0x4d3   :  { %4844 = vmatpush.bf16.msrb.mxu1 %v7201_v51  ;;  %4853 = vmatpush.bf16.msrb.mxu2 %v7393_v52  ;;  %v3905_v11 = vadd.f32 %v3904_v49, %v3892_v20  ;;  %v7426_v51 = vld [vmem:[#allocation20 + $0x2d8] sm:$0xf0]  ;;  %v7237_v52 = vor.u32 %v8187_v43, %v7234_v50  ;;  %v8179_v20 = vld [vmem:[#allocation20 + $0x10c] sm:$0xf]  ;;  %v7573_v31 = vor.u32 %v8271_v27, %v7570_v28  ;;  %v8292_v27 = vld [vmem:[#allocation23 + $0x90] sm:$0xff] }
 0x4d4   :  { %v7525_v43 = vor.u32 %v8259_v41, %v7522_v42  ;;  %v8290_v41 = vld [vmem:[#allocation23 + $0x80] sm:$0xff]  ;;  %v8305_v42 = vld [vmem:[#allocation23 + $0xf8] sm:$0xff] }
 0x4d6   :  { %4880 = vmatpush.bf16.msra.mxu0 %v7125_v53  ;;  %4845 = vmatmul.bf16.vlgmr.msrb.gmra.mxu1 %v9030_v61  ;;  %v7429_v53 = vor.u32 %v8235_v48, %v7426_v51  ;;  %v8251_v48 = vld [vmem:[#allocation20 + $0x34c] sm:$0xf]  ;;  %v7490_v51 = vld [vmem:[#allocation20 + $0x358] sm:$0xf0] }
 0x4d7   :  { %4889 = vmatpush.bf16.msra.mxu1 %v7317_v54  ;;  %4806 = vmatmul.bf16.vlgmr.msra.gmra.mxu2 %v9035_v46  ;;  %v8265_v54 = vld [vmem:[#allocation20 + $0x3b4] sm:$0xf0] }
 0x4d8   :  { %v3893_v3 = vpop.f32.mrf.mxu0  ;;  %v3906_v5 = vpop.f32.mrf.mxu1  ;;  %4854 = vmatpush.bf16.msrb.mxu2 %v7377_v63  ;;  %v7537_v60 = vor.u32 %v8265_v54, %v7536_v23  ;;  %v7413_v63 = vor.u32 %v8231_v57, %v7410_v59  ;;  %v8243_v54 = vld [vmem:[#allocation20 + $0x30c] sm:$0xf]  ;;  %v8281_v59 = vld [vmem:[#allocation23 + $0x38] sm:$0xff] }
 0x4d9   :  { %v7397_v5 = vor.u32 %v8227_v0, %v7394_v1  ;;  %v8277_v0 = vld [vmem:[#allocation23 + $0x18] sm:$0xff] }
 0x4da   :  { %4881 = vmatpush.bf16.msra.mxu0 %v7109_v19  ;;  %v7520_v19 = vld [vmem:[#allocation20 + $0x388] sm:$0xf]  ;;  %v8289_v1 = vld [vmem:[#allocation23 + $0x78] sm:$0xff] }
 0x4db   :  { %4890 = vmatpush.bf16.msra.mxu1 %v7301_v58  ;;  %v7202_v58 = vld [vmem:[#allocation20 + $0x118] sm:$0xf0]  ;;  %v7521_v2 = vor.u32 %v8261_v56, %v7520_v19  ;;  %v8279_v19 = vld [vmem:[#allocation23 + $0x28] sm:$0xff]  ;;  %v8278_v56 = vld [vmem:[#allocation23 + $0x20] sm:$0xff] }
 0x4dc   :  { %v3917_v15 = vpop.f32.mrf.mxu2  ;;  %v3930_v9 = vpop.f32.mrf.mxu3  ;;  %4855 = vmatpush.bf16.msrb.mxu2 %v7361_v8  ;;  %v7205_v3 = vor.u32 %v8179_v20, %v7202_v58  ;;  %v8223_v8 = vld [vmem:[#allocation20 + $0x26c] sm:$0xf] }
 0x4dd   :  { %v3918_v17 = vadd.f32 %v3917_v15, %v3905_v11 }
 0x4de   :  { %4882 = vmatpush.bf16.msra.mxu0 %v7093_v10  ;;  %v7378_v10 = vld [vmem:[#allocation20 + $0x278] sm:$0xf0] }
 0x4df   :  { %v3931_v62 = vadd.f32 %v3930_v9, %v3918_v17  ;;  %4891 = vmatpush.bf16.msra.mxu1 %v7285_v12  ;;  %v7381_v11 = vor.u32 %v8223_v8, %v7378_v10  ;;  %v7488_v12 = vld [vmem:[#allocation20 + $0x348] sm:$0xf]  ;;  %v7365_v9 = vor.u32 %v8219_v36, %v7362_v13  ;;  %v8215_v17 = vld [vmem:[#allocation20 + $0x22c] sm:$0xf]  ;;  %v8297_v36 = vld [vmem:[#allocation23 + $0xb8] sm:$0xff] }
 0x4e0   :  { %4856 = vmatpush.bf16.msrb.mxu2 %v7345_v18  ;;  %v7489_v15 = vor.u32 %v8253_v35, %v7488_v12  ;;  %v7346_v18 = vld [vmem:[#allocation20 + $0x238] sm:$0xf0]  ;;  %v8274_v8 = vld [vmem:[#allocation23] sm:$0xff]  ;;  %v8284_v13 = vld [vmem:[#allocation23 + $0x50] sm:$0xff] }
 0x4e1   :  { %v3937_v34 = vmax.f32 %v3931_v62, 0.0  ;;  %v7349_v22 = vor.u32 %v8215_v17, %v7346_v18  ;;  %v8245_v62 = vld [vmem:[#allocation20 + $0x314] sm:$0xf0]  ;;  %v8286_v10 = vld [vmem:[#allocation23 + $0x60] sm:$0xff]  ;;  %v8285_v35 = vld [vmem:[#allocation23 + $0x58] sm:$0xff] }
 0x4e2   :  { %4883 = vmatpush.bf16.msra.mxu0 %v7077_v21  ;;  %v7473_v21 = vor.u32 %v8249_v16, %v7472_v14  ;;  %v7457_v29 = vor.u32 %v8245_v62, %v7456_v24  ;;  %v8283_v16 = vld [vmem:[#allocation23 + $0x48] sm:$0xff]  ;;  %v8282_v18 = vld [vmem:[#allocation23 + $0x40] sm:$0xff] }
 0x4e3   :  { %v9043_v39 = vpack.c.bf16 %v3937_v34, %v3937_v34  ;;  %4892 = vmatpush.bf16.msra.mxu1 %v7269_v25  ;;  %v8211_v25 = vld [vmem:[#allocation20 + $0x20c] sm:$0xf]  ;;  %v7554_v34 = vld [vmem:[#allocation20 + $0x3d8] sm:$0xf0] }
 0x4e4   :  { %v3919_v45 = vpop.f32.mrf.mxu2  ;;  %v3932_v49 = vpop.f32.mrf.mxu3  ;;  %4857 = vmatpush.bf16.msrb.mxu2 %v7329_v37  ;;  %v7557_v37 = vor.u32 %v8267_v32, %v7554_v34  ;;  %v8295_v17 = vld [vmem:[#allocation23 + $0xa8] sm:$0xff] }
 0x4e5   :  { %4767 = vmatmul.bf16.vlgmr.msrb.gmra.mxu3 %v9043_v39  ;;  %4884 = vmatmul.bf16.vlgmr.msra.gmra.mxu0 %v9027_v30  ;;  %v7221_v30 = vor.u32 %v8183_v55, %v7218_v44  ;;  %v8255_v45 = vld [vmem:[#allocation20 + $0x36c] sm:$0xf]  ;;  %v7506_v49 = vld [vmem:[#allocation20 + $0x378] sm:$0xf0] }
 0x4e6   :  { %4863 = vmatpush.bf16.msrb.mxu3 %v7569_v38  ;;  %v8263_v38 = vld [vmem:[#allocation20 + $0x3ac] sm:$0xf]  ;;  %v7509_v50 = vor.u32 %v8255_v45, %v7506_v49  ;;  %5196 = vmatpush.bf16.msrb.mxu0 %v8281_v59 }
 0x4e7   :  { %4893 = vmatpush.bf16.msra.mxu1 %v7253_v40  ;;  %4858 = vmatmul.bf16.vlgmr.msrb.gmra.mxu2 %v9035_v46  ;;  %v7538_v40 = vld [vmem:[#allocation20 + $0x3b8] sm:$0xf0]  ;;  %v8291_v34 = vld [vmem:[#allocation23 + $0x88] sm:$0xff] }
 0x4e8   :  { %4902 = vmatpush.bf16.msra.mxu2 %v7445_v4  ;;  %v7541_v4 = vor.u32 %v8263_v38, %v7538_v40 }
 0x4ea   :  { %4864 = vmatpush.bf16.msrb.mxu3 %v7553_v33  ;;  %v7493_v33 = vor.u32 %v8251_v48, %v7490_v51  ;;  %v8303_v51 = vld [vmem:[#allocation23 + $0xe8] sm:$0xff] }
 0x4eb   :  { %4894 = vmatpush.bf16.msra.mxu1 %v7237_v52  ;;  %v8247_v52 = vld [vmem:[#allocation20 + $0x32c] sm:$0xf] }
 0x4ec   :  { %4903 = vmatpush.bf16.msra.mxu2 %v7429_v53  ;;  %v7474_v53 = vld [vmem:[#allocation20 + $0x338] sm:$0xf0] }
 0x4ed   :  { %v7477_v23 = vor.u32 %v8247_v52, %v7474_v53 }
 0x4ee   :  { %4865 = vmatpush.bf16.msrb.mxu3 %v7537_v60  ;;  %v8280_v60 = vld [vmem:[#allocation23 + $0x30] sm:$0xff] }
 0x4ef   :  { %4895 = vmatpush.bf16.msra.mxu1 %v7221_v30  ;;  %5197 = vmatpush.bf16.msrb.mxu0 %v8280_v60 }
 0x4f0   :  { %4904 = vmatpush.bf16.msra.mxu2 %v7413_v63 }
 0x4f2   :  { %4866 = vmatpush.bf16.msrb.mxu3 %v7521_v2  ;;  %v8288_v2 = vld [vmem:[#allocation23 + $0x70] sm:$0xff] }
 0x4f3   :  { %4896 = vmatpush.bf16.msra.mxu1 %v7205_v3  ;;  %5198 = vmatpush.bf16.msrb.mxu0 %v8279_v19  ;;  %v8300_v19 = vld [vmem:[#allocation23 + $0xd0] sm:$0xff] }
 0x4f4   :  { %4905 = vmatpush.bf16.msra.mxu2 %v7397_v5 }
 0x4f5   :  { %4819 = vmatmul.bf16.vlgmr.msra.gmra.mxu3 %v9043_v39 }
 0x4f6   :  { %4867 = vmatpush.bf16.msrb.mxu3 %v7505_v47  ;;  %4897 = vmatmul.bf16.vlgmr.msra.gmra.mxu1 %v9030_v61  ;;  %v7333_v61 = vor.u32 %v8211_v25, %v7330_v26  ;;  %v8293_v26 = vld [vmem:[#allocation23 + $0x98] sm:$0xff] }
 0x4f7   :  { %5199 = vmatpush.bf16.msrb.mxu0 %v8278_v56  ;;  %5209 = vmatpush.bf16.msrb.mxu1 %v8289_v1 }
 0x4f8   :  { %4906 = vmatpush.bf16.msra.mxu2 %v7381_v11 }
 0x4fa   :  { %4868 = vmatpush.bf16.msrb.mxu3 %v7489_v15  ;;  %v8296_v15 = vld [vmem:[#allocation23 + $0xb0] sm:$0xff] }
 0x4fb   :  { %5200 = vmatpush.bf16.msrb.mxu0 %v8277_v0  ;;  %5210 = vmatpush.bf16.msrb.mxu1 %v8288_v2 }
 0x4fc   :  { %4907 = vmatpush.bf16.msra.mxu2 %v7365_v9 }
 0x4fe   :  { %4869 = vmatpush.bf16.msrb.mxu3 %v7473_v21  ;;  %v8294_v21 = vld [vmem:[#allocation23 + $0xa0] sm:$0xff] }
 0x4ff   :  { %5211 = vmatpush.bf16.msrb.mxu1 %v8287_v7 }
 0x500   :  { %4908 = vmatpush.bf16.msra.mxu2 %v7349_v22  ;;  %v9061_v22 = vld [vmem:[#allocation22] sm:$0xf] }
 0x501   :  { %v4072_v25 = vperm.slane %v9061_v22, 0  ;;  %v4073_v49 = vperm.slane %v9061_v22, 1  ;;  %v4074_v56 = vperm.slane %v9061_v22, 2 }
 0x502   :  { %4870 = vmatpush.bf16.msrb.mxu3 %v7457_v29 }
 0x503   :  { %5212 = vmatpush.bf16.msrb.mxu1 %v8286_v10 }
 0x504   :  { %4909 = vmatpush.bf16.msra.mxu2 %v7333_v61 }
 0x505   :  { %4871 = vmatmul.bf16.vlgmr.msrb.gmra.mxu3 %v9043_v39 }
 0x506   :  { %4915 = vmatpush.bf16.msra.mxu3 %v7573_v31 }
 0x507   :  { %4910 = vmatmul.bf16.vlgmr.msra.gmra.mxu2 %v9035_v46  ;;  %v7458_v46 = vld [vmem:[#allocation20 + $0x318] sm:$0xf0]  ;;  %5213 = vmatpush.bf16.msrb.mxu1 %v8285_v35 }
 0x508   :  { %v7461_v55 = vor.u32 %v8243_v54, %v7458_v46  ;;  %5222 = vmatpush.bf16.msrb.mxu2 %v8297_v36  ;;  %v8302_v54 = vld [vmem:[#allocation23 + $0xe0] sm:$0xff] }
 0x50a   :  { %4916 = vmatpush.bf16.msra.mxu3 %v7557_v37 }
 0x50b   :  { %5214 = vmatpush.bf16.msrb.mxu1 %v8284_v13 }
 0x50c   :  { %5223 = vmatpush.bf16.msrb.mxu2 %v8296_v15 }
 0x50e   :  { %4917 = vmatpush.bf16.msra.mxu3 %v7541_v4 }
 0x50f   :  { %5215 = vmatpush.bf16.msrb.mxu1 %v8283_v16 }
 0x510   :  { %5224 = vmatpush.bf16.msrb.mxu2 %v8295_v17 }
 0x512   :  { %4918 = vmatpush.bf16.msra.mxu3 %v7525_v43 }
 0x513   :  { %5216 = vmatpush.bf16.msrb.mxu1 %v8282_v18 }
 0x514   :  { %5225 = vmatpush.bf16.msrb.mxu2 %v8294_v21 }
 0x516   :  { %4919 = vmatpush.bf16.msra.mxu3 %v7509_v50  ;;  %v8304_v50 = vld [vmem:[#allocation23 + $0xf0] sm:$0xff] }
 0x518   :  { %5226 = vmatpush.bf16.msrb.mxu2 %v8293_v26 }
 0x51a   :  { %4920 = vmatpush.bf16.msra.mxu3 %v7493_v33 }
 0x51c   :  { %5227 = vmatpush.bf16.msrb.mxu2 %v8292_v27 }
 0x51e   :  { %4921 = vmatpush.bf16.msra.mxu3 %v7477_v23 }
 0x520   :  { %5228 = vmatpush.bf16.msrb.mxu2 %v8291_v34 }
 0x522   :  { %4922 = vmatpush.bf16.msra.mxu3 %v7461_v55  ;;  %v4729_v44 = vpop.f32.mrf.mxu0 }
 0x523   :  { %v4730_v29 = vadd.f32 %v4729_v44, %v4072_v25  ;;  %v8327_v25 = vld [vmem:[%s9094_s17] ss:$0 sm:$0xff] }
 0x524   :  { %5229 = vmatpush.bf16.msrb.mxu2 %v8290_v41 }
 0x525   :  { %4923 = vmatmul.bf16.vlgmr.msra.gmra.mxu3 %v9043_v39  ;;  %v8276_v39 = vld [vmem:[#allocation23 + $0x10] sm:$0xff] }
 0x526   :  { %5201 = vmatpush.bf16.msrb.mxu0 %v8276_v39  ;;  %5235 = vmatpush.bf16.msrb.mxu3 %v8305_v42  ;;  %v8298_v39 = vld [vmem:[#allocation23 + $0xc0] sm:$0xff] }
 0x52a   :  { %v4731_v57 = vpop.f32.mrf.mxu0  ;;  %5202 = vmatpush.bf16.msrb.mxu0 %v8275_v6  ;;  %5236 = vmatpush.bf16.msrb.mxu3 %v8304_v50 }
 0x52b   :  { %v8301_v57 = vld [vmem:[#allocation23 + $0xd8] sm:$0xff] }
 0x52e   :  { %5203 = vmatpush.bf16.msrb.mxu0 %v8274_v8  ;;  %5237 = vmatpush.bf16.msrb.mxu3 %v8303_v51 }
 0x532   :  { %v4742_v30 = vpop.f32.mrf.mxu1  ;;  %v9053_v63 = vpop.f32.mrf.mxu0  ;;  %5238 = vmatpush.bf16.msrb.mxu3 %v8302_v54 }
 0x533   :  { %v4743_v31 = vadd.f32 %v4742_v30, %v4730_v29  ;;  %v4782_v33 = vadd.f32 %v9053_v63, %v4073_v49 }
 0x536   :  { %5239 = vmatpush.bf16.msrb.mxu3 %v8301_v57 }
 0x53a   :  { %v4744_v20 = vpop.f32.mrf.mxu1  ;;  %v4783_v58 = vpop.f32.mrf.mxu0  ;;  %5240 = vmatpush.bf16.msrb.mxu3 %v8300_v19 }
 0x53b   :  { %v8299_v58 = vld [vmem:[#allocation23 + $0xc8] sm:$0xff] }
 0x53e   :  { %5241 = vmatpush.bf16.msrb.mxu3 %v8299_v58 }
 0x542   :  { %v9055_v3 = vpop.f32.mrf.mxu1  ;;  %v9057_v5 = vpop.f32.mrf.mxu0  ;;  %5242 = vmatpush.bf16.msrb.mxu3 %v8298_v39 }
 0x543   :  { %v4795_v23 = vadd.f32 %v9055_v3, %v4782_v33  ;;  %v4834_v20 = vadd.f32 %v9057_v5, %v4074_v56 }
 0x549   :  { %v4755_v47 = vpop.f32.mrf.mxu2 }
 0x54a   :  { %v4796_v11 = vpop.f32.mrf.mxu1  ;;  %v4835_v12 = vpop.f32.mrf.mxu0  ;;  %v4756_v32 = vadd.f32 %v4755_v47, %v4743_v31 }
 0x54b   :  { %v4075_v11 = vperm.slane %v9061_v22, 3 }
 0x551   :  { %v4757_v9 = vpop.f32.mrf.mxu2 }
 0x553   :  { %v9059_v14 = vpop.f32.mrf.mxu1 }
 0x554   :  { %v4847_v0 = vadd.f32 %v9059_v14, %v4834_v20 }
 0x55a   :  { %v4807_v24 = vpop.f32.mrf.mxu2 }
 0x55b   :  { %v4848_v62 = vpop.f32.mrf.mxu1  ;;  %v4808_v46 = vadd.f32 %v4807_v24, %v4795_v23 }
 0x562   :  { %v4885_v28 = vpop.f32.mrf.mxu0  ;;  %v4809_v61 = vpop.f32.mrf.mxu2 }
 0x563   :  { %v4886_v12 = vadd.f32 %v4885_v28, %v4075_v11 }
 0x568   :  { %v4768_v37 = vpop.f32.mrf.mxu3 }
 0x569   :  { %v4769_v38 = vadd.f32 %v4768_v37, %v4756_v32 }
 0x56a   :  { %v4887_v40 = vpop.f32.mrf.mxu0  ;;  %v4859_v43 = vpop.f32.mrf.mxu2 }
 0x56b   :  { %v4928_v4 = vmax.f32 %v4769_v38, 0.0  ;;  %v4860_v1 = vadd.f32 %v4859_v43, %v4847_v0 }
 0x56d   :  { %v4932_v45 = vpack.c.bf16 %v4928_v4, %v4928_v4 }
 0x56f   :  { %5204 = vmatmul.bf16.vlgmr.msrb.gmra.mxu0 %v4932_v45 }
 0x570   :  { %v4770_v48 = vpop.f32.mrf.mxu3 }
 0x572   :  { %v4861_v53 = vpop.f32.mrf.mxu2 }
 0x573   :  { %v4898_v52 = vpop.f32.mrf.mxu1 }
 0x574   :  { %v4899_v35 = vadd.f32 %v4898_v52, %v4886_v12 }
 0x578   :  { %v4820_v55 = vpop.f32.mrf.mxu3 }
 0x579   :  { %v4821_v44 = vadd.f32 %v4820_v55, %v4808_v46 }
 0x57b   :  { %v4929_v59 = vmax.f32 %v4821_v44, 0.0  ;;  %v4900_v60 = vpop.f32.mrf.mxu1 }
 0x57d   :  { %v4933_v30 = vpack.c.bf16 %v4929_v59, %v4929_v59 }
 0x57f   :  { %5217 = vmatmul.bf16.vlgmr.msrb.gmra.mxu1 %v4933_v30 }
 0x580   :  { %v4822_v63 = vpop.f32.mrf.mxu3 }
 0x588   :  { %v4872_v2 = vpop.f32.mrf.mxu3 }
 0x589   :  { %v4873_v3 = vadd.f32 %v4872_v2, %v4860_v1 }
 0x58a   :  { %v4911_v6 = vpop.f32.mrf.mxu2 }
 0x58b   :  { %v4930_v7 = vmax.f32 %v4873_v3, 0.0  ;;  %v4912_v5 = vadd.f32 %v4911_v6, %v4899_v35 }
 0x58d   :  { %v4934_v8 = vpack.c.bf16 %v4930_v7, %v4930_v7 }
 0x58f   :  { %5230 = vmatmul.bf16.vlgmr.msrb.gmra.mxu2 %v4934_v8 }
 0x590   :  { %v4874_v10 = vpop.f32.mrf.mxu3 }
 0x592   :  { %v4913_v47 = vpop.f32.mrf.mxu2 }
 0x5a8   :  { %v4924_v36 = vpop.f32.mrf.mxu3 }
 0x5a9   :  { %v4925_v13 = vadd.f32 %v4924_v36, %v4912_v5 }
 0x5ab   :  { %v4931_v15 = vmax.f32 %v4925_v13, 0.0 }
 0x5ad   :  { %v4935_v9 = vpack.c.bf16 %v4931_v15, %v4931_v15 }
 0x5af   :  { %5243 = vmatmul.bf16.vlgmr.msrb.gmra.mxu3 %v4935_v9 }
 0x5b0   :  { %v4926_v14 = vpop.f32.mrf.mxu3 }
 0x5ec   :  { %v5205_v16 = vpop.f32.mrf.mxu0 }
 0x5ed   :  { %v5206_v22 = vadd.f32 %v8327_v25, %v5205_v16 }
 0x5f4   :  { %v5207_v17 = vpop.f32.mrf.mxu0 }
 0x5fc   :  { %v5218_v18 = vpop.f32.mrf.mxu1 }
 0x5fd   :  { %v5219_v26 = vadd.f32 %v5218_v18, %v5206_v22 }
 0x604   :  { %v5220_v21 = vpop.f32.mrf.mxu1 }
 0x612   :  { %v5231_v24 = vpop.f32.mrf.mxu2 }
 0x613   :  { %v5232_v27 = vadd.f32 %v5231_v24, %v5219_v26 }
 0x61a   :  { %v5233_v62 = vpop.f32.mrf.mxu2 }
 0x632   :  { %v5244_v28 = vpop.f32.mrf.mxu3 }
 0x633   :  { %v5245_v29 = vadd.f32 %v5244_v28, %v5232_v27 }
 0x635   :  { %5248 = vst [vmem:[#allocation25] sm:$0xff] %v5245_v29 }
 0x636   :  { %5260 = dma.vmem_to_hbm [thread:$0]  %s5256_s26, 128, %s5258_s8, [#allocation4]  }
 0x63a   :  { %v5246_v61 = vpop.f32.mrf.mxu3 }
 0x63b   :  { %8706 = dma.done.wait [#allocation4], 128  }
 0x63c   :  { %8707 = vsyncadd [#allocation4], 4294967168 }
 0x63d   :  { %5269 = vsyncpa [#allocation3], 1 }
 0x63e   :  { %5270 = vsyncpa [#allocation6], 1 }
 0x63f   :  { %5271 = vsyncpa [#allocation9], 1 }
 0x640   :  { %5272 = vsyncpa [#allocation12], 1 }
 0x641   :  { %5273 = vsyncpa [#allocation15], 1 }
 0x642   :  { %5274 = vsyncpa [#allocation18], 1 }
 0x643   :  { %5275 = vsyncpa [#allocation21], 1 }
 0x644   :  { %5276 = vsyncpa [#allocation24], 1 }
 0x645   :  { %5277 = vsyncpa [#allocation4], 1 }

</bundles_post_ra>
